<compile_context>
chip_gen: v7x
topology: tpu7x:2x2x1
jax: 0.10.0
libtpu: 0.0.40
codegen_flags: <defaults>
</compile_context>

<pallas_src>
import math

import jax
import jax.numpy as jnp
from jax.experimental import pallas as pl
from jax.experimental.pallas import tpu as pltpu

# ----------------------- small synthetic configuration -----------------------
B = 2              # batch
T = 2              # num crops per image
N_PATCH = 16       # patches per crop
N_PIX = 48         # flattened pixels per patch (4*4*3)
EMB = 64           # vit image_emb_dim
HEADS = 4          # vit image_num_heads
HEAD_DIM = 16      # vit image_head_dim
INNER = HEADS * HEAD_DIM          # 64
VIT_MLP = 128      # vit mlp hidden dim
NUM_VIT_LAYERS = 2
VIT_LAYERS_CFG = (-1,)
PREFIX = 1         # num_prefix_tokens (class token)
D_MODEL = 128      # llm d_model
MLP_HIDDEN = 256   # llm mlp_hidden_size -> projector half width = 128
PROJ_H = MLP_HIDDEN // 2
NP_POOL = 8        # pooled tokens per batch element
PS_POOL = 4        # patches pooled per token (2x2 pooling window)
LN_EPS = 1e-5

POOL_DIM = EMB * len(VIT_LAYERS_CFG)
BT = B * T
SEQ = N_PATCH + PREFIX            # 17
NPOOL_TOK = B * NP_POOL           # 16
_SCALE = 1.0 / math.sqrt(HEAD_DIM)


def _bf16(x):
    return x.astype(jnp.bfloat16)


def _ln(x, g, b):
    mu = jnp.mean(x, axis=-1, keepdims=True)
    var = jnp.mean(jnp.square(x - mu), axis=-1, keepdims=True)
    return (x - mu) * jax.lax.rsqrt(var + LN_EPS) * g + b


# ------------------------------ Pallas kernels -------------------------------
def _embed_kernel(img_ref, pw_ref, pb_ref, pos_ref, g_ref, b_ref, o_ref):
    """Patch linear + positional embed + pre-LN for one crop (patch rows only)."""
    img = img_ref[0]                                               # (N_PATCH, N_PIX)
    x = jnp.dot(_bf16(img), _bf16(pw_ref[...]),
                preferred_element_type=jnp.float32) + pb_ref[...]
    x = x + pos_ref[...]
    o_ref[0] = _ln(x, g_ref[...], b_ref[...])


def _attn_block_kernel(x_ref, g_ref, b_ref, wqkv_ref, bqkv_ref, wo_ref, bo_ref, o_ref):
    """x + MHA(LN1(x)) for one crop, fully fused (fused QKV, in-kernel heads)."""
    x = x_ref[0]                                                   # (SEQ, EMB) f32
    h = _ln(x, g_ref[...], b_ref[...])
    qkv = jnp.dot(_bf16(h), _bf16(wqkv_ref[...]),
                  preferred_element_type=jnp.float32) + bqkv_ref[...]
    q = qkv[:, :INNER] * _SCALE
    k = qkv[:, INNER:2 * INNER]
    v = qkv[:, 2 * INNER:]

    out = None
    for hh in range(HEADS):
        sl = slice(hh * HEAD_DIM, (hh + 1) * HEAD_DIM)
        qh, kh, vh = _bf16(q[:, sl]), _bf16(k[:, sl]), _bf16(v[:, sl])
        # NT contraction (no explicit k.T)
        s = jax.lax.dot_general(qh, kh, (((1,), (1,)), ((), ())),
                                preferred_element_type=jnp.float32)  # (SEQ, SEQ)
        s = s - jnp.max(s, axis=-1, keepdims=True)
        p = jnp.exp(s)
        p = p * pl.reciprocal(jnp.sum(p, axis=-1, keepdims=True), approx=True)
        oh = jnp.dot(_bf16(p), vh, preferred_element_type=jnp.float32)   # (SEQ, HD)
        # accumulate through the matching wo slice (== concat-heads @ wo)
        c = jnp.dot(_bf16(oh), _bf16(wo_ref[sl, :]),
                    preferred_element_type=jnp.float32)                  # (SEQ, EMB)
        out = c if out is None else out + c
    o_ref[0] = x + out + bo_ref[...]


def _mlp_block_kernel(x_ref, g_ref, b_ref, w1_ref, b1_ref, w2_ref, b2_ref, o_ref):
    """x + MLP(LN2(x)) for one crop, fully fused."""
    x = x_ref[0]                                                   # (SEQ, EMB)
    h = _ln(x, g_ref[...], b_ref[...])
    a = jnp.dot(_bf16(h), _bf16(w1_ref[...]),
                preferred_element_type=jnp.float32) + b1_ref[...]
    a = a * jax.nn.sigmoid(1.702 * a)                              # quick_gelu
    y = jnp.dot(_bf16(a), _bf16(w2_ref[...]),
                preferred_element_type=jnp.float32) + b2_ref[...]
    o_ref[0] = x + y


def _pool_attn_kernel(tp_ref, val_ref, wq_ref, bq_ref, wkv_ref, bkv_ref,
                      wo_ref, bo_ref, o_ref):
    """attention_meanq pooling: mask + mean-query + MHA, all pooled tokens at once.

    tp_ref is laid out slot-major: rows [s*M : (s+1)*M] hold pooling slot s for
    all M = B*NP pooled tokens, so per-slot views are static contiguous slices.
    """
    n = NPOOL_TOK
    tp = tp_ref[...] * val_ref[...]                                # (PS*M, POOL_DIM)

    # mean query over the PS pooling slots (matches reference: divide by PS)
    q_in = tp[0:n]
    for s in range(1, PS_POOL):
        q_in = q_in + tp[s * n:(s + 1) * n]
    q_in = q_in * (1.0 / PS_POOL)

    q = jnp.dot(_bf16(q_in), _bf16(wq_ref[...]),
                preferred_element_type=jnp.float32) + bq_ref[...]   # (M, INNER)
    kv = jnp.dot(_bf16(tp), _bf16(wkv_ref[...]),
                 preferred_element_type=jnp.float32) + bkv_ref[...]  # (PS*M, 2*INNER)

    out = None
    for hh in range(HEADS):
        sl = slice(hh * HEAD_DIM, (hh + 1) * HEAD_DIM)
        qh = q[:, sl] * _SCALE                                     # (M, HD)
        # per-slot scores: row-wise dot(qh, k_slot)  -> (M, 1) each
        scores = []
        for s in range(PS_POOL):
            kh = kv[s * n:(s + 1) * n, sl]
            scores.append(jnp.sum(qh * kh, axis=-1, keepdims=True))
        m = scores[0]
        for sc in scores[1:]:
            m = jnp.maximum(m, sc)
        exps = [jnp.exp(sc - m) for sc in scores]
        denom = exps[0]
        for e in exps[1:]:
            denom = denom + e
        r = pl.reciprocal(denom, approx=True)
        oh = None
        for s in range(PS_POOL):
            vh = kv[s * n:(s + 1) * n, INNER + hh * HEAD_DIM:INNER + (hh + 1) * HEAD_DIM]
            contrib = (exps[s] * r) * vh
            oh = contrib if oh is None else oh + contrib           # (M, HD)
        c = jnp.dot(_bf16(oh), _bf16(wo_ref[sl, :]),
                    preferred_element_type=jnp.float32)            # (M, EMB)
        out = c if out is None else out + c
    o_ref[...] = out + bo_ref[...]


def _proj_kernel(x_ref, w13_ref, w2_ref, o_ref):
    """ImageProjectorMLP (SwiGLU): w2(silu(w1 x) * w3 x), w1|w3 fused."""
    x = x_ref[...]
    hg = jnp.dot(_bf16(x), _bf16(w13_ref[...]),
                 preferred_element_type=jnp.float32)               # (M, 2*PROJ_H)
    a = hg[:, :PROJ_H]
    gate = hg[:, PROJ_H:]
    h = jax.nn.silu(a) * gate
    o_ref[...] = jnp.dot(_bf16(h), _bf16(w2_ref[...]),
                         preferred_element_type=jnp.float32)


# ------------------------------ kernel wrappers -------------------------------
_EMBED_FLOPS = 2 * BT * N_PATCH * N_PIX * EMB
_ATTN_FLOPS = BT * (2 * SEQ * EMB * 3 * INNER
                    + HEADS * (4 * SEQ * SEQ * HEAD_DIM + 2 * SEQ * HEAD_DIM * EMB))
_MLP_FLOPS = BT * 4 * SEQ * EMB * VIT_MLP
_POOL_FLOPS = (2 * NPOOL_TOK * POOL_DIM * INNER
               + 2 * PS_POOL * NPOOL_TOK * POOL_DIM * 2 * INNER
               + HEADS * 2 * NPOOL_TOK * HEAD_DIM * EMB)
_PROJ_FLOPS = 2 * NPOOL_TOK * EMB * 2 * PROJ_H + 2 * NPOOL_TOK * PROJ_H * D_MODEL


def vit_embed(images_bt, v):
    return pl.pallas_call(
        _embed_kernel,
        out_shape=jax.ShapeDtypeStruct((BT, N_PATCH, EMB), jnp.float32),
        grid=(BT,),
        in_specs=[
            pl.BlockSpec((1, N_PATCH, N_PIX), lambda i: (i, 0, 0)),
            pl.BlockSpec((N_PIX, EMB), lambda i: (0, 0)),
            pl.BlockSpec((1, EMB), lambda i: (0, 0)),
            pl.BlockSpec((N_PATCH, EMB), lambda i: (0, 0)),
            pl.BlockSpec((1, EMB), lambda i: (0, 0)),
            pl.BlockSpec((1, EMB), lambda i: (0, 0)),
        ],
        out_specs=pl.BlockSpec((1, N_PATCH, EMB), lambda i: (i, 0, 0)),
        compiler_params=pltpu.CompilerParams(dimension_semantics=("parallel",)),
        cost_estimate=pl.CostEstimate(
            flops=_EMBED_FLOPS, transcendentals=0,
            bytes_accessed=4 * (BT * N_PATCH * (N_PIX + EMB) + N_PIX * EMB + N_PATCH * EMB)),
    )(images_bt, v["patch_w"], v["patch_b"], v["pos_patch"], v["pre_g"], v["pre_b"])


def attn_block(x, blk):
    return pl.pallas_call(
        _attn_block_kernel,
        out_shape=jax.ShapeDtypeStruct((BT, SEQ, EMB), jnp.float32),
        grid=(BT,),
        in_specs=[
            pl.BlockSpec((1, SEQ, EMB), lambda i: (i, 0, 0)),
            pl.BlockSpec((1, EMB), lambda i: (0, 0)),
            pl.BlockSpec((1, EMB), lambda i: (0, 0)),
            pl.BlockSpec((EMB, 3 * INNER), lambda i: (0, 0)),
            pl.BlockSpec((1, 3 * INNER), lambda i: (0, 0)),
            pl.BlockSpec((INNER, EMB), lambda i: (0, 0)),
            pl.BlockSpec((1, EMB), lambda i: (0, 0)),
        ],
        out_specs=pl.BlockSpec((1, SEQ, EMB), lambda i: (i, 0, 0)),
        compiler_params=pltpu.CompilerParams(dimension_semantics=("parallel",)),
        cost_estimate=pl.CostEstimate(
            flops=_ATTN_FLOPS, transcendentals=BT * HEADS * SEQ * SEQ,
            bytes_accessed=4 * (2 * BT * SEQ * EMB + EMB * 3 * INNER + INNER * EMB)),
    )(x, blk["ln1_g"], blk["ln1_b"], blk["wqkv"], blk["bqkv"], blk["wo"], blk["bo"])


def mlp_block(x, blk):
    return pl.pallas_call(
        _mlp_block_kernel,
        out_shape=jax.ShapeDtypeStruct((BT, SEQ, EMB), jnp.float32),
        grid=(BT,),
        in_specs=[
            pl.BlockSpec((1, SEQ, EMB), lambda i: (i, 0, 0)),
            pl.BlockSpec((1, EMB), lambda i: (0, 0)),
            pl.BlockSpec((1, EMB), lambda i: (0, 0)),
            pl.BlockSpec((EMB, VIT_MLP), lambda i: (0, 0)),
            pl.BlockSpec((1, VIT_MLP), lambda i: (0, 0)),
            pl.BlockSpec((VIT_MLP, EMB), lambda i: (0, 0)),
            pl.BlockSpec((1, EMB), lambda i: (0, 0)),
        ],
        out_specs=pl.BlockSpec((1, SEQ, EMB), lambda i: (i, 0, 0)),
        compiler_params=pltpu.CompilerParams(dimension_semantics=("parallel",)),
        cost_estimate=pl.CostEstimate(
            flops=_MLP_FLOPS, transcendentals=BT * SEQ * VIT_MLP,
            bytes_accessed=4 * (2 * BT * SEQ * EMB + 2 * EMB * VIT_MLP)),
    )(x, blk["ln2_g"], blk["ln2_b"], blk["w1"], blk["b1"], blk["w2"], blk["b2"])


def pool_attention(to_pool_t, valid_t, p):
    return pl.pallas_call(
        _pool_attn_kernel,
        out_shape=jax.ShapeDtypeStruct((NPOOL_TOK, EMB), jnp.float32),
        grid=(1,),
        in_specs=[
            pl.BlockSpec((PS_POOL * NPOOL_TOK, POOL_DIM), lambda i: (0, 0)),
            pl.BlockSpec((PS_POOL * NPOOL_TOK, 1), lambda i: (0, 0)),
            pl.BlockSpec((POOL_DIM, INNER), lambda i: (0, 0)),
            pl.BlockSpec((1, INNER), lambda i: (0, 0)),
            pl.BlockSpec((POOL_DIM, 2 * INNER), lambda i: (0, 0)),
            pl.BlockSpec((1, 2 * INNER), lambda i: (0, 0)),
            pl.BlockSpec((INNER, EMB), lambda i: (0, 0)),
            pl.BlockSpec((1, EMB), lambda i: (0, 0)),
        ],
        out_specs=pl.BlockSpec((NPOOL_TOK, EMB), lambda i: (0, 0)),
        compiler_params=pltpu.CompilerParams(dimension_semantics=("arbitrary",)),
        cost_estimate=pl.CostEstimate(
            flops=_POOL_FLOPS, transcendentals=HEADS * PS_POOL * NPOOL_TOK,
            bytes_accessed=4 * (PS_POOL * NPOOL_TOK * (POOL_DIM + 1)
                                + NPOOL_TOK * EMB + POOL_DIM * 3 * INNER + INNER * EMB)),
    )(to_pool_t, valid_t, p["wq"], p["bq"], p["wkv"], p["bkv"], p["wo"], p["bo"])


def image_projector(x, p):
    return pl.pallas_call(
        _proj_kernel,
        out_shape=jax.ShapeDtypeStruct((NPOOL_TOK, D_MODEL), jnp.float32),
        grid=(1,),
        in_specs=[
            pl.BlockSpec((NPOOL_TOK, EMB), lambda i: (0, 0)),
            pl.BlockSpec((EMB, 2 * PROJ_H), lambda i: (0, 0)),
            pl.BlockSpec((PROJ_H, D_MODEL), lambda i: (0, 0)),
        ],
        out_specs=pl.BlockSpec((NPOOL_TOK, D_MODEL), lambda i: (0, 0)),
        compiler_params=pltpu.CompilerParams(dimension_semantics=("arbitrary",)),
        cost_estimate=pl.CostEstimate(
            flops=_PROJ_FLOPS, transcendentals=NPOOL_TOK * PROJ_H,
            bytes_accessed=4 * (NPOOL_TOK * (EMB + D_MODEL)
                                + EMB * 2 * PROJ_H + PROJ_H * D_MODEL)),
    )(x, p["w13"], p["w2"])


# ------------------------------ forward pass ----------------------------------
@jax.jit
def molmo_vision_backbone_forward(params, images, image_masks, pooled_patches_idx):
    """images: (B, T, N_PATCH, N_PIX); pooled_patches_idx: (B, NP, PS) int32."""
    del image_masks  # image_padding_embed is None -> mask branch is skipped
    v = params["vit"]

    # ----- encode_image: fused patch-embed + pos + pre-LN (patch rows) -----
    patches = vit_embed(images.reshape(BT, N_PATCH, N_PIX), v)     # (BT, N, EMB)

    # class-token row: LN(class_emb + pos[0]) -- a single 64-vector, plain JAX.
    cls_row = v["class_emb"] + v["pos_cls"]                        # (1, EMB)
    mu = jnp.mean(cls_row, axis=-1, keepdims=True)
    var = jnp.mean(jnp.square(cls_row - mu), axis=-1, keepdims=True)
    cls_ln = (cls_row - mu) * jax.lax.rsqrt(var + LN_EPS) * v["pre_g"] + v["pre_b"]
    x = jnp.concatenate(
        [jnp.broadcast_to(cls_ln[None], (BT, 1, EMB)), patches], axis=1)  # (BT, SEQ, EMB)

    hidden = []
    for blk in v["blocks"]:
        x = attn_block(x, blk)
        x = mlp_block(x, blk)
        hidden.append(x)

    vit_layers = [l if l >= 0 else NUM_VIT_LAYERS + l for l in VIT_LAYERS_CFG]
    feats = jnp.concatenate([hidden[l] for l in vit_layers], axis=-1)
    feats = feats[:, PREFIX:]                                      # drop class token
    feats = feats.reshape(B, T * N_PATCH, POOL_DIM)
    # image_feature_dropout = 0.0 -> identity

    # ----- pooled-patch gather (XLA gather) + fused attention_meanq pooling -----
    valid = pooled_patches_idx >= 0                                # (B, NP, PS)
    valid_token = jnp.any(valid, axis=-1)                          # (B, NP)
    idx = jnp.maximum(pooled_patches_idx, 0)
    batch_idx = jnp.broadcast_to(jnp.arange(B)[:, None, None], idx.shape)
    to_pool = feats[batch_idx, idx]                                # (B, NP, PS, dim)

    # slot-major 2D layout so per-slot views in the kernel are static slices
    to_pool_t = (to_pool.reshape(NPOOL_TOK, PS_POOL, POOL_DIM)
                 .transpose(1, 0, 2).reshape(PS_POOL * NPOOL_TOK, POOL_DIM))
    valid_t = (valid.reshape(NPOOL_TOK, PS_POOL)
               .transpose(1, 0).reshape(PS_POOL * NPOOL_TOK, 1).astype(jnp.float32))

    pooled = pool_attention(to_pool_t, valid_t, params["pool"])    # (B*NP, EMB)
    proj = image_projector(pooled, params["proj"])                 # (B*NP, D_MODEL)
    return proj.reshape(B, NP_POOL, D_MODEL), valid_token


# ---------------------------- deterministic params ---------------------------
def init_params(key):
    keys = iter(jax.random.split(key, 64))

    def nrm(shape, std=0.02):
        return jax.random.normal(next(keys), shape, jnp.float32) * std

    def attn_params(din, dout):
        return dict(
            wq=nrm((din, INNER)), bq=jnp.zeros((INNER,), jnp.float32),
            wk=nrm((din, INNER)), bk=jnp.zeros((INNER,), jnp.float32),
            wv=nrm((din, INNER)), bv=jnp.zeros((INNER,), jnp.float32),
            wo=nrm((INNER, dout)), bo=jnp.zeros((dout,), jnp.float32),
        )

    blocks = []
    for _ in range(NUM_VIT_LAYERS):
        blocks.append(dict(
            ln1_g=jnp.ones((EMB,), jnp.float32), ln1_b=jnp.zeros((EMB,), jnp.float32),
            attn=attn_params(EMB, EMB),
            ln2_g=jnp.ones((EMB,), jnp.float32), ln2_b=jnp.zeros((EMB,), jnp.float32),
            w1=nrm((EMB, VIT_MLP)), b1=jnp.zeros((VIT_MLP,), jnp.float32),
            w2=nrm((VIT_MLP, EMB)), b2=jnp.zeros((EMB,), jnp.float32),
        ))

    return dict(
        vit=dict(
            patch_w=nrm((N_PIX, EMB)), patch_b=jnp.zeros((EMB,), jnp.float32),
            class_emb=nrm((EMB,)),
            pos_emb=nrm((N_PATCH + PREFIX, EMB)),
            pre_ln_g=jnp.ones((EMB,), jnp.float32), pre_ln_b=jnp.zeros((EMB,), jnp.float32),
            blocks=blocks,
        ),
        pool_attn=attn_params(POOL_DIM, EMB),
        proj_w1=nrm((EMB, PROJ_H)),
        proj_w3=nrm((EMB, PROJ_H)),
        proj_w2=nrm((PROJ_H, D_MODEL)),
    )


def prepare_params(p):
    """One-time fusion/reshape of module-style params into kernel-ready form."""
    blocks = []
    for blk in p["vit"]["blocks"]:
        a = blk["attn"]
        blocks.append(dict(
            ln1_g=blk["ln1_g"].reshape(1, EMB), ln1_b=blk["ln1_b"].reshape(1, EMB),
            wqkv=jnp.concatenate([a["wq"], a["wk"], a["wv"]], axis=1),
            bqkv=jnp.concatenate([a["bq"], a["bk"], a["bv"]], axis=0).reshape(1, 3 * INNER),
            wo=a["wo"], bo=a["bo"].reshape(1, EMB),
            ln2_g=blk["ln2_g"].reshape(1, EMB), ln2_b=blk["ln2_b"].reshape(1, EMB),
            w1=blk["w1"], b1=blk["b1"].reshape(1, VIT_MLP),
            w2=blk["w2"], b2=blk["b2"].reshape(1, EMB),
        ))
    v = p["vit"]
    pa = p["pool_attn"]
    return dict(
        vit=dict(
            patch_w=v["patch_w"], patch_b=v["patch_b"].reshape(1, EMB),
            class_emb=v["class_emb"].reshape(1, EMB),
            pos_cls=v["pos_emb"][0:1],
            pos_patch=v["pos_emb"][PREFIX:],
            pre_g=v["pre_ln_g"].reshape(1, EMB), pre_b=v["pre_ln_b"].reshape(1, EMB),
            blocks=blocks,
        ),
        pool=dict(
            wq=pa["wq"], bq=pa["bq"].reshape(1, INNER),
            wkv=jnp.concatenate([pa["wk"], pa["wv"]], axis=1),
            bkv=jnp.concatenate([pa["bk"], pa["bv"]], axis=0).reshape(1, 2 * INNER),
            wo=pa["wo"], bo=pa["bo"].reshape(1, EMB),
        ),
        proj=dict(
            w13=jnp.concatenate([p["proj_w1"], p["proj_w3"]], axis=1),
            w2=p["proj_w2"],
        ),
    )


# ------------------------------------ main ------------------------------------
if __name__ == "__main__":
    key = jax.random.PRNGKey(0)
    kp, ki, kidx = jax.random.split(key, 3)
    params = prepare_params(init_params(kp))

    images = jax.random.normal(ki, (B, T, N_PATCH, N_PIX), jnp.float32)
    image_masks = jnp.ones((B, T, N_PATCH), jnp.float32)  # unused (padding embed is None)
    pooled_patches_idx = jax.random.randint(
        kidx, (B, NP_POOL, PS_POOL), -1, T * N_PATCH).astype(jnp.int32)

    proj, valid_token = molmo_vision_backbone_forward(
        params, images, image_masks, pooled_patches_idx)

    # TODO(synk): final dynamic-shape boolean row selection has no static-shape
    # Pallas equivalent; done eagerly in JAX outside the jitted graph.
    out = proj.reshape(-1, D_MODEL)[valid_token.reshape(-1)]
    jax.block_until_ready(out)
    assert out.shape[-1] == D_MODEL
    print("KERNEL_OK")
</pallas_src>

<mosaic_0001>
module attributes {stable_mosaic.version = 11 : i64} {
  func.func @_embed_kernel(%arg0: i32, %arg1: memref<1x16x48xf32, #tpu.memory_space<vmem>>, %arg2: memref<48x64xf32, #tpu.memory_space<vmem>>, %arg3: memref<1x64xf32, #tpu.memory_space<vmem>>, %arg4: memref<16x64xf32, #tpu.memory_space<vmem>>, %arg5: memref<1x64xf32, #tpu.memory_space<vmem>>, %arg6: memref<1x64xf32, #tpu.memory_space<vmem>>, %arg7: memref<1x16x64xf32, #tpu.memory_space<vmem>>) attributes {dimension_semantics = [#tpu.dimension_semantics<parallel>], iteration_bounds = array<i64: 4>, scalar_prefetch = 0 : i64, scratch_operands = 0 : i64, tpu.core_type = #tpu.core_type<tc>, window_params = [{transform_indices = @transform_0, window_bounds = array<i64: 1, 16, 48>}, {pipeline_mode = #tpu.pipeline_mode<synchronous>, transform_indices = @transform_1, window_bounds = array<i64: 48, 64>}, {pipeline_mode = #tpu.pipeline_mode<synchronous>, transform_indices = @transform_2, window_bounds = array<i64: 1, 64>}, {pipeline_mode = #tpu.pipeline_mode<synchronous>, transform_indices = @transform_3, window_bounds = array<i64: 16, 64>}, {pipeline_mode = #tpu.pipeline_mode<synchronous>, transform_indices = @transform_4, window_bounds = array<i64: 1, 64>}, {pipeline_mode = #tpu.pipeline_mode<synchronous>, transform_indices = @transform_5, window_bounds = array<i64: 1, 64>}, {transform_indices = @transform_6, window_bounds = array<i64: 1, 16, 64>}]} {
    %c0 = arith.constant 0 : index
    %c0_0 = arith.constant 0 : index
    %c0_1 = arith.constant 0 : index
    %0 = vector.load %arg1[%c0, %c0_0, %c0_1] : memref<1x16x48xf32, #tpu.memory_space<vmem>>, vector<1x16x48xf32>
    %1 = vector.shape_cast %0 : vector<1x16x48xf32> to vector<16x48xf32>
    %2 = arith.truncf %1 : vector<16x48xf32> to vector<16x48xbf16>
    %c0_2 = arith.constant 0 : index
    %c0_3 = arith.constant 0 : index
    %3 = vector.load %arg2[%c0_2, %c0_3] : memref<48x64xf32, #tpu.memory_space<vmem>>, vector<48x64xf32>
    %4 = arith.truncf %3 : vector<48x64xf32> to vector<48x64xbf16>
    %cst = arith.constant dense<0.000000e+00> : vector<16x64xf32>
    %5 = tpu.matmul %2, %4, %cst {dimension_numbers = #tpu.dot_dimension_numbers<[1], [0], [0], [1], [0, 0, 1, 1], [], []>} : vector<16x48xbf16>, vector<48x64xbf16>, vector<16x64xf32> -> vector<16x64xf32>
    %c0_4 = arith.constant 0 : index
    %c0_5 = arith.constant 0 : index
    %6 = vector.load %arg3[%c0_4, %c0_5] : memref<1x64xf32, #tpu.memory_space<vmem>>, vector<1x64xf32>
    %7 = vector.broadcast %6 : vector<1x64xf32> to vector<16x64xf32>
    %8 = arith.addf %5, %7 : vector<16x64xf32>
    %c0_6 = arith.constant 0 : index
    %c0_7 = arith.constant 0 : index
    %9 = vector.load %arg4[%c0_6, %c0_7] : memref<16x64xf32, #tpu.memory_space<vmem>>, vector<16x64xf32>
    %10 = arith.addf %8, %9 : vector<16x64xf32>
    %c0_8 = arith.constant 0 : index
    %c0_9 = arith.constant 0 : index
    %11 = vector.load %arg5[%c0_8, %c0_9] : memref<1x64xf32, #tpu.memory_space<vmem>>, vector<1x64xf32>
    %c0_10 = arith.constant 0 : index
    %c0_11 = arith.constant 0 : index
    %12 = vector.load %arg6[%c0_10, %c0_11] : memref<1x64xf32, #tpu.memory_space<vmem>>, vector<1x64xf32>
    %cst_12 = arith.constant dense<0.000000e+00> : vector<16xf32>
    %13 = vector.multi_reduction <add>, %10, %cst_12 [1] : vector<16x64xf32> to vector<16xf32>
    %14 = vector.shape_cast %13 : vector<16xf32> to vector<16x1xf32>
    %cst_13 = arith.constant 6.400000e+01 : f32
    %15 = vector.broadcast %cst_13 : f32 to vector<16x1xf32>
    %16 = arith.divf %14, %15 : vector<16x1xf32>
    %17 = vector.broadcast %16 : vector<16x1xf32> to vector<16x64xf32>
    %18 = arith.subf %10, %17 : vector<16x64xf32>
    %19 = arith.mulf %18, %18 : vector<16x64xf32>
    %cst_14 = arith.constant dense<0.000000e+00> : vector<16xf32>
    %20 = vector.multi_reduction <add>, %19, %cst_14 [1] : vector<16x64xf32> to vector<16xf32>
    %21 = vector.shape_cast %20 : vector<16xf32> to vector<16x1xf32>
    %cst_15 = arith.constant 6.400000e+01 : f32
    %22 = vector.broadcast %cst_15 : f32 to vector<16x1xf32>
    %23 = arith.divf %21, %22 : vector<16x1xf32>
    %24 = vector.broadcast %16 : vector<16x1xf32> to vector<16x64xf32>
    %25 = arith.subf %10, %24 : vector<16x64xf32>
    %cst_16 = arith.constant 9.99999974E-6 : f32
    %26 = vector.broadcast %cst_16 : f32 to vector<16x1xf32>
    %27 = arith.addf %23, %26 : vector<16x1xf32>
    %28 = math.rsqrt %27 : vector<16x1xf32>
    %29 = vector.broadcast %28 : vector<16x1xf32> to vector<16x64xf32>
    %30 = arith.mulf %25, %29 : vector<16x64xf32>
    %31 = vector.broadcast %11 : vector<1x64xf32> to vector<16x64xf32>
    %32 = arith.mulf %30, %31 : vector<16x64xf32>
    %33 = vector.broadcast %12 : vector<1x64xf32> to vector<16x64xf32>
    %34 = arith.addf %32, %33 : vector<16x64xf32>
    %c0_17 = arith.constant 0 : index
    %c0_18 = arith.constant 0 : index
    %c0_19 = arith.constant 0 : index
    %35 = vector.load %arg7[%c0_17, %c0_18, %c0_19] : memref<1x16x64xf32, #tpu.memory_space<vmem>>, vector<1x16x64xf32>
    %36 = vector.shape_cast %35 : vector<1x16x64xf32> to vector<16x64xf32>
    %37 = vector.shape_cast %34 : vector<16x64xf32> to vector<1x16x64xf32>
    tpu.vector_store %arg7[%c0_17, %c0_18, %c0_19], %37 {strides = array<i32>} : memref<1x16x64xf32, #tpu.memory_space<vmem>>, vector<1x16x64xf32>,
    return
  }
  func.func @transform_0(%arg0: i32) -> (i32, i32, i32) {
    %c0_i32 = arith.constant 0 : i32
    %c0_i32_0 = arith.constant 0 : i32
    %c0_i32_1 = arith.constant 0 : i32
    return %arg0, %c0_i32, %c0_i32_0 : i32, i32, i32
  }
  func.func @transform_1(%arg0: i32) -> (i32, i32) {
    %c0_i32 = arith.constant 0 : i32
    %c0_i32_0 = arith.constant 0 : i32
    %c0_i32_1 = arith.constant 0 : i32
    return %c0_i32, %c0_i32_0 : i32, i32
  }
  func.func @transform_2(%arg0: i32) -> (i32, i32) {
    %c0_i32 = arith.constant 0 : i32
    %c0_i32_0 = arith.constant 0 : i32
    %c0_i32_1 = arith.constant 0 : i32
    return %c0_i32, %c0_i32_0 : i32, i32
  }
  func.func @transform_3(%arg0: i32) -> (i32, i32) {
    %c0_i32 = arith.constant 0 : i32
    %c0_i32_0 = arith.constant 0 : i32
    %c0_i32_1 = arith.constant 0 : i32
    return %c0_i32, %c0_i32_0 : i32, i32
  }
  func.func @transform_4(%arg0: i32) -> (i32, i32) {
    %c0_i32 = arith.constant 0 : i32
    %c0_i32_0 = arith.constant 0 : i32
    %c0_i32_1 = arith.constant 0 : i32
    return %c0_i32, %c0_i32_0 : i32, i32
  }
  func.func @transform_5(%arg0: i32) -> (i32, i32) {
    %c0_i32 = arith.constant 0 : i32
    %c0_i32_0 = arith.constant 0 : i32
    %c0_i32_1 = arith.constant 0 : i32
    return %c0_i32, %c0_i32_0 : i32, i32
  }
  func.func @transform_6(%arg0: i32) -> (i32, i32, i32) {
    %c0_i32 = arith.constant 0 : i32
    %c0_i32_0 = arith.constant 0 : i32
    %c0_i32_1 = arith.constant 0 : i32
    return %arg0, %c0_i32, %c0_i32_0 : i32, i32, i32
  }
}

module attributes {stable_mosaic.version = 11 : i64} {
  func.func @_mlp_block_kernel(%arg0: i32, %arg1: memref<1x17x64xf32, #tpu.memory_space<vmem>>, %arg2: memref<1x64xf32, #tpu.memory_space<vmem>>, %arg3: memref<1x64xf32, #tpu.memory_space<vmem>>, %arg4: memref<64x128xf32, #tpu.memory_space<vmem>>, %arg5: memref<1x128xf32, #tpu.memory_space<vmem>>, %arg6: memref<128x64xf32, #tpu.memory_space<vmem>>, %arg7: memref<1x64xf32, #tpu.memory_space<vmem>>, %arg8: memref<1x17x64xf32, #tpu.memory_space<vmem>>) attributes {dimension_semantics = [#tpu.dimension_semantics<parallel>], iteration_bounds = array<i64: 4>, scalar_prefetch = 0 : i64, scratch_operands = 0 : i64, tpu.core_type = #tpu.core_type<tc>, window_params = [{transform_indices = @transform_0, window_bounds = array<i64: 1, 17, 64>}, {pipeline_mode = #tpu.pipeline_mode<synchronous>, transform_indices = @transform_1, window_bounds = array<i64: 1, 64>}, {pipeline_mode = #tpu.pipeline_mode<synchronous>, transform_indices = @transform_2, window_bounds = array<i64: 1, 64>}, {pipeline_mode = #tpu.pipeline_mode<synchronous>, transform_indices = @transform_3, window_bounds = array<i64: 64, 128>}, {pipeline_mode = #tpu.pipeline_mode<synchronous>, transform_indices = @transform_4, window_bounds = array<i64: 1, 128>}, {pipeline_mode = #tpu.pipeline_mode<synchronous>, transform_indices = @transform_5, window_bounds = array<i64: 128, 64>}, {pipeline_mode = #tpu.pipeline_mode<synchronous>, transform_indices = @transform_6, window_bounds = array<i64: 1, 64>}, {transform_indices = @transform_7, window_bounds = array<i64: 1, 17, 64>}]} {
    %c0 = arith.constant 0 : index
    %c0_0 = arith.constant 0 : index
    %c0_1 = arith.constant 0 : index
    %0 = vector.load %arg1[%c0, %c0_0, %c0_1] : memref<1x17x64xf32, #tpu.memory_space<vmem>>, vector<1x17x64xf32>
    %1 = vector.shape_cast %0 : vector<1x17x64xf32> to vector<17x64xf32>
    %c0_2 = arith.constant 0 : index
    %c0_3 = arith.constant 0 : index
    %2 = vector.load %arg2[%c0_2, %c0_3] : memref<1x64xf32, #tpu.memory_space<vmem>>, vector<1x64xf32>
    %c0_4 = arith.constant 0 : index
    %c0_5 = arith.constant 0 : index
    %3 = vector.load %arg3[%c0_4, %c0_5] : memref<1x64xf32, #tpu.memory_space<vmem>>, vector<1x64xf32>
    %cst = arith.constant dense<0.000000e+00> : vector<17xf32>
    %4 = vector.multi_reduction <add>, %1, %cst [1] : vector<17x64xf32> to vector<17xf32>
    %5 = vector.shape_cast %4 : vector<17xf32> to vector<17x1xf32>
    %cst_6 = arith.constant 6.400000e+01 : f32
    %6 = vector.broadcast %cst_6 : f32 to vector<17x1xf32>
    %7 = arith.divf %5, %6 : vector<17x1xf32>
    %8 = vector.broadcast %7 : vector<17x1xf32> to vector<17x64xf32>
    %9 = arith.subf %1, %8 : vector<17x64xf32>
    %10 = arith.mulf %9, %9 : vector<17x64xf32>
    %cst_7 = arith.constant dense<0.000000e+00> : vector<17xf32>
    %11 = vector.multi_reduction <add>, %10, %cst_7 [1] : vector<17x64xf32> to vector<17xf32>
    %12 = vector.shape_cast %11 : vector<17xf32> to vector<17x1xf32>
    %cst_8 = arith.constant 6.400000e+01 : f32
    %13 = vector.broadcast %cst_8 : f32 to vector<17x1xf32>
    %14 = arith.divf %12, %13 : vector<17x1xf32>
    %15 = vector.broadcast %7 : vector<17x1xf32> to vector<17x64xf32>
    %16 = arith.subf %1, %15 : vector<17x64xf32>
    %cst_9 = arith.constant 9.99999974E-6 : f32
    %17 = vector.broadcast %cst_9 : f32 to vector<17x1xf32>
    %18 = arith.addf %14, %17 : vector<17x1xf32>
    %19 = math.rsqrt %18 : vector<17x1xf32>
    %20 = vector.broadcast %19 : vector<17x1xf32> to vector<17x64xf32>
    %21 = arith.mulf %16, %20 : vector<17x64xf32>
    %22 = vector.broadcast %2 : vector<1x64xf32> to vector<17x64xf32>
    %23 = arith.mulf %21, %22 : vector<17x64xf32>
    %24 = vector.broadcast %3 : vector<1x64xf32> to vector<17x64xf32>
    %25 = arith.addf %23, %24 : vector<17x64xf32>
    %26 = arith.truncf %25 : vector<17x64xf32> to vector<17x64xbf16>
    %c0_10 = arith.constant 0 : index
    %c0_11 = arith.constant 0 : index
    %27 = vector.load %arg4[%c0_10, %c0_11] : memref<64x128xf32, #tpu.memory_space<vmem>>, vector<64x128xf32>
    %28 = arith.truncf %27 : vector<64x128xf32> to vector<64x128xbf16>
    %cst_12 = arith.constant dense<0.000000e+00> : vector<17x128xf32>
    %29 = tpu.matmul %26, %28, %cst_12 {dimension_numbers = #tpu.dot_dimension_numbers<[1], [0], [0], [1], [0, 0, 1, 1], [], []>} : vector<17x64xbf16>, vector<64x128xbf16>, vector<17x128xf32> -> vector<17x128xf32>
    %c0_13 = arith.constant 0 : index
    %c0_14 = arith.constant 0 : index
    %30 = vector.load %arg5[%c0_13, %c0_14] : memref<1x128xf32, #tpu.memory_space<vmem>>, vector<1x128xf32>
    %31 = vector.broadcast %30 : vector<1x128xf32> to vector<17x128xf32>
    %32 = arith.addf %29, %31 : vector<17x128xf32>
    %cst_15 = arith.constant 1.702000e+00 : f32
    %33 = vector.broadcast %cst_15 : f32 to vector<17x128xf32>
    %34 = arith.mulf %33, %32 : vector<17x128xf32>
    %35 = arith.negf %34 : vector<17x128xf32>
    %36 = math.exp %35 : vector<17x128xf32>
    %cst_16 = arith.constant 1.000000e+00 : f32
    %37 = vector.broadcast %cst_16 : f32 to vector<17x128xf32>
    %38 = arith.addf %37, %36 : vector<17x128xf32>
    %39 = arith.divf %37, %38 : vector<17x128xf32>
    %40 = arith.mulf %32, %39 : vector<17x128xf32>
    %41 = arith.truncf %40 : vector<17x128xf32> to vector<17x128xbf16>
    %c0_17 = arith.constant 0 : index
    %c0_18 = arith.constant 0 : index
    %42 = vector.load %arg6[%c0_17, %c0_18] : memref<128x64xf32, #tpu.memory_space<vmem>>, vector<128x64xf32>
    %43 = arith.truncf %42 : vector<128x64xf32> to vector<128x64xbf16>
    %cst_19 = arith.constant dense<0.000000e+00> : vector<17x64xf32>
    %44 = tpu.matmul %41, %43, %cst_19 {dimension_numbers = #tpu.dot_dimension_numbers<[1], [0], [0], [1], [0, 0, 1, 1], [], []>} : vector<17x128xbf16>, vector<128x64xbf16>, vector<17x64xf32> -> vector<17x64xf32>
    %c0_20 = arith.constant 0 : index
    %c0_21 = arith.constant 0 : index
    %45 = vector.load %arg7[%c0_20, %c0_21] : memref<1x64xf32, #tpu.memory_space<vmem>>, vector<1x64xf32>
    %46 = vector.broadcast %45 : vector<1x64xf32> to vector<17x64xf32>
    %47 = arith.addf %44, %46 : vector<17x64xf32>
    %48 = arith.addf %1, %47 : vector<17x64xf32>
    %c0_22 = arith.constant 0 : index
    %c0_23 = arith.constant 0 : index
    %c0_24 = arith.constant 0 : index
    %49 = vector.load %arg8[%c0_22, %c0_23, %c0_24] : memref<1x17x64xf32, #tpu.memory_space<vmem>>, vector<1x17x64xf32>
    %50 = vector.shape_cast %49 : vector<1x17x64xf32> to vector<17x64xf32>
    %51 = vector.shape_cast %48 : vector<17x64xf32> to vector<1x17x64xf32>
    tpu.vector_store %arg8[%c0_22, %c0_23, %c0_24], %51 {strides = array<i32>} : memref<1x17x64xf32, #tpu.memory_space<vmem>>, vector<1x17x64xf32>,
    return
  }
  func.func @transform_0(%arg0: i32) -> (i32, i32, i32) {
    %c0_i32 = arith.constant 0 : i32
    %c0_i32_0 = arith.constant 0 : i32
    %c0_i32_1 = arith.constant 0 : i32
    return %arg0, %c0_i32, %c0_i32_0 : i32, i32, i32
  }
  func.func @transform_1(%arg0: i32) -> (i32, i32) {
    %c0_i32 = arith.constant 0 : i32
    %c0_i32_0 = arith.constant 0 : i32
    %c0_i32_1 = arith.constant 0 : i32
    return %c0_i32, %c0_i32_0 : i32, i32
  }
  func.func @transform_2(%arg0: i32) -> (i32, i32) {
    %c0_i32 = arith.constant 0 : i32
    %c0_i32_0 = arith.constant 0 : i32
    %c0_i32_1 = arith.constant 0 : i32
    return %c0_i32, %c0_i32_0 : i32, i32
  }
  func.func @transform_3(%arg0: i32) -> (i32, i32) {
    %c0_i32 = arith.constant 0 : i32
    %c0_i32_0 = arith.constant 0 : i32
    %c0_i32_1 = arith.constant 0 : i32
    return %c0_i32, %c0_i32_0 : i32, i32
  }
  func.func @transform_4(%arg0: i32) -> (i32, i32) {
    %c0_i32 = arith.constant 0 : i32
    %c0_i32_0 = arith.constant 0 : i32
    %c0_i32_1 = arith.constant 0 : i32
    return %c0_i32, %c0_i32_0 : i32, i32
  }
  func.func @transform_5(%arg0: i32) -> (i32, i32) {
    %c0_i32 = arith.constant 0 : i32
    %c0_i32_0 = arith.constant 0 : i32
    %c0_i32_1 = arith.constant 0 : i32
    return %c0_i32, %c0_i32_0 : i32, i32
  }
  func.func @transform_6(%arg0: i32) -> (i32, i32) {
    %c0_i32 = arith.constant 0 : i32
    %c0_i32_0 = arith.constant 0 : i32
    %c0_i32_1 = arith.constant 0 : i32
    return %c0_i32, %c0_i32_0 : i32, i32
  }
  func.func @transform_7(%arg0: i32) -> (i32, i32, i32) {
    %c0_i32 = arith.constant 0 : i32
    %c0_i32_0 = arith.constant 0 : i32
    %c0_i32_1 = arith.constant 0 : i32
    return %arg0, %c0_i32, %c0_i32_0 : i32, i32, i32
  }
}

module attributes {stable_mosaic.version = 11 : i64} {
  func.func @_attn_block_kernel(%arg0: i32, %arg1: memref<1x17x64xf32, #tpu.memory_space<vmem>>, %arg2: memref<1x64xf32, #tpu.memory_space<vmem>>, %arg3: memref<1x64xf32, #tpu.memory_space<vmem>>, %arg4: memref<64x192xf32, #tpu.memory_space<vmem>>, %arg5: memref<1x192xf32, #tpu.memory_space<vmem>>, %arg6: memref<64x64xf32, #tpu.memory_space<vmem>>, %arg7: memref<1x64xf32, #tpu.memory_space<vmem>>, %arg8: memref<1x17x64xf32, #tpu.memory_space<vmem>>) attributes {dimension_semantics = [#tpu.dimension_semantics<parallel>], iteration_bounds = array<i64: 4>, scalar_prefetch = 0 : i64, scratch_operands = 0 : i64, tpu.core_type = #tpu.core_type<tc>, window_params = [{transform_indices = @transform_0, window_bounds = array<i64: 1, 17, 64>}, {pipeline_mode = #tpu.pipeline_mode<synchronous>, transform_indices = @transform_1, window_bounds = array<i64: 1, 64>}, {pipeline_mode = #tpu.pipeline_mode<synchronous>, transform_indices = @transform_2, window_bounds = array<i64: 1, 64>}, {pipeline_mode = #tpu.pipeline_mode<synchronous>, transform_indices = @transform_3, window_bounds = array<i64: 64, 192>}, {pipeline_mode = #tpu.pipeline_mode<synchronous>, transform_indices = @transform_4, window_bounds = array<i64: 1, 192>}, {pipeline_mode = #tpu.pipeline_mode<synchronous>, transform_indices = @transform_5, window_bounds = array<i64: 64, 64>}, {pipeline_mode = #tpu.pipeline_mode<synchronous>, transform_indices = @transform_6, window_bounds = array<i64: 1, 64>}, {transform_indices = @transform_7, window_bounds = array<i64: 1, 17, 64>}]} {
    %c0 = arith.constant 0 : index
    %c0_0 = arith.constant 0 : index
    %c0_1 = arith.constant 0 : index
    %0 = vector.load %arg1[%c0, %c0_0, %c0_1] : memref<1x17x64xf32, #tpu.memory_space<vmem>>, vector<1x17x64xf32>
    %1 = vector.shape_cast %0 : vector<1x17x64xf32> to vector<17x64xf32>
    %c0_2 = arith.constant 0 : index
    %c0_3 = arith.constant 0 : index
    %2 = vector.load %arg2[%c0_2, %c0_3] : memref<1x64xf32, #tpu.memory_space<vmem>>, vector<1x64xf32>
    %c0_4 = arith.constant 0 : index
    %c0_5 = arith.constant 0 : index
    %3 = vector.load %arg3[%c0_4, %c0_5] : memref<1x64xf32, #tpu.memory_space<vmem>>, vector<1x64xf32>
    %cst = arith.constant dense<0.000000e+00> : vector<17xf32>
    %4 = vector.multi_reduction <add>, %1, %cst [1] : vector<17x64xf32> to vector<17xf32>
    %5 = vector.shape_cast %4 : vector<17xf32> to vector<17x1xf32>
    %cst_6 = arith.constant 6.400000e+01 : f32
    %6 = vector.broadcast %cst_6 : f32 to vector<17x1xf32>
    %7 = arith.divf %5, %6 : vector<17x1xf32>
    %8 = vector.broadcast %7 : vector<17x1xf32> to vector<17x64xf32>
    %9 = arith.subf %1, %8 : vector<17x64xf32>
    %10 = arith.mulf %9, %9 : vector<17x64xf32>
    %cst_7 = arith.constant dense<0.000000e+00> : vector<17xf32>
    %11 = vector.multi_reduction <add>, %10, %cst_7 [1] : vector<17x64xf32> to vector<17xf32>
    %12 = vector.shape_cast %11 : vector<17xf32> to vector<17x1xf32>
    %cst_8 = arith.constant 6.400000e+01 : f32
    %13 = vector.broadcast %cst_8 : f32 to vector<17x1xf32>
    %14 = arith.divf %12, %13 : vector<17x1xf32>
    %15 = vector.broadcast %7 : vector<17x1xf32> to vector<17x64xf32>
    %16 = arith.subf %1, %15 : vector<17x64xf32>
    %cst_9 = arith.constant 9.99999974E-6 : f32
    %17 = vector.broadcast %cst_9 : f32 to vector<17x1xf32>
    %18 = arith.addf %14, %17 : vector<17x1xf32>
    %19 = math.rsqrt %18 : vector<17x1xf32>
    %20 = vector.broadcast %19 : vector<17x1xf32> to vector<17x64xf32>
    %21 = arith.mulf %16, %20 : vector<17x64xf32>
    %22 = vector.broadcast %2 : vector<1x64xf32> to vector<17x64xf32>
    %23 = arith.mulf %21, %22 : vector<17x64xf32>
    %24 = vector.broadcast %3 : vector<1x64xf32> to vector<17x64xf32>
    %25 = arith.addf %23, %24 : vector<17x64xf32>
    %26 = arith.truncf %25 : vector<17x64xf32> to vector<17x64xbf16>
    %c0_10 = arith.constant 0 : index
    %c0_11 = arith.constant 0 : index
    %27 = vector.load %arg4[%c0_10, %c0_11] : memref<64x192xf32, #tpu.memory_space<vmem>>, vector<64x192xf32>
    %28 = arith.truncf %27 : vector<64x192xf32> to vector<64x192xbf16>
    %cst_12 = arith.constant dense<0.000000e+00> : vector<17x192xf32>
    %29 = tpu.matmul %26, %28, %cst_12 {dimension_numbers = #tpu.dot_dimension_numbers<[1], [0], [0], [1], [0, 0, 1, 1], [], []>} : vector<17x64xbf16>, vector<64x192xbf16>, vector<17x192xf32> -> vector<17x192xf32>
    %c0_13 = arith.constant 0 : index
    %c0_14 = arith.constant 0 : index
    %30 = vector.load %arg5[%c0_13, %c0_14] : memref<1x192xf32, #tpu.memory_space<vmem>>, vector<1x192xf32>
    %31 = vector.broadcast %30 : vector<1x192xf32> to vector<17x192xf32>
    %32 = arith.addf %29, %31 : vector<17x192xf32>
    %33 = vector.extract_strided_slice %32 {offsets = [0, 0], sizes = [17, 64], strides = [1, 1]} : vector<17x192xf32> to vector<17x64xf32>
    %cst_15 = arith.constant 2.500000e-01 : f32
    %34 = vector.broadcast %cst_15 : f32 to vector<17x64xf32>
    %35 = arith.mulf %33, %34 : vector<17x64xf32>
    %36 = vector.extract_strided_slice %32 {offsets = [0, 64], sizes = [17, 64], strides = [1, 1]} : vector<17x192xf32> to vector<17x64xf32>
    %37 = vector.extract_strided_slice %32 {offsets = [0, 128], sizes = [17, 64], strides = [1, 1]} : vector<17x192xf32> to vector<17x64xf32>
    %38 = vector.extract_strided_slice %35 {offsets = [0, 0], sizes = [17, 16], strides = [1, 1]} : vector<17x64xf32> to vector<17x16xf32>
    %39 = arith.truncf %38 : vector<17x16xf32> to vector<17x16xbf16>
    %40 = vector.extract_strided_slice %36 {offsets = [0, 0], sizes = [17, 16], strides = [1, 1]} : vector<17x64xf32> to vector<17x16xf32>
    %41 = arith.truncf %40 : vector<17x16xf32> to vector<17x16xbf16>
    %42 = vector.extract_strided_slice %37 {offsets = [0, 0], sizes = [17, 16], strides = [1, 1]} : vector<17x64xf32> to vector<17x16xf32>
    %43 = arith.truncf %42 : vector<17x16xf32> to vector<17x16xbf16>
    %cst_16 = arith.constant dense<0.000000e+00> : vector<17x17xf32>
    %44 = tpu.matmul %39, %41, %cst_16 {dimension_numbers = #tpu.dot_dimension_numbers<[1], [1], [0], [0], [0, 0, 1, 0], [], []>} : vector<17x16xbf16>, vector<17x16xbf16>, vector<17x17xf32> -> vector<17x17xf32>
    %cst_17 = arith.constant dense<0xFF800000> : vector<17xf32>
    %45 = vector.multi_reduction <maximumf>, %44, %cst_17 [1] : vector<17x17xf32> to vector<17xf32>
    %46 = vector.shape_cast %45 : vector<17xf32> to vector<17x1xf32>
    %47 = vector.broadcast %46 : vector<17x1xf32> to vector<17x17xf32>
    %48 = arith.subf %44, %47 : vector<17x17xf32>
    %49 = math.exp %48 : vector<17x17xf32>
    %cst_18 = arith.constant dense<0.000000e+00> : vector<17xf32>
    %50 = vector.multi_reduction <add>, %49, %cst_18 [1] : vector<17x17xf32> to vector<17xf32>
    %51 = vector.shape_cast %50 : vector<17xf32> to vector<17x1xf32>
    %52 = tpu.reciprocal %51 {approx = true} : vector<17x1xf32> -> vector<17x1xf32>
    %53 = vector.broadcast %52 : vector<17x1xf32> to vector<17x17xf32>
    %54 = arith.mulf %49, %53 : vector<17x17xf32>
    %55 = arith.truncf %54 : vector<17x17xf32> to vector<17x17xbf16>
    %cst_19 = arith.constant dense<0.000000e+00> : vector<17x16xf32>
    %56 = tpu.matmul %55, %43, %cst_19 {dimension_numbers = #tpu.dot_dimension_numbers<[1], [0], [0], [1], [0, 0, 1, 1], [], []>} : vector<17x17xbf16>, vector<17x16xbf16>, vector<17x16xf32> -> vector<17x16xf32>
    %57 = arith.truncf %56 : vector<17x16xf32> to vector<17x16xbf16>
    %c0_20 = arith.constant 0 : index
    %c0_21 = arith.constant 0 : index
    %58 = vector.load %arg6[%c0_20, %c0_21] : memref<64x64xf32, #tpu.memory_space<vmem>>, vector<16x64xf32>
    %59 = arith.truncf %58 : vector<16x64xf32> to vector<16x64xbf16>
    %cst_22 = arith.constant dense<0.000000e+00> : vector<17x64xf32>
    %60 = tpu.matmul %57, %59, %cst_22 {dimension_numbers = #tpu.dot_dimension_numbers<[1], [0], [0], [1], [0, 0, 1, 1], [], []>} : vector<17x16xbf16>, vector<16x64xbf16>, vector<17x64xf32> -> vector<17x64xf32>
    %61 = vector.extract_strided_slice %35 {offsets = [0, 16], sizes = [17, 16], strides = [1, 1]} : vector<17x64xf32> to vector<17x16xf32>
    %62 = arith.truncf %61 : vector<17x16xf32> to vector<17x16xbf16>
    %63 = vector.extract_strided_slice %36 {offsets = [0, 16], sizes = [17, 16], strides = [1, 1]} : vector<17x64xf32> to vector<17x16xf32>
    %64 = arith.truncf %63 : vector<17x16xf32> to vector<17x16xbf16>
    %65 = vector.extract_strided_slice %37 {offsets = [0, 16], sizes = [17, 16], strides = [1, 1]} : vector<17x64xf32> to vector<17x16xf32>
    %66 = arith.truncf %65 : vector<17x16xf32> to vector<17x16xbf16>
    %cst_23 = arith.constant dense<0.000000e+00> : vector<17x17xf32>
    %67 = tpu.matmul %62, %64, %cst_23 {dimension_numbers = #tpu.dot_dimension_numbers<[1], [1], [0], [0], [0, 0, 1, 0], [], []>} : vector<17x16xbf16>, vector<17x16xbf16>, vector<17x17xf32> -> vector<17x17xf32>
    %cst_24 = arith.constant dense<0xFF800000> : vector<17xf32>
    %68 = vector.multi_reduction <maximumf>, %67, %cst_24 [1] : vector<17x17xf32> to vector<17xf32>
    %69 = vector.shape_cast %68 : vector<17xf32> to vector<17x1xf32>
    %70 = vector.broadcast %69 : vector<17x1xf32> to vector<17x17xf32>
    %71 = arith.subf %67, %70 : vector<17x17xf32>
    %72 = math.exp %71 : vector<17x17xf32>
    %cst_25 = arith.constant dense<0.000000e+00> : vector<17xf32>
    %73 = vector.multi_reduction <add>, %72, %cst_25 [1] : vector<17x17xf32> to vector<17xf32>
    %74 = vector.shape_cast %73 : vector<17xf32> to vector<17x1xf32>
    %75 = tpu.reciprocal %74 {approx = true} : vector<17x1xf32> -> vector<17x1xf32>
    %76 = vector.broadcast %75 : vector<17x1xf32> to vector<17x17xf32>
    %77 = arith.mulf %72, %76 : vector<17x17xf32>
    %78 = arith.truncf %77 : vector<17x17xf32> to vector<17x17xbf16>
    %cst_26 = arith.constant dense<0.000000e+00> : vector<17x16xf32>
    %79 = tpu.matmul %78, %66, %cst_26 {dimension_numbers = #tpu.dot_dimension_numbers<[1], [0], [0], [1], [0, 0, 1, 1], [], []>} : vector<17x17xbf16>, vector<17x16xbf16>, vector<17x16xf32> -> vector<17x16xf32>
    %80 = arith.truncf %79 : vector<17x16xf32> to vector<17x16xbf16>
    %c16 = arith.constant 16 : index
    %c0_27 = arith.constant 0 : index
    %81 = vector.load %arg6[%c16, %c0_27] : memref<64x64xf32, #tpu.memory_space<vmem>>, vector<16x64xf32>
    %82 = arith.truncf %81 : vector<16x64xf32> to vector<16x64xbf16>
    %cst_28 = arith.constant dense<0.000000e+00> : vector<17x64xf32>
    %83 = tpu.matmul %80, %82, %cst_28 {dimension_numbers = #tpu.dot_dimension_numbers<[1], [0], [0], [1], [0, 0, 1, 1], [], []>} : vector<17x16xbf16>, vector<16x64xbf16>, vector<17x64xf32> -> vector<17x64xf32>
    %84 = arith.addf %60, %83 : vector<17x64xf32>
    %85 = vector.extract_strided_slice %35 {offsets = [0, 32], sizes = [17, 16], strides = [1, 1]} : vector<17x64xf32> to vector<17x16xf32>
    %86 = arith.truncf %85 : vector<17x16xf32> to vector<17x16xbf16>
    %87 = vector.extract_strided_slice %36 {offsets = [0, 32], sizes = [17, 16], strides = [1, 1]} : vector<17x64xf32> to vector<17x16xf32>
    %88 = arith.truncf %87 : vector<17x16xf32> to vector<17x16xbf16>
    %89 = vector.extract_strided_slice %37 {offsets = [0, 32], sizes = [17, 16], strides = [1, 1]} : vector<17x64xf32> to vector<17x16xf32>
    %90 = arith.truncf %89 : vector<17x16xf32> to vector<17x16xbf16>
    %cst_29 = arith.constant dense<0.000000e+00> : vector<17x17xf32>
    %91 = tpu.matmul %86, %88, %cst_29 {dimension_numbers = #tpu.dot_dimension_numbers<[1], [1], [0], [0], [0, 0, 1, 0], [], []>} : vector<17x16xbf16>, vector<17x16xbf16>, vector<17x17xf32> -> vector<17x17xf32>
    %cst_30 = arith.constant dense<0xFF800000> : vector<17xf32>
    %92 = vector.multi_reduction <maximumf>, %91, %cst_30 [1] : vector<17x17xf32> to vector<17xf32>
    %93 = vector.shape_cast %92 : vector<17xf32> to vector<17x1xf32>
    %94 = vector.broadcast %93 : vector<17x1xf32> to vector<17x17xf32>
    %95 = arith.subf %91, %94 : vector<17x17xf32>
    %96 = math.exp %95 : vector<17x17xf32>
    %cst_31 = arith.constant dense<0.000000e+00> : vector<17xf32>
    %97 = vector.multi_reduction <add>, %96, %cst_31 [1] : vector<17x17xf32> to vector<17xf32>
    %98 = vector.shape_cast %97 : vector<17xf32> to vector<17x1xf32>
    %99 = tpu.reciprocal %98 {approx = true} : vector<17x1xf32> -> vector<17x1xf32>
    %100 = vector.broadcast %99 : vector<17x1xf32> to vector<17x17xf32>
    %101 = arith.mulf %96, %100 : vector<17x17xf32>
    %102 = arith.truncf %101 : vector<17x17xf32> to vector<17x17xbf16>
    %cst_32 = arith.constant dense<0.000000e+00> : vector<17x16xf32>
    %103 = tpu.matmul %102, %90, %cst_32 {dimension_numbers = #tpu.dot_dimension_numbers<[1], [0], [0], [1], [0, 0, 1, 1], [], []>} : vector<17x17xbf16>, vector<17x16xbf16>, vector<17x16xf32> -> vector<17x16xf32>
    %104 = arith.truncf %103 : vector<17x16xf32> to vector<17x16xbf16>
    %c32 = arith.constant 32 : index
    %c0_33 = arith.constant 0 : index
    %105 = vector.load %arg6[%c32, %c0_33] : memref<64x64xf32, #tpu.memory_space<vmem>>, vector<16x64xf32>
    %106 = arith.truncf %105 : vector<16x64xf32> to vector<16x64xbf16>
    %cst_34 = arith.constant dense<0.000000e+00> : vector<17x64xf32>
    %107 = tpu.matmul %104, %106, %cst_34 {dimension_numbers = #tpu.dot_dimension_numbers<[1], [0], [0], [1], [0, 0, 1, 1], [], []>} : vector<17x16xbf16>, vector<16x64xbf16>, vector<17x64xf32> -> vector<17x64xf32>
    %108 = arith.addf %84, %107 : vector<17x64xf32>
    %109 = vector.extract_strided_slice %35 {offsets = [0, 48], sizes = [17, 16], strides = [1, 1]} : vector<17x64xf32> to vector<17x16xf32>
    %110 = arith.truncf %109 : vector<17x16xf32> to vector<17x16xbf16>
    %111 = vector.extract_strided_slice %36 {offsets = [0, 48], sizes = [17, 16], strides = [1, 1]} : vector<17x64xf32> to vector<17x16xf32>
    %112 = arith.truncf %111 : vector<17x16xf32> to vector<17x16xbf16>
    %113 = vector.extract_strided_slice %37 {offsets = [0, 48], sizes = [17, 16], strides = [1, 1]} : vector<17x64xf32> to vector<17x16xf32>
    %114 = arith.truncf %113 : vector<17x16xf32> to vector<17x16xbf16>
    %cst_35 = arith.constant dense<0.000000e+00> : vector<17x17xf32>
    %115 = tpu.matmul %110, %112, %cst_35 {dimension_numbers = #tpu.dot_dimension_numbers<[1], [1], [0], [0], [0, 0, 1, 0], [], []>} : vector<17x16xbf16>, vector<17x16xbf16>, vector<17x17xf32> -> vector<17x17xf32>
    %cst_36 = arith.constant dense<0xFF800000> : vector<17xf32>
    %116 = vector.multi_reduction <maximumf>, %115, %cst_36 [1] : vector<17x17xf32> to vector<17xf32>
    %117 = vector.shape_cast %116 : vector<17xf32> to vector<17x1xf32>
    %118 = vector.broadcast %117 : vector<17x1xf32> to vector<17x17xf32>
    %119 = arith.subf %115, %118 : vector<17x17xf32>
    %120 = math.exp %119 : vector<17x17xf32>
    %cst_37 = arith.constant dense<0.000000e+00> : vector<17xf32>
    %121 = vector.multi_reduction <add>, %120, %cst_37 [1] : vector<17x17xf32> to vector<17xf32>
    %122 = vector.shape_cast %121 : vector<17xf32> to vector<17x1xf32>
    %123 = tpu.reciprocal %122 {approx = true} : vector<17x1xf32> -> vector<17x1xf32>
    %124 = vector.broadcast %123 : vector<17x1xf32> to vector<17x17xf32>
    %125 = arith.mulf %120, %124 : vector<17x17xf32>
    %126 = arith.truncf %125 : vector<17x17xf32> to vector<17x17xbf16>
    %cst_38 = arith.constant dense<0.000000e+00> : vector<17x16xf32>
    %127 = tpu.matmul %126, %114, %cst_38 {dimension_numbers = #tpu.dot_dimension_numbers<[1], [0], [0], [1], [0, 0, 1, 1], [], []>} : vector<17x17xbf16>, vector<17x16xbf16>, vector<17x16xf32> -> vector<17x16xf32>
    %128 = arith.truncf %127 : vector<17x16xf32> to vector<17x16xbf16>
    %c48 = arith.constant 48 : index
    %c0_39 = arith.constant 0 : index
    %129 = vector.load %arg6[%c48, %c0_39] : memref<64x64xf32, #tpu.memory_space<vmem>>, vector<16x64xf32>
    %130 = arith.truncf %129 : vector<16x64xf32> to vector<16x64xbf16>
    %cst_40 = arith.constant dense<0.000000e+00> : vector<17x64xf32>
    %131 = tpu.matmul %128, %130, %cst_40 {dimension_numbers = #tpu.dot_dimension_numbers<[1], [0], [0], [1], [0, 0, 1, 1], [], []>} : vector<17x16xbf16>, vector<16x64xbf16>, vector<17x64xf32> -> vector<17x64xf32>
    %132 = arith.addf %108, %131 : vector<17x64xf32>
    %133 = arith.addf %1, %132 : vector<17x64xf32>
    %c0_41 = arith.constant 0 : index
    %c0_42 = arith.constant 0 : index
    %134 = vector.load %arg7[%c0_41, %c0_42] : memref<1x64xf32, #tpu.memory_space<vmem>>, vector<1x64xf32>
    %135 = vector.broadcast %134 : vector<1x64xf32> to vector<17x64xf32>
    %136 = arith.addf %133, %135 : vector<17x64xf32>
    %c0_43 = arith.constant 0 : index
    %c0_44 = arith.constant 0 : index
    %c0_45 = arith.constant 0 : index
    %137 = vector.load %arg8[%c0_43, %c0_44, %c0_45] : memref<1x17x64xf32, #tpu.memory_space<vmem>>, vector<1x17x64xf32>
    %138 = vector.shape_cast %137 : vector<1x17x64xf32> to vector<17x64xf32>
    %139 = vector.shape_cast %136 : vector<17x64xf32> to vector<1x17x64xf32>
    tpu.vector_store %arg8[%c0_43, %c0_44, %c0_45], %139 {strides = array<i32>} : memref<1x17x64xf32, #tpu.memory_space<vmem>>, vector<1x17x64xf32>,
    return
  }
  func.func @transform_0(%arg0: i32) -> (i32, i32, i32) {
    %c0_i32 = arith.constant 0 : i32
    %c0_i32_0 = arith.constant 0 : i32
    %c0_i32_1 = arith.constant 0 : i32
    return %arg0, %c0_i32, %c0_i32_0 : i32, i32, i32
  }
  func.func @transform_1(%arg0: i32) -> (i32, i32) {
    %c0_i32 = arith.constant 0 : i32
    %c0_i32_0 = arith.constant 0 : i32
    %c0_i32_1 = arith.constant 0 : i32
    return %c0_i32, %c0_i32_0 : i32, i32
  }
  func.func @transform_2(%arg0: i32) -> (i32, i32) {
    %c0_i32 = arith.constant 0 : i32
    %c0_i32_0 = arith.constant 0 : i32
    %c0_i32_1 = arith.constant 0 : i32
    return %c0_i32, %c0_i32_0 : i32, i32
  }
  func.func @transform_3(%arg0: i32) -> (i32, i32) {
    %c0_i32 = arith.constant 0 : i32
    %c0_i32_0 = arith.constant 0 : i32
    %c0_i32_1 = arith.constant 0 : i32
    return %c0_i32, %c0_i32_0 : i32, i32
  }
  func.func @transform_4(%arg0: i32) -> (i32, i32) {
    %c0_i32 = arith.constant 0 : i32
    %c0_i32_0 = arith.constant 0 : i32
    %c0_i32_1 = arith.constant 0 : i32
    return %c0_i32, %c0_i32_0 : i32, i32
  }
  func.func @transform_5(%arg0: i32) -> (i32, i32) {
    %c0_i32 = arith.constant 0 : i32
    %c0_i32_0 = arith.constant 0 : i32
    %c0_i32_1 = arith.constant 0 : i32
    return %c0_i32, %c0_i32_0 : i32, i32
  }
  func.func @transform_6(%arg0: i32) -> (i32, i32) {
    %c0_i32 = arith.constant 0 : i32
    %c0_i32_0 = arith.constant 0 : i32
    %c0_i32_1 = arith.constant 0 : i32
    return %c0_i32, %c0_i32_0 : i32, i32
  }
  func.func @transform_7(%arg0: i32) -> (i32, i32, i32) {
    %c0_i32 = arith.constant 0 : i32
    %c0_i32_0 = arith.constant 0 : i32
    %c0_i32_1 = arith.constant 0 : i32
    return %arg0, %c0_i32, %c0_i32_0 : i32, i32, i32
  }
}

module attributes {stable_mosaic.version = 11 : i64} {
  func.func @_proj_kernel(%arg0: i32, %arg1: memref<16x64xf32, #tpu.memory_space<vmem>>, %arg2: memref<64x256xf32, #tpu.memory_space<vmem>>, %arg3: memref<128x128xf32, #tpu.memory_space<vmem>>, %arg4: memref<16x128xf32, #tpu.memory_space<vmem>>) attributes {dimension_semantics = [#tpu.dimension_semantics<arbitrary>], iteration_bounds = array<i64: 1>, scalar_prefetch = 0 : i64, scratch_operands = 0 : i64, tpu.core_type = #tpu.core_type<tc>, window_params = [{pipeline_mode = #tpu.pipeline_mode<synchronous>, transform_indices = @transform_0, window_bounds = array<i64: 16, 64>}, {pipeline_mode = #tpu.pipeline_mode<synchronous>, transform_indices = @transform_1, window_bounds = array<i64: 64, 256>}, {pipeline_mode = #tpu.pipeline_mode<synchronous>, transform_indices = @transform_2, window_bounds = array<i64: 128, 128>}, {pipeline_mode = #tpu.pipeline_mode<synchronous>, transform_indices = @transform_3, window_bounds = array<i64: 16, 128>}]} {
    %c0 = arith.constant 0 : index
    %c0_0 = arith.constant 0 : index
    %0 = vector.load %arg1[%c0, %c0_0] : memref<16x64xf32, #tpu.memory_space<vmem>>, vector<16x64xf32>
    %1 = arith.truncf %0 : vector<16x64xf32> to vector<16x64xbf16>
    %c0_1 = arith.constant 0 : index
    %c0_2 = arith.constant 0 : index
    %2 = vector.load %arg2[%c0_1, %c0_2] : memref<64x256xf32, #tpu.memory_space<vmem>>, vector<64x256xf32>
    %3 = arith.truncf %2 : vector<64x256xf32> to vector<64x256xbf16>
    %cst = arith.constant dense<0.000000e+00> : vector<16x256xf32>
    %4 = tpu.matmul %1, %3, %cst {dimension_numbers = #tpu.dot_dimension_numbers<[1], [0], [0], [1], [0, 0, 1, 1], [], []>} : vector<16x64xbf16>, vector<64x256xbf16>, vector<16x256xf32> -> vector<16x256xf32>
    %5 = vector.extract_strided_slice %4 {offsets = [0, 0], sizes = [16, 128], strides = [1, 1]} : vector<16x256xf32> to vector<16x128xf32>
    %6 = vector.extract_strided_slice %4 {offsets = [0, 128], sizes = [16, 128], strides = [1, 1]} : vector<16x256xf32> to vector<16x128xf32>
    %7 = arith.negf %5 : vector<16x128xf32>
    %8 = math.exp %7 : vector<16x128xf32>
    %cst_3 = arith.constant 1.000000e+00 : f32
    %9 = vector.broadcast %cst_3 : f32 to vector<16x128xf32>
    %10 = arith.addf %9, %8 : vector<16x128xf32>
    %11 = arith.divf %9, %10 : vector<16x128xf32>
    %12 = arith.mulf %5, %11 : vector<16x128xf32>
    %13 = arith.mulf %12, %6 : vector<16x128xf32>
    %14 = arith.truncf %13 : vector<16x128xf32> to vector<16x128xbf16>
    %c0_4 = arith.constant 0 : index
    %c0_5 = arith.constant 0 : index
    %15 = vector.load %arg3[%c0_4, %c0_5] : memref<128x128xf32, #tpu.memory_space<vmem>>, vector<128x128xf32>
    %16 = arith.truncf %15 : vector<128x128xf32> to vector<128x128xbf16>
    %cst_6 = arith.constant dense<0.000000e+00> : vector<16x128xf32>
    %17 = tpu.matmul %14, %16, %cst_6 {dimension_numbers = #tpu.dot_dimension_numbers<[1], [0], [0], [1], [0, 0, 1, 1], [], []>} : vector<16x128xbf16>, vector<128x128xbf16>, vector<16x128xf32> -> vector<16x128xf32>
    %c0_7 = arith.constant 0 : index
    %c0_8 = arith.constant 0 : index
    %18 = vector.load %arg4[%c0_7, %c0_8] : memref<16x128xf32, #tpu.memory_space<vmem>>, vector<16x128xf32>
    tpu.vector_store %arg4[%c0_7, %c0_8], %17 {strides = array<i32>} : memref<16x128xf32, #tpu.memory_space<vmem>>, vector<16x128xf32>,
    return
  }
  func.func @transform_0(%arg0: i32) -> (i32, i32) {
    %c0_i32 = arith.constant 0 : i32
    %c0_i32_0 = arith.constant 0 : i32
    %c0_i32_1 = arith.constant 0 : i32
    return %c0_i32, %c0_i32_0 : i32, i32
  }
  func.func @transform_1(%arg0: i32) -> (i32, i32) {
    %c0_i32 = arith.constant 0 : i32
    %c0_i32_0 = arith.constant 0 : i32
    %c0_i32_1 = arith.constant 0 : i32
    return %c0_i32, %c0_i32_0 : i32, i32
  }
  func.func @transform_2(%arg0: i32) -> (i32, i32) {
    %c0_i32 = arith.constant 0 : i32
    %c0_i32_0 = arith.constant 0 : i32
    %c0_i32_1 = arith.constant 0 : i32
    return %c0_i32, %c0_i32_0 : i32, i32
  }
  func.func @transform_3(%arg0: i32) -> (i32, i32) {
    %c0_i32 = arith.constant 0 : i32
    %c0_i32_0 = arith.constant 0 : i32
    %c0_i32_1 = arith.constant 0 : i32
    return %c0_i32, %c0_i32_0 : i32, i32
  }
}

module attributes {stable_mosaic.version = 11 : i64} {
  func.func @_pool_attn_kernel(%arg0: i32, %arg1: memref<64x64xf32, #tpu.memory_space<vmem>>, %arg2: memref<64x1xf32, #tpu.memory_space<vmem>>, %arg3: memref<64x64xf32, #tpu.memory_space<vmem>>, %arg4: memref<1x64xf32, #tpu.memory_space<vmem>>, %arg5: memref<64x128xf32, #tpu.memory_space<vmem>>, %arg6: memref<1x128xf32, #tpu.memory_space<vmem>>, %arg7: memref<64x64xf32, #tpu.memory_space<vmem>>, %arg8: memref<1x64xf32, #tpu.memory_space<vmem>>, %arg9: memref<16x64xf32, #tpu.memory_space<vmem>>) attributes {dimension_semantics = [#tpu.dimension_semantics<arbitrary>], iteration_bounds = array<i64: 1>, scalar_prefetch = 0 : i64, scratch_operands = 0 : i64, tpu.core_type = #tpu.core_type<tc>, window_params = [{pipeline_mode = #tpu.pipeline_mode<synchronous>, transform_indices = @transform_0, window_bounds = array<i64: 64, 64>}, {pipeline_mode = #tpu.pipeline_mode<synchronous>, transform_indices = @transform_1, window_bounds = array<i64: 64, 1>}, {pipeline_mode = #tpu.pipeline_mode<synchronous>, transform_indices = @transform_2, window_bounds = array<i64: 64, 64>}, {pipeline_mode = #tpu.pipeline_mode<synchronous>, transform_indices = @transform_3, window_bounds = array<i64: 1, 64>}, {pipeline_mode = #tpu.pipeline_mode<synchronous>, transform_indices = @transform_4, window_bounds = array<i64: 64, 128>}, {pipeline_mode = #tpu.pipeline_mode<synchronous>, transform_indices = @transform_5, window_bounds = array<i64: 1, 128>}, {pipeline_mode = #tpu.pipeline_mode<synchronous>, transform_indices = @transform_6, window_bounds = array<i64: 64, 64>}, {pipeline_mode = #tpu.pipeline_mode<synchronous>, transform_indices = @transform_7, window_bounds = array<i64: 1, 64>}, {pipeline_mode = #tpu.pipeline_mode<synchronous>, transform_indices = @transform_8, window_bounds = array<i64: 16, 64>}]} {
    %c0 = arith.constant 0 : index
    %c0_0 = arith.constant 0 : index
    %0 = vector.load %arg1[%c0, %c0_0] : memref<64x64xf32, #tpu.memory_space<vmem>>, vector<64x64xf32>
    %c0_1 = arith.constant 0 : index
    %c0_2 = arith.constant 0 : index
    %1 = vector.load %arg2[%c0_1, %c0_2] : memref<64x1xf32, #tpu.memory_space<vmem>>, vector<64x1xf32>
    %2 = vector.broadcast %1 : vector<64x1xf32> to vector<64x64xf32>
    %3 = arith.mulf %0, %2 : vector<64x64xf32>
    %4 = vector.extract_strided_slice %3 {offsets = [0, 0], sizes = [16, 64], strides = [1, 1]} : vector<64x64xf32> to vector<16x64xf32>
    %5 = vector.extract_strided_slice %3 {offsets = [16, 0], sizes = [16, 64], strides = [1, 1]} : vector<64x64xf32> to vector<16x64xf32>
    %6 = arith.addf %4, %5 : vector<16x64xf32>
    %7 = vector.extract_strided_slice %3 {offsets = [32, 0], sizes = [16, 64], strides = [1, 1]} : vector<64x64xf32> to vector<16x64xf32>
    %8 = arith.addf %6, %7 : vector<16x64xf32>
    %9 = vector.extract_strided_slice %3 {offsets = [48, 0], sizes = [16, 64], strides = [1, 1]} : vector<64x64xf32> to vector<16x64xf32>
    %10 = arith.addf %8, %9 : vector<16x64xf32>
    %cst = arith.constant 2.500000e-01 : f32
    %11 = vector.broadcast %cst : f32 to vector<16x64xf32>
    %12 = arith.mulf %10, %11 : vector<16x64xf32>
    %13 = arith.truncf %12 : vector<16x64xf32> to vector<16x64xbf16>
    %c0_3 = arith.constant 0 : index
    %c0_4 = arith.constant 0 : index
    %14 = vector.load %arg3[%c0_3, %c0_4] : memref<64x64xf32, #tpu.memory_space<vmem>>, vector<64x64xf32>
    %15 = arith.truncf %14 : vector<64x64xf32> to vector<64x64xbf16>
    %cst_5 = arith.constant dense<0.000000e+00> : vector<16x64xf32>
    %16 = tpu.matmul %13, %15, %cst_5 {dimension_numbers = #tpu.dot_dimension_numbers<[1], [0], [0], [1], [0, 0, 1, 1], [], []>} : vector<16x64xbf16>, vector<64x64xbf16>, vector<16x64xf32> -> vector<16x64xf32>
    %c0_6 = arith.constant 0 : index
    %c0_7 = arith.constant 0 : index
    %17 = vector.load %arg4[%c0_6, %c0_7] : memref<1x64xf32, #tpu.memory_space<vmem>>, vector<1x64xf32>
    %18 = vector.broadcast %17 : vector<1x64xf32> to vector<16x64xf32>
    %19 = arith.addf %16, %18 : vector<16x64xf32>
    %20 = arith.truncf %3 : vector<64x64xf32> to vector<64x64xbf16>
    %c0_8 = arith.constant 0 : index
    %c0_9 = arith.constant 0 : index
    %21 = vector.load %arg5[%c0_8, %c0_9] : memref<64x128xf32, #tpu.memory_space<vmem>>, vector<64x128xf32>
    %22 = arith.truncf %21 : vector<64x128xf32> to vector<64x128xbf16>
    %cst_10 = arith.constant dense<0.000000e+00> : vector<64x128xf32>
    %23 = tpu.matmul %20, %22, %cst_10 {dimension_numbers = #tpu.dot_dimension_numbers<[1], [0], [0], [1], [0, 0, 1, 1], [], []>} : vector<64x64xbf16>, vector<64x128xbf16>, vector<64x128xf32> -> vector<64x128xf32>
    %c0_11 = arith.constant 0 : index
    %c0_12 = arith.constant 0 : index
    %24 = vector.load %arg6[%c0_11, %c0_12] : memref<1x128xf32, #tpu.memory_space<vmem>>, vector<1x128xf32>
    %25 = vector.broadcast %24 : vector<1x128xf32> to vector<64x128xf32>
    %26 = arith.addf %23, %25 : vector<64x128xf32>
    %27 = vector.extract_strided_slice %19 {offsets = [0, 0], sizes = [16, 16], strides = [1, 1]} : vector<16x64xf32> to vector<16x16xf32>
    %cst_13 = arith.constant 2.500000e-01 : f32
    %28 = vector.broadcast %cst_13 : f32 to vector<16x16xf32>
    %29 = arith.mulf %27, %28 : vector<16x16xf32>
    %30 = vector.extract_strided_slice %26 {offsets = [0, 0], sizes = [16, 16], strides = [1, 1]} : vector<64x128xf32> to vector<16x16xf32>
    %31 = arith.mulf %29, %30 : vector<16x16xf32>
    %cst_14 = arith.constant dense<0.000000e+00> : vector<16xf32>
    %32 = vector.multi_reduction <add>, %31, %cst_14 [1] : vector<16x16xf32> to vector<16xf32>
    %33 = vector.shape_cast %32 : vector<16xf32> to vector<16x1xf32>
    %34 = vector.extract_strided_slice %26 {offsets = [16, 0], sizes = [16, 16], strides = [1, 1]} : vector<64x128xf32> to vector<16x16xf32>
    %35 = arith.mulf %29, %34 : vector<16x16xf32>
    %cst_15 = arith.constant dense<0.000000e+00> : vector<16xf32>
    %36 = vector.multi_reduction <add>, %35, %cst_15 [1] : vector<16x16xf32> to vector<16xf32>
    %37 = vector.shape_cast %36 : vector<16xf32> to vector<16x1xf32>
    %38 = vector.extract_strided_slice %26 {offsets = [32, 0], sizes = [16, 16], strides = [1, 1]} : vector<64x128xf32> to vector<16x16xf32>
    %39 = arith.mulf %29, %38 : vector<16x16xf32>
    %cst_16 = arith.constant dense<0.000000e+00> : vector<16xf32>
    %40 = vector.multi_reduction <add>, %39, %cst_16 [1] : vector<16x16xf32> to vector<16xf32>
    %41 = vector.shape_cast %40 : vector<16xf32> to vector<16x1xf32>
    %42 = vector.extract_strided_slice %26 {offsets = [48, 0], sizes = [16, 16], strides = [1, 1]} : vector<64x128xf32> to vector<16x16xf32>
    %43 = arith.mulf %29, %42 : vector<16x16xf32>
    %cst_17 = arith.constant dense<0.000000e+00> : vector<16xf32>
    %44 = vector.multi_reduction <add>, %43, %cst_17 [1] : vector<16x16xf32> to vector<16xf32>
    %45 = vector.shape_cast %44 : vector<16xf32> to vector<16x1xf32>
    %46 = arith.maximumf %33, %37 : vector<16x1xf32>
    %47 = arith.maximumf %46, %41 : vector<16x1xf32>
    %48 = arith.maximumf %47, %45 : vector<16x1xf32>
    %49 = arith.subf %33, %48 : vector<16x1xf32>
    %50 = math.exp %49 : vector<16x1xf32>
    %51 = arith.subf %37, %48 : vector<16x1xf32>
    %52 = math.exp %51 : vector<16x1xf32>
    %53 = arith.subf %41, %48 : vector<16x1xf32>
    %54 = math.exp %53 : vector<16x1xf32>
    %55 = arith.subf %45, %48 : vector<16x1xf32>
    %56 = math.exp %55 : vector<16x1xf32>
    %57 = arith.addf %50, %52 : vector<16x1xf32>
    %58 = arith.addf %57, %54 : vector<16x1xf32>
    %59 = arith.addf %58, %56 : vector<16x1xf32>
    %60 = tpu.reciprocal %59 {approx = true} : vector<16x1xf32> -> vector<16x1xf32>
    %61 = vector.extract_strided_slice %26 {offsets = [0, 64], sizes = [16, 16], strides = [1, 1]} : vector<64x128xf32> to vector<16x16xf32>
    %62 = arith.mulf %50, %60 : vector<16x1xf32>
    %63 = vector.broadcast %62 : vector<16x1xf32> to vector<16x16xf32>
    %64 = arith.mulf %63, %61 : vector<16x16xf32>
    %65 = vector.extract_strided_slice %26 {offsets = [16, 64], sizes = [16, 16], strides = [1, 1]} : vector<64x128xf32> to vector<16x16xf32>
    %66 = arith.mulf %52, %60 : vector<16x1xf32>
    %67 = vector.broadcast %66 : vector<16x1xf32> to vector<16x16xf32>
    %68 = arith.mulf %67, %65 : vector<16x16xf32>
    %69 = arith.addf %64, %68 : vector<16x16xf32>
    %70 = vector.extract_strided_slice %26 {offsets = [32, 64], sizes = [16, 16], strides = [1, 1]} : vector<64x128xf32> to vector<16x16xf32>
    %71 = arith.mulf %54, %60 : vector<16x1xf32>
    %72 = vector.broadcast %71 : vector<16x1xf32> to vector<16x16xf32>
    %73 = arith.mulf %72, %70 : vector<16x16xf32>
    %74 = arith.addf %69, %73 : vector<16x16xf32>
    %75 = vector.extract_strided_slice %26 {offsets = [48, 64], sizes = [16, 16], strides = [1, 1]} : vector<64x128xf32> to vector<16x16xf32>
    %76 = arith.mulf %56, %60 : vector<16x1xf32>
    %77 = vector.broadcast %76 : vector<16x1xf32> to vector<16x16xf32>
    %78 = arith.mulf %77, %75 : vector<16x16xf32>
    %79 = arith.addf %74, %78 : vector<16x16xf32>
    %80 = arith.truncf %79 : vector<16x16xf32> to vector<16x16xbf16>
    %c0_18 = arith.constant 0 : index
    %c0_19 = arith.constant 0 : index
    %81 = vector.load %arg7[%c0_18, %c0_19] : memref<64x64xf32, #tpu.memory_space<vmem>>, vector<16x64xf32>
    %82 = arith.truncf %81 : vector<16x64xf32> to vector<16x64xbf16>
    %cst_20 = arith.constant dense<0.000000e+00> : vector<16x64xf32>
    %83 = tpu.matmul %80, %82, %cst_20 {dimension_numbers = #tpu.dot_dimension_numbers<[1], [0], [0], [1], [0, 0, 1, 1], [], []>} : vector<16x16xbf16>, vector<16x64xbf16>, vector<16x64xf32> -> vector<16x64xf32>
    %84 = vector.extract_strided_slice %19 {offsets = [0, 16], sizes = [16, 16], strides = [1, 1]} : vector<16x64xf32> to vector<16x16xf32>
    %cst_21 = arith.constant 2.500000e-01 : f32
    %85 = vector.broadcast %cst_21 : f32 to vector<16x16xf32>
    %86 = arith.mulf %84, %85 : vector<16x16xf32>
    %87 = vector.extract_strided_slice %26 {offsets = [0, 16], sizes = [16, 16], strides = [1, 1]} : vector<64x128xf32> to vector<16x16xf32>
    %88 = arith.mulf %86, %87 : vector<16x16xf32>
    %cst_22 = arith.constant dense<0.000000e+00> : vector<16xf32>
    %89 = vector.multi_reduction <add>, %88, %cst_22 [1] : vector<16x16xf32> to vector<16xf32>
    %90 = vector.shape_cast %89 : vector<16xf32> to vector<16x1xf32>
    %91 = vector.extract_strided_slice %26 {offsets = [16, 16], sizes = [16, 16], strides = [1, 1]} : vector<64x128xf32> to vector<16x16xf32>
    %92 = arith.mulf %86, %91 : vector<16x16xf32>
    %cst_23 = arith.constant dense<0.000000e+00> : vector<16xf32>
    %93 = vector.multi_reduction <add>, %92, %cst_23 [1] : vector<16x16xf32> to vector<16xf32>
    %94 = vector.shape_cast %93 : vector<16xf32> to vector<16x1xf32>
    %95 = vector.extract_strided_slice %26 {offsets = [32, 16], sizes = [16, 16], strides = [1, 1]} : vector<64x128xf32> to vector<16x16xf32>
    %96 = arith.mulf %86, %95 : vector<16x16xf32>
    %cst_24 = arith.constant dense<0.000000e+00> : vector<16xf32>
    %97 = vector.multi_reduction <add>, %96, %cst_24 [1] : vector<16x16xf32> to vector<16xf32>
    %98 = vector.shape_cast %97 : vector<16xf32> to vector<16x1xf32>
    %99 = vector.extract_strided_slice %26 {offsets = [48, 16], sizes = [16, 16], strides = [1, 1]} : vector<64x128xf32> to vector<16x16xf32>
    %100 = arith.mulf %86, %99 : vector<16x16xf32>
    %cst_25 = arith.constant dense<0.000000e+00> : vector<16xf32>
    %101 = vector.multi_reduction <add>, %100, %cst_25 [1] : vector<16x16xf32> to vector<16xf32>
    %102 = vector.shape_cast %101 : vector<16xf32> to vector<16x1xf32>
    %103 = arith.maximumf %90, %94 : vector<16x1xf32>
    %104 = arith.maximumf %103, %98 : vector<16x1xf32>
    %105 = arith.maximumf %104, %102 : vector<16x1xf32>
    %106 = arith.subf %90, %105 : vector<16x1xf32>
    %107 = math.exp %106 : vector<16x1xf32>
    %108 = arith.subf %94, %105 : vector<16x1xf32>
    %109 = math.exp %108 : vector<16x1xf32>
    %110 = arith.subf %98, %105 : vector<16x1xf32>
    %111 = math.exp %110 : vector<16x1xf32>
    %112 = arith.subf %102, %105 : vector<16x1xf32>
    %113 = math.exp %112 : vector<16x1xf32>
    %114 = arith.addf %107, %109 : vector<16x1xf32>
    %115 = arith.addf %114, %111 : vector<16x1xf32>
    %116 = arith.addf %115, %113 : vector<16x1xf32>
    %117 = tpu.reciprocal %116 {approx = true} : vector<16x1xf32> -> vector<16x1xf32>
    %118 = vector.extract_strided_slice %26 {offsets = [0, 80], sizes = [16, 16], strides = [1, 1]} : vector<64x128xf32> to vector<16x16xf32>
    %119 = arith.mulf %107, %117 : vector<16x1xf32>
    %120 = vector.broadcast %119 : vector<16x1xf32> to vector<16x16xf32>
    %121 = arith.mulf %120, %118 : vector<16x16xf32>
    %122 = vector.extract_strided_slice %26 {offsets = [16, 80], sizes = [16, 16], strides = [1, 1]} : vector<64x128xf32> to vector<16x16xf32>
    %123 = arith.mulf %109, %117 : vector<16x1xf32>
    %124 = vector.broadcast %123 : vector<16x1xf32> to vector<16x16xf32>
    %125 = arith.mulf %124, %122 : vector<16x16xf32>
    %126 = arith.addf %121, %125 : vector<16x16xf32>
    %127 = vector.extract_strided_slice %26 {offsets = [32, 80], sizes = [16, 16], strides = [1, 1]} : vector<64x128xf32> to vector<16x16xf32>
    %128 = arith.mulf %111, %117 : vector<16x1xf32>
    %129 = vector.broadcast %128 : vector<16x1xf32> to vector<16x16xf32>
    %130 = arith.mulf %129, %127 : vector<16x16xf32>
    %131 = arith.addf %126, %130 : vector<16x16xf32>
    %132 = vector.extract_strided_slice %26 {offsets = [48, 80], sizes = [16, 16], strides = [1, 1]} : vector<64x128xf32> to vector<16x16xf32>
    %133 = arith.mulf %113, %117 : vector<16x1xf32>
    %134 = vector.broadcast %133 : vector<16x1xf32> to vector<16x16xf32>
    %135 = arith.mulf %134, %132 : vector<16x16xf32>
    %136 = arith.addf %131, %135 : vector<16x16xf32>
    %137 = arith.truncf %136 : vector<16x16xf32> to vector<16x16xbf16>
    %c16 = arith.constant 16 : index
    %c0_26 = arith.constant 0 : index
    %138 = vector.load %arg7[%c16, %c0_26] : memref<64x64xf32, #tpu.memory_space<vmem>>, vector<16x64xf32>
    %139 = arith.truncf %138 : vector<16x64xf32> to vector<16x64xbf16>
    %cst_27 = arith.constant dense<0.000000e+00> : vector<16x64xf32>
    %140 = tpu.matmul %137, %139, %cst_27 {dimension_numbers = #tpu.dot_dimension_numbers<[1], [0], [0], [1], [0, 0, 1, 1], [], []>} : vector<16x16xbf16>, vector<16x64xbf16>, vector<16x64xf32> -> vector<16x64xf32>
    %141 = arith.addf %83, %140 : vector<16x64xf32>
    %142 = vector.extract_strided_slice %19 {offsets = [0, 32], sizes = [16, 16], strides = [1, 1]} : vector<16x64xf32> to vector<16x16xf32>
    %cst_28 = arith.constant 2.500000e-01 : f32
    %143 = vector.broadcast %cst_28 : f32 to vector<16x16xf32>
    %144 = arith.mulf %142, %143 : vector<16x16xf32>
    %145 = vector.extract_strided_slice %26 {offsets = [0, 32], sizes = [16, 16], strides = [1, 1]} : vector<64x128xf32> to vector<16x16xf32>
    %146 = arith.mulf %144, %145 : vector<16x16xf32>
    %cst_29 = arith.constant dense<0.000000e+00> : vector<16xf32>
    %147 = vector.multi_reduction <add>, %146, %cst_29 [1] : vector<16x16xf32> to vector<16xf32>
    %148 = vector.shape_cast %147 : vector<16xf32> to vector<16x1xf32>
    %149 = vector.extract_strided_slice %26 {offsets = [16, 32], sizes = [16, 16], strides = [1, 1]} : vector<64x128xf32> to vector<16x16xf32>
    %150 = arith.mulf %144, %149 : vector<16x16xf32>
    %cst_30 = arith.constant dense<0.000000e+00> : vector<16xf32>
    %151 = vector.multi_reduction <add>, %150, %cst_30 [1] : vector<16x16xf32> to vector<16xf32>
    %152 = vector.shape_cast %151 : vector<16xf32> to vector<16x1xf32>
    %153 = vector.extract_strided_slice %26 {offsets = [32, 32], sizes = [16, 16], strides = [1, 1]} : vector<64x128xf32> to vector<16x16xf32>
    %154 = arith.mulf %144, %153 : vector<16x16xf32>
    %cst_31 = arith.constant dense<0.000000e+00> : vector<16xf32>
    %155 = vector.multi_reduction <add>, %154, %cst_31 [1] : vector<16x16xf32> to vector<16xf32>
    %156 = vector.shape_cast %155 : vector<16xf32> to vector<16x1xf32>
    %157 = vector.extract_strided_slice %26 {offsets = [48, 32], sizes = [16, 16], strides = [1, 1]} : vector<64x128xf32> to vector<16x16xf32>
    %158 = arith.mulf %144, %157 : vector<16x16xf32>
    %cst_32 = arith.constant dense<0.000000e+00> : vector<16xf32>
    %159 = vector.multi_reduction <add>, %158, %cst_32 [1] : vector<16x16xf32> to vector<16xf32>
    %160 = vector.shape_cast %159 : vector<16xf32> to vector<16x1xf32>
    %161 = arith.maximumf %148, %152 : vector<16x1xf32>
    %162 = arith.maximumf %161, %156 : vector<16x1xf32>
    %163 = arith.maximumf %162, %160 : vector<16x1xf32>
    %164 = arith.subf %148, %163 : vector<16x1xf32>
    %165 = math.exp %164 : vector<16x1xf32>
    %166 = arith.subf %152, %163 : vector<16x1xf32>
    %167 = math.exp %166 : vector<16x1xf32>
    %168 = arith.subf %156, %163 : vector<16x1xf32>
    %169 = math.exp %168 : vector<16x1xf32>
    %170 = arith.subf %160, %163 : vector<16x1xf32>
    %171 = math.exp %170 : vector<16x1xf32>
    %172 = arith.addf %165, %167 : vector<16x1xf32>
    %173 = arith.addf %172, %169 : vector<16x1xf32>
    %174 = arith.addf %173, %171 : vector<16x1xf32>
    %175 = tpu.reciprocal %174 {approx = true} : vector<16x1xf32> -> vector<16x1xf32>
    %176 = vector.extract_strided_slice %26 {offsets = [0, 96], sizes = [16, 16], strides = [1, 1]} : vector<64x128xf32> to vector<16x16xf32>
    %177 = arith.mulf %165, %175 : vector<16x1xf32>
    %178 = vector.broadcast %177 : vector<16x1xf32> to vector<16x16xf32>
    %179 = arith.mulf %178, %176 : vector<16x16xf32>
    %180 = vector.extract_strided_slice %26 {offsets = [16, 96], sizes = [16, 16], strides = [1, 1]} : vector<64x128xf32> to vector<16x16xf32>
    %181 = arith.mulf %167, %175 : vector<16x1xf32>
    %182 = vector.broadcast %181 : vector<16x1xf32> to vector<16x16xf32>
    %183 = arith.mulf %182, %180 : vector<16x16xf32>
    %184 = arith.addf %179, %183 : vector<16x16xf32>
    %185 = vector.extract_strided_slice %26 {offsets = [32, 96], sizes = [16, 16], strides = [1, 1]} : vector<64x128xf32> to vector<16x16xf32>
    %186 = arith.mulf %169, %175 : vector<16x1xf32>
    %187 = vector.broadcast %186 : vector<16x1xf32> to vector<16x16xf32>
    %188 = arith.mulf %187, %185 : vector<16x16xf32>
    %189 = arith.addf %184, %188 : vector<16x16xf32>
    %190 = vector.extract_strided_slice %26 {offsets = [48, 96], sizes = [16, 16], strides = [1, 1]} : vector<64x128xf32> to vector<16x16xf32>
    %191 = arith.mulf %171, %175 : vector<16x1xf32>
    %192 = vector.broadcast %191 : vector<16x1xf32> to vector<16x16xf32>
    %193 = arith.mulf %192, %190 : vector<16x16xf32>
    %194 = arith.addf %189, %193 : vector<16x16xf32>
    %195 = arith.truncf %194 : vector<16x16xf32> to vector<16x16xbf16>
    %c32 = arith.constant 32 : index
    %c0_33 = arith.constant 0 : index
    %196 = vector.load %arg7[%c32, %c0_33] : memref<64x64xf32, #tpu.memory_space<vmem>>, vector<16x64xf32>
    %197 = arith.truncf %196 : vector<16x64xf32> to vector<16x64xbf16>
    %cst_34 = arith.constant dense<0.000000e+00> : vector<16x64xf32>
    %198 = tpu.matmul %195, %197, %cst_34 {dimension_numbers = #tpu.dot_dimension_numbers<[1], [0], [0], [1], [0, 0, 1, 1], [], []>} : vector<16x16xbf16>, vector<16x64xbf16>, vector<16x64xf32> -> vector<16x64xf32>
    %199 = arith.addf %141, %198 : vector<16x64xf32>
    %200 = vector.extract_strided_slice %19 {offsets = [0, 48], sizes = [16, 16], strides = [1, 1]} : vector<16x64xf32> to vector<16x16xf32>
    %cst_35 = arith.constant 2.500000e-01 : f32
    %201 = vector.broadcast %cst_35 : f32 to vector<16x16xf32>
    %202 = arith.mulf %200, %201 : vector<16x16xf32>
    %203 = vector.extract_strided_slice %26 {offsets = [0, 48], sizes = [16, 16], strides = [1, 1]} : vector<64x128xf32> to vector<16x16xf32>
    %204 = arith.mulf %202, %203 : vector<16x16xf32>
    %cst_36 = arith.constant dense<0.000000e+00> : vector<16xf32>
    %205 = vector.multi_reduction <add>, %204, %cst_36 [1] : vector<16x16xf32> to vector<16xf32>
    %206 = vector.shape_cast %205 : vector<16xf32> to vector<16x1xf32>
    %207 = vector.extract_strided_slice %26 {offsets = [16, 48], sizes = [16, 16], strides = [1, 1]} : vector<64x128xf32> to vector<16x16xf32>
    %208 = arith.mulf %202, %207 : vector<16x16xf32>
    %cst_37 = arith.constant dense<0.000000e+00> : vector<16xf32>
    %209 = vector.multi_reduction <add>, %208, %cst_37 [1] : vector<16x16xf32> to vector<16xf32>
    %210 = vector.shape_cast %209 : vector<16xf32> to vector<16x1xf32>
    %211 = vector.extract_strided_slice %26 {offsets = [32, 48], sizes = [16, 16], strides = [1, 1]} : vector<64x128xf32> to vector<16x16xf32>
    %212 = arith.mulf %202, %211 : vector<16x16xf32>
    %cst_38 = arith.constant dense<0.000000e+00> : vector<16xf32>
    %213 = vector.multi_reduction <add>, %212, %cst_38 [1] : vector<16x16xf32> to vector<16xf32>
    %214 = vector.shape_cast %213 : vector<16xf32> to vector<16x1xf32>
    %215 = vector.extract_strided_slice %26 {offsets = [48, 48], sizes = [16, 16], strides = [1, 1]} : vector<64x128xf32> to vector<16x16xf32>
    %216 = arith.mulf %202, %215 : vector<16x16xf32>
    %cst_39 = arith.constant dense<0.000000e+00> : vector<16xf32>
    %217 = vector.multi_reduction <add>, %216, %cst_39 [1] : vector<16x16xf32> to vector<16xf32>
    %218 = vector.shape_cast %217 : vector<16xf32> to vector<16x1xf32>
    %219 = arith.maximumf %206, %210 : vector<16x1xf32>
    %220 = arith.maximumf %219, %214 : vector<16x1xf32>
    %221 = arith.maximumf %220, %218 : vector<16x1xf32>
    %222 = arith.subf %206, %221 : vector<16x1xf32>
    %223 = math.exp %222 : vector<16x1xf32>
    %224 = arith.subf %210, %221 : vector<16x1xf32>
    %225 = math.exp %224 : vector<16x1xf32>
    %226 = arith.subf %214, %221 : vector<16x1xf32>
    %227 = math.exp %226 : vector<16x1xf32>
    %228 = arith.subf %218, %221 : vector<16x1xf32>
    %229 = math.exp %228 : vector<16x1xf32>
    %230 = arith.addf %223, %225 : vector<16x1xf32>
    %231 = arith.addf %230, %227 : vector<16x1xf32>
    %232 = arith.addf %231, %229 : vector<16x1xf32>
    %233 = tpu.reciprocal %232 {approx = true} : vector<16x1xf32> -> vector<16x1xf32>
    %234 = vector.extract_strided_slice %26 {offsets = [0, 112], sizes = [16, 16], strides = [1, 1]} : vector<64x128xf32> to vector<16x16xf32>
    %235 = arith.mulf %223, %233 : vector<16x1xf32>
    %236 = vector.broadcast %235 : vector<16x1xf32> to vector<16x16xf32>
    %237 = arith.mulf %236, %234 : vector<16x16xf32>
    %238 = vector.extract_strided_slice %26 {offsets = [16, 112], sizes = [16, 16], strides = [1, 1]} : vector<64x128xf32> to vector<16x16xf32>
    %239 = arith.mulf %225, %233 : vector<16x1xf32>
    %240 = vector.broadcast %239 : vector<16x1xf32> to vector<16x16xf32>
    %241 = arith.mulf %240, %238 : vector<16x16xf32>
    %242 = arith.addf %237, %241 : vector<16x16xf32>
    %243 = vector.extract_strided_slice %26 {offsets = [32, 112], sizes = [16, 16], strides = [1, 1]} : vector<64x128xf32> to vector<16x16xf32>
    %244 = arith.mulf %227, %233 : vector<16x1xf32>
    %245 = vector.broadcast %244 : vector<16x1xf32> to vector<16x16xf32>
    %246 = arith.mulf %245, %243 : vector<16x16xf32>
    %247 = arith.addf %242, %246 : vector<16x16xf32>
    %248 = vector.extract_strided_slice %26 {offsets = [48, 112], sizes = [16, 16], strides = [1, 1]} : vector<64x128xf32> to vector<16x16xf32>
    %249 = arith.mulf %229, %233 : vector<16x1xf32>
    %250 = vector.broadcast %249 : vector<16x1xf32> to vector<16x16xf32>
    %251 = arith.mulf %250, %248 : vector<16x16xf32>
    %252 = arith.addf %247, %251 : vector<16x16xf32>
    %253 = arith.truncf %252 : vector<16x16xf32> to vector<16x16xbf16>
    %c48 = arith.constant 48 : index
    %c0_40 = arith.constant 0 : index
    %254 = vector.load %arg7[%c48, %c0_40] : memref<64x64xf32, #tpu.memory_space<vmem>>, vector<16x64xf32>
    %255 = arith.truncf %254 : vector<16x64xf32> to vector<16x64xbf16>
    %cst_41 = arith.constant dense<0.000000e+00> : vector<16x64xf32>
    %256 = tpu.matmul %253, %255, %cst_41 {dimension_numbers = #tpu.dot_dimension_numbers<[1], [0], [0], [1], [0, 0, 1, 1], [], []>} : vector<16x16xbf16>, vector<16x64xbf16>, vector<16x64xf32> -> vector<16x64xf32>
    %257 = arith.addf %199, %256 : vector<16x64xf32>
    %c0_42 = arith.constant 0 : index
    %c0_43 = arith.constant 0 : index
    %258 = vector.load %arg8[%c0_42, %c0_43] : memref<1x64xf32, #tpu.memory_space<vmem>>, vector<1x64xf32>
    %259 = vector.broadcast %258 : vector<1x64xf32> to vector<16x64xf32>
    %260 = arith.addf %257, %259 : vector<16x64xf32>
    %c0_44 = arith.constant 0 : index
    %c0_45 = arith.constant 0 : index
    %261 = vector.load %arg9[%c0_44, %c0_45] : memref<16x64xf32, #tpu.memory_space<vmem>>, vector<16x64xf32>
    tpu.vector_store %arg9[%c0_44, %c0_45], %260 {strides = array<i32>} : memref<16x64xf32, #tpu.memory_space<vmem>>, vector<16x64xf32>,
    return
  }
  func.func @transform_0(%arg0: i32) -> (i32, i32) {
    %c0_i32 = arith.constant 0 : i32
    %c0_i32_0 = arith.constant 0 : i32
    %c0_i32_1 = arith.constant 0 : i32
    return %c0_i32, %c0_i32_0 : i32, i32
  }
  func.func @transform_1(%arg0: i32) -> (i32, i32) {
    %c0_i32 = arith.constant 0 : i32
    %c0_i32_0 = arith.constant 0 : i32
    %c0_i32_1 = arith.constant 0 : i32
    return %c0_i32, %c0_i32_0 : i32, i32
  }
  func.func @transform_2(%arg0: i32) -> (i32, i32) {
    %c0_i32 = arith.constant 0 : i32
    %c0_i32_0 = arith.constant 0 : i32
    %c0_i32_1 = arith.constant 0 : i32
    return %c0_i32, %c0_i32_0 : i32, i32
  }
  func.func @transform_3(%arg0: i32) -> (i32, i32) {
    %c0_i32 = arith.constant 0 : i32
    %c0_i32_0 = arith.constant 0 : i32
    %c0_i32_1 = arith.constant 0 : i32
    return %c0_i32, %c0_i32_0 : i32, i32
  }
  func.func @transform_4(%arg0: i32) -> (i32, i32) {
    %c0_i32 = arith.constant 0 : i32
    %c0_i32_0 = arith.constant 0 : i32
    %c0_i32_1 = arith.constant 0 : i32
    return %c0_i32, %c0_i32_0 : i32, i32
  }
  func.func @transform_5(%arg0: i32) -> (i32, i32) {
    %c0_i32 = arith.constant 0 : i32
    %c0_i32_0 = arith.constant 0 : i32
    %c0_i32_1 = arith.constant 0 : i32
    return %c0_i32, %c0_i32_0 : i32, i32
  }
  func.func @transform_6(%arg0: i32) -> (i32, i32) {
    %c0_i32 = arith.constant 0 : i32
    %c0_i32_0 = arith.constant 0 : i32
    %c0_i32_1 = arith.constant 0 : i32
    return %c0_i32, %c0_i32_0 : i32, i32
  }
  func.func @transform_7(%arg0: i32) -> (i32, i32) {
    %c0_i32 = arith.constant 0 : i32
    %c0_i32_0 = arith.constant 0 : i32
    %c0_i32_1 = arith.constant 0 : i32
    return %c0_i32, %c0_i32_0 : i32, i32
  }
  func.func @transform_8(%arg0: i32) -> (i32, i32) {
    %c0_i32 = arith.constant 0 : i32
    %c0_i32_0 = arith.constant 0 : i32
    %c0_i32_1 = arith.constant 0 : i32
    return %c0_i32, %c0_i32_0 : i32, i32
  }
}

</mosaic_0001>

<bundles_post_ra>
// kernel: molmo_vision_backbone_forward.7
= control target key start
LH: loop header
LB: loop body
LE: loop exit
PB: predicated region body
PF: predicated region fallthrough
CT: control target
= control target key end

     0   :  { %s514_s21 = smov 0   ;;  %s577_s0 = inlined_call_operand.vmem [shape: f32[4,16,48], index: 0, kind: input, shape index: {}]   ;;  %s578_s1 = inlined_call_operand.vmem [shape: f32[48,64], index: 1, kind: input, shape index: {}]   ;;  %s579_s2 = inlined_call_operand.vmem [shape: f32[1,64], index: 2, kind: input, shape index: {}]   ;;  %s580_s3 = inlined_call_operand.vmem [shape: f32[16,64], index: 3, kind: input, shape index: {}]   ;;  %s581_s4 = inlined_call_operand.vmem [shape: f32[1,64], index: 4, kind: input, shape index: {}]   ;;  %s582_s5 = inlined_call_operand.vmem [shape: f32[1,64], index: 5, kind: input, shape index: {}]   ;;  %s583_s6 = inlined_call_operand.vmem [shape: f32[4,16,64], index: 6, kind: output, shape index: {}]  }
   0x1 LB: > { %s424_s22 = sadd.s32 4294967295, %s475_s21   ;;  %p428_p0 = scmp.ge.s32.totalorder %s475_s21, 1  ;;  %s475_s21 = sphi %s514_s21, %s16_s21  }
   0x2   : > { %p212_p1 = scmp.lt.s32.totalorder %s475_s21, 5 }
   0x4   : > { %p213_p2 = pnand %p428_p0, %p212_p1 }
   0x5   : > { %v256_v0 = vld [vmem:[%s578_s1] sm:$0xff] (!%p213_p2)  ;;  %v257_v1 = vld [vmem:[%s578_s1 + $0x8] sm:$0xff] (!%p213_p2)  ;;  %v258_v2 = vld [vmem:[%s578_s1 + $0x10] sm:$0xff] (!%p213_p2)  ;;  %p242_p3 = scmp.lt.s32.totalorder (!%p213_p2), %s424_s22, 3  ;;  %v477_v3 = vmov (!%p213_p2), 0.0   ;;  %vm478_vm0 = vmmov (!%p213_p2), 0  }
   0x6   : > { %216 = sbr.rel (%p213_p2) target bundleno = 553 (0x229), region = 44  ;;  %445 = vmatprep.subr.bf16.mxu0 (!%p213_p2), %v477_v3  ;;  %v262_v4 = vpack.c.bf16 (!%p213_p2), %v257_v1, %v256_v0  ;;  %v259_v5 = vld [vmem:[%s578_s1 + $0x18] sm:$0xff] (!%p213_p2)  ;;  %451 = vmatprep.mubr.msk.bf16.mxu0 (!%p213_p2), %vm478_vm0, %v477_v3  ;;  %v260_v7 = vld [vmem:[%s578_s1 + $0x20] sm:$0xff] (!%p213_p2)  ;;  %v261_v8 = vld [vmem:[%s578_s1 + $0x28] sm:$0xff] (!%p213_p2)  ;;  %vm272_vm1 = vcmask (!%p213_p2), 392192   ;;  %vm323_vm2 = vcmask (!%p213_p2), 523264  }
   0x7   : > { %v263_v6 = vpack.c.bf16 (!%p213_p2), %v259_v5, %v258_v2  ;;  %v264_v9 = vpack.c.bf16 (!%p213_p2), %v261_v8, %v260_v7  ;;  %v433_v13 = vld [vmem:[%s579_s2] ss:$0 sm:$0xff] (!%p213_p2)  ;;  %v318_v19 = vld [vmem:[%s580_s3 + $0x8] sm:$0xff] (!%p213_p2) }
   0x8   : > { %446 = vmatpush3.bf16.msra.mxu0 (!%p213_p2), %v262_v4  ;;  %v317_v15 = vld [vmem:[%s580_s3] sm:$0xff] (!%p213_p2) }
   0x9   : > { %447 = vmatprep.subr.bf16.mxu0 (!%p213_p2), %v477_v3  ;;  %v435_v43 = vld [vmem:[%s581_s4] ss:$0 sm:$0xff] (!%p213_p2) }
   0xa   : > { %v436_v45 = vld [vmem:[%s582_s5] ss:$0 sm:$0xff] (!%p213_p2) }
   0xc   : > { %448 = vmatpush3.bf16.msra.mxu0 (!%p213_p2), %v263_v6 }
   0xd   : > { %s585_s22 = smov (!%p242_p3, %s424_s22), 3  ;;  %449 = vmatprep.subr.bf16.mxu0 %v477_v3 }
   0xe   : > { %s439_s11 = sshll.u32 %s585_s22, 4 }
   0xf   : > { %s246_s14 = scalar_lea.vmem %s577_s0, %s439_s11  ;;  %s251_s29 = scalar_lea.vmem %s583_s6, %s439_s11 }
  0x10   : > { %v253_v10 = vld [vmem:[%s246_s14] sm:$0xff]  ;;  %v254_v11 = vld [vmem:[%s246_s14 + $0x8] sm:$0xff]  ;;  %450 = vmatpush3.bf16.msra.mxu0 %v264_v9 }
  0x11   : > { %v255_v12 = vpack.c.bf16 %v254_v11, %v253_v10 }
  0x13   : > { %452 = vmatmul.mubr.msk.bf16.vlgmr.msra.gmra.mrb[0].mxu0 %vm272_vm1, %v255_v12 }
  0xe6   : > { %v310_v14 = vpop.f32.mrb[0].mxu0 }
  0xe7   : > { %v311_v16 = vadd.f32 %v433_v13, %v310_v14  ;;  %v453_v17 = vpop.f32.mrb[1].mxu0 }
  0xe8   : > { %v313_v18 = vpop.f32.mrb[2].mxu0 }
  0xe9   : > { %v314_v20 = vadd.f32 %v433_v13, %v313_v18  ;;  %v454_v21 = vpop.f32.mrb[3].mxu0  ;;  %v319_v22 = vadd.f32 %v317_v15, %v311_v16 }
  0xeb   : > { %v324_v23 = vsel %vm323_vm2, %v319_v22, 0.0  ;;  %v320_v24 = vadd.f32 %v318_v19, %v314_v20 }
  0xec   : > { %325 = vadd.xlane.f32.xlu0 %v324_v23 }
  0xed   : > { %v327_v25 = vsel %vm323_vm2, %v320_v24, 0.0 }
  0xf0   : > { %328 = vadd.xlane.f32.xlu0 %v327_v25 }
 0x179   : > { %v326_v26 = vpop.xlane.xlu0 %325 }
 0x17a   : > { %v331_v27 = vmul.f32 0.015625, %v326_v26 }
 0x17c   : > { %v333_v28 = vsub.f32 %v319_v22, %v331_v27 }
 0x17d   : > { %v329_v29 = vpop.xlane.xlu0 %328 }
 0x17e   : > { %v332_v30 = vmul.f32 0.015625, %v329_v29  ;;  %v335_v31 = vmul.f32 %v333_v28, %v333_v28 }
 0x180   : > { %v334_v32 = vsub.f32 %v320_v24, %v332_v30  ;;  %v337_v33 = vsel %vm323_vm2, %v335_v31, 0.0 }
 0x181   : > { %338 = vadd.xlane.f32.xlu1 %v337_v33 }
 0x182   : > { %v336_v34 = vmul.f32 %v334_v32, %v334_v32 }
 0x184   : > { %v340_v35 = vsel %vm323_vm2, %v336_v34, 0.0 }
 0x185   : > { %341 = vadd.xlane.f32.xlu1 %v340_v35 }
 0x20e   : > { %v339_v36 = vpop.xlane.xlu1 %338 }
 0x20f   : > { %v343_v37 = vmul.f32 0.015625, %v339_v36 }
 0x211   : > { %v345_v38 = vadd.f32 1e-05, %v343_v37 }
 0x212   : > { %v342_v39 = vpop.xlane.xlu1 %341 }
 0x213   : > { %465 = vrsqrt.f32 %v345_v38  ;;  %v344_v40 = vmul.f32 0.015625, %v342_v39 }
 0x215   : > { %v346_v41 = vadd.f32 1e-05, %v344_v40 }
 0x217   : > { %467 = vrsqrt.f32 %v346_v41 }
 0x21d   : > { %v466_v42 = vpop.eup %465 }
 0x21e   : > { %v349_v44 = vmul.f32 %v466_v42, %v333_v28 }
 0x220   : > { %v357_v46 = vmul.f32 %v435_v43, %v349_v44 }
 0x221   : > { %v468_v47 = vpop.eup %467 }
 0x222   : > { %v365_v48 = vadd.f32 %v436_v45, %v357_v46  ;;  %v350_v49 = vmul.f32 %v468_v47, %v334_v32 }
 0x224   : > { %367 = vst.msk [vmem:[%s251_s29] sm:$0xff] %vm323_vm2, %v365_v48  ;;  %v358_v50 = vmul.f32 %v435_v43, %v350_v49 }
 0x226   : > { %v366_v51 = vadd.f32 %v436_v45, %v358_v50 }
 0x228   : > { %368 = vst.msk [vmem:[%s251_s29 + $0x8] sm:$0xff] %vm323_vm2, %v366_v51 }
 0x229 PF: > { %s16_s21 = sadd.s32 1, %s475_s21  }
 0x22a   : > { %p13_p4 = scmp.ge.s32.totalorder %s16_s21, 6  }
 0x22c   :  { %15 = sbr.rel (!%p13_p4) target bundleno = 1 (0x1), region = 74 }

// kernel: molmo_vision_backbone_forward.9
= control target key start
LH: loop header
LB: loop body
LE: loop exit
PB: predicated region body
PF: predicated region fallthrough
CT: control target
= control target key end

     0   :  { %s727_s24 = smov 0   ;;  %s861_s0 = inlined_call_operand.vmem [shape: f32[4,17,64], index: 0, kind: input, shape index: {}]   ;;  %s862_s1 = inlined_call_operand.vmem [shape: f32[1,64], index: 1, kind: input, shape index: {}]   ;;  %s863_s2 = inlined_call_operand.vmem [shape: f32[1,64], index: 2, kind: input, shape index: {}]   ;;  %s864_s3 = inlined_call_operand.vmem [shape: f32[64,128], index: 3, kind: input, shape index: {}]   ;;  %s865_s4 = inlined_call_operand.vmem [shape: f32[1,128], index: 4, kind: input, shape index: {}]   ;;  %s866_s5 = inlined_call_operand.vmem [shape: f32[128,64], index: 5, kind: input, shape index: {}]   ;;  %s867_s6 = inlined_call_operand.vmem [shape: f32[1,64], index: 6, kind: input, shape index: {}]   ;;  %s868_s7 = inlined_call_operand.vmem [shape: f32[4,17,64], index: 7, kind: output, shape index: {}]  }
   0x1 LB: > { %s586_s25 = sadd.s32 4294967295, %s685_s24   ;;  %p590_p0 = scmp.ge.s32.totalorder %s685_s24, 1  ;;  %s685_s24 = sphi %s727_s24, %s17_s24  }
   0x2   : > { %p237_p1 = scmp.lt.s32.totalorder %s685_s24, 5 }
   0x4   : > { %p238_p2 = pnand %p590_p0, %p237_p1 }
   0x5   : > { %p269_p3 = scmp.lt.s32.totalorder (!%p238_p2), %s586_s25, 3  ;;  %vm285_vm0 = vcmask (!%p238_p2), 523264   ;;  %vm292_vm1 = vcmask (!%p238_p2), 516096   ;;  %v347_v21 = vld [vmem:[%s864_s3] sm:$0xff] (!%p238_p2)  ;;  %v348_v22 = vld [vmem:[%s864_s3 + $0x8] sm:$0xff] (!%p238_p2)  ;;  %v349_v24 = vld [vmem:[%s864_s3 + $0x10] sm:$0xff] (!%p238_p2) }
   0x6   : > { %241 = sbr.rel (%p238_p2) target bundleno = 809 (0x329), region = 48  ;;  %v355_v23 = vpack.c.bf16 (!%p238_p2), %v348_v22, %v347_v21  ;;  %v350_v25 = vld [vmem:[%s864_s3 + $0x18] sm:$0xff] (!%p238_p2)  ;;  %v351_v27 = vld [vmem:[%s864_s3 + $0x20] sm:$0xff] (!%p238_p2)  ;;  %v352_v28 = vld [vmem:[%s864_s3 + $0x28] sm:$0xff] (!%p238_p2) }
   0x7   : > { %v356_v26 = vpack.c.bf16 (!%p238_p2), %v350_v25, %v349_v24  ;;  %v357_v29 = vpack.c.bf16 (!%p238_p2), %v352_v28, %v351_v27  ;;  %v353_v30 = vld [vmem:[%s864_s3 + $0x30] sm:$0xff] (!%p238_p2)  ;;  %v354_v31 = vld [vmem:[%s864_s3 + $0x38] sm:$0xff] (!%p238_p2)  ;;  %v593_v44 = vld [vmem:[%s862_s1] ss:$0 sm:$0xff] (!%p238_p2) }
   0x8   : > { %620 = vmatprep.subr.bf16.mxu0 (!%p238_p2), %v355_v23  ;;  %v358_v32 = vpack.c.bf16 (!%p238_p2), %v354_v31, %v353_v30  ;;  %v594_v50 = vld [vmem:[%s863_s2] ss:$0 sm:$0xff] (!%p238_p2)  ;;  %v447_v59 = vld [vmem:[%s866_s5 + $0x8] sm:$0xff] (!%p238_p2)  ;;  %v448_v61 = vld [vmem:[%s866_s5 + $0x10] sm:$0xff] (!%p238_p2) }
   0x9   : > { %621 = vmatpush3.bf16.msra.mxu0 (!%p238_p2), %v355_v23  ;;  %v446_v58 = vld [vmem:[%s866_s5] sm:$0xff] (!%p238_p2)  ;;  %v449_v62 = vld [vmem:[%s866_s5 + $0x18] sm:$0xff] (!%p238_p2) }
   0xa   : > { %622 = vmatprep.subr.bf16.mxu0 (!%p238_p2), %v356_v26  ;;  %v462_v60 = vpack.c.bf16 (!%p238_p2), %v447_v59, %v446_v58  ;;  %v463_v63 = vpack.c.bf16 (!%p238_p2), %v449_v62, %v448_v61  ;;  %v595_v21 = vld [vmem:[%s865_s4] ss:$0 sm:$0xff] (!%p238_p2) }
   0xc   : > { %632 = vmatprep.subr.bf16.mxu1 (!%p238_p2), %v462_v60 }
   0xd   : > { %s870_s25 = smov (!%p269_p3, %s586_s25), 3  ;;  %623 = vmatpush3.bf16.msra.mxu0 %v356_v26  ;;  %633 = vmatpush3.bf16.msra.mxu1 %v462_v60 }
   0xe   : > { %s652_s26 = smul.u32 24, %s870_s25  ;;  %624 = vmatprep.subr.bf16.mxu0 %v357_v29  ;;  %634 = vmatprep.subr.bf16.mxu1 %v463_v63 }
  0x10   : > { %s273_s29 = scalar_lea.vmem %s861_s0, %s652_s26  ;;  %s278_s28 = scalar_lea.vmem %s868_s7, %s652_s26 }
  0x11   : > { %v743_v0 = vld [vmem:[%s273_s29] sm:$0xff]  ;;  %v745_v1 = vld [vmem:[%s273_s29 + $0x10] sm:$0x1]  ;;  %v747_v2 = vld [vmem:[%s273_s29 + $0x8] sm:$0xff]  ;;  %625 = vmatpush3.bf16.msra.mxu0 %v357_v29  ;;  %635 = vmatpush3.bf16.msra.mxu1 %v463_v63 }
  0x12   : > { %v286_v3 = vsel %vm285_vm0, %v743_v0, 0.0  ;;  %v293_v4 = vsel %vm292_vm1, %v745_v1, 0.0  ;;  %v289_v5 = vsel %vm285_vm0, %v747_v2, 0.0  ;;  %626 = vmatprep.subr.bf16.mxu0 %v358_v32 }
  0x13   : > { %287 = vadd.xlane.f32.xlu0 %v286_v3  ;;  %294 = vadd.xlane.f32.xlu1 %v293_v4  ;;  %v450_v3 = vld [vmem:[%s866_s5 + $0x20] sm:$0xff]  ;;  %v451_v4 = vld [vmem:[%s866_s5 + $0x28] sm:$0xff] }
  0x15   : > { %627 = vmatpush3.bf16.msra.mxu0 %v358_v32 }
  0x17   : > { %290 = vadd.xlane.f32.xlu0 %v289_v5  ;;  %v464_v5 = vpack.c.bf16 %v451_v4, %v450_v3 }
  0x19   : > { %636 = vmatprep.subr.bf16.mxu1 %v464_v5 }
  0x1a   : > { %637 = vmatpush3.bf16.msra.mxu1 %v464_v5 }
  0xa0   : > { %v288_v6 = vpop.xlane.xlu0 %287  ;;  %v295_v7 = vpop.xlane.xlu1 %294 }
  0xa1   : > { %v297_v8 = vmul.f32 0.015625, %v288_v6  ;;  %v299_v9 = vmul.f32 0.015625, %v295_v7  ;;  %v452_v6 = vld [vmem:[%s866_s5 + $0x30] sm:$0xff]  ;;  %v453_v7 = vld [vmem:[%s866_s5 + $0x38] sm:$0xff] }
  0xa3   : > { %v300_v10 = vsub.f32 %v743_v0, %v297_v8  ;;  %v302_v11 = vsub.f32 %v745_v1, %v299_v9  ;;  %v465_v8 = vpack.c.bf16 %v453_v7, %v452_v6  ;;  %v454_v9 = vld [vmem:[%s866_s5 + $0x40] sm:$0xff] }
  0xa4   : > { %v291_v12 = vpop.xlane.xlu0 %290 }
  0xa5   : > { %v298_v13 = vmul.f32 0.015625, %v291_v12  ;;  %v303_v14 = vmul.f32 %v300_v10, %v300_v10  ;;  %v305_v15 = vmul.f32 %v302_v11, %v302_v11  ;;  %638 = vmatprep.subr.bf16.mxu1 %v465_v8  ;;  %v456_v12 = vld [vmem:[%s866_s5 + $0x50] sm:$0xff] }
  0xa6   : > { %639 = vmatpush3.bf16.msra.mxu1 %v465_v8 }
  0xa7   : > { %v301_v16 = vsub.f32 %v747_v2, %v298_v13  ;;  %v306_v17 = vsel %vm285_vm0, %v303_v14, 0.0  ;;  %v312_v18 = vsel %vm292_vm1, %v305_v15, 0.0  ;;  %v457_v13 = vld [vmem:[%s866_s5 + $0x58] sm:$0xff]  ;;  %v458_v15 = vld [vmem:[%s866_s5 + $0x60] sm:$0xff] }
  0xa8   : > { %307 = vadd.xlane.f32.xlu1 %v306_v17  ;;  %v467_v14 = vpack.c.bf16 %v457_v13, %v456_v12 }
  0xa9   : > { %v304_v19 = vmul.f32 %v301_v16, %v301_v16 }
  0xab   : > { %v309_v20 = vsel %vm285_vm0, %v304_v19, 0.0  ;;  %v461_v19 = vld [vmem:[%s866_s5 + $0x78] sm:$0xff] }
  0xac   : > { %313 = vadd.xlane.f32.xlu1 %v312_v18  ;;  %310 = vadd.xlane.f32.xlu0 %v309_v20  ;;  %v460_v18 = vld [vmem:[%s866_s5 + $0x70] sm:$0xff] }
  0xad   : > { %v469_v20 = vpack.c.bf16 %v461_v19, %v460_v18 }
 0x135   : > { %v308_v33 = vpop.xlane.xlu1 %307 }
 0x136   : > { %v315_v34 = vmul.f32 0.015625, %v308_v33 }
 0x138   : > { %v318_v35 = vadd.f32 1e-05, %v315_v34 }
 0x139   : > { %v314_v36 = vpop.xlane.xlu1 %313  ;;  %v311_v37 = vpop.xlane.xlu0 %310 }
 0x13a   : > { %661 = vrsqrt.f32 %v318_v35  ;;  %v317_v38 = vmul.f32 0.015625, %v314_v36  ;;  %v316_v39 = vmul.f32 0.015625, %v311_v37 }
 0x13c   : > { %v320_v40 = vadd.f32 1e-05, %v317_v38  ;;  %v319_v41 = vadd.f32 1e-05, %v316_v39 }
 0x13e   : > { %663 = vrsqrt.f32 %v320_v40 }
 0x13f   : > { %665 = vrsqrt.f32 %v319_v41 }
 0x144   : > { %v662_v42 = vpop.eup %661 }
 0x145   : > { %v324_v43 = vmul.f32 %v662_v42, %v300_v10  ;;  %v455_v10 = vld [vmem:[%s866_s5 + $0x48] sm:$0xff] }
 0x147   : > { %v333_v49 = vmul.f32 %v593_v44, %v324_v43 }
 0x148   : > { %v664_v45 = vpop.eup %663 }
 0x149   : > { %v666_v46 = vpop.eup %665  ;;  %v326_v47 = vmul.f32 %v664_v45, %v302_v11  ;;  %v342_v54 = vadd.f32 %v594_v50, %v333_v49  ;;  %v466_v11 = vpack.c.bf16 %v455_v10, %v454_v9  ;;  %v601_v49 = vld [vmem:[%s867_s6] ss:$0 sm:$0xff] }
 0x14a   : > { %v325_v48 = vmul.f32 %v666_v46, %v301_v16  ;;  %v459_v16 = vld [vmem:[%s866_s5 + $0x68] sm:$0xff] }
 0x14b   : > { %v335_v51 = vmul.f32 %v593_v44, %v326_v47  ;;  %640 = vmatprep.subr.bf16.mxu1 %v466_v11  ;;  %v468_v17 = vpack.c.bf16 %v459_v16, %v458_v15 }
 0x14c   : > { %v334_v52 = vmul.f32 %v593_v44, %v325_v48  ;;  %641 = vmatpush3.bf16.msra.mxu1 %v466_v11 }
 0x14d   : > { %v344_v53 = vadd.f32 %v594_v50, %v335_v51  ;;  %642 = vmatprep.subr.bf16.mxu1 %v467_v14 }
 0x14e   : > { %v343_v55 = vadd.f32 %v594_v50, %v334_v52 }
 0x14f   : > { %v346_v56 = vpack.c.bf16 %v344_v53, %v344_v53 }
 0x150   : > { %v345_v57 = vpack.c.bf16 %v343_v55, %v342_v54  ;;  %643 = vmatpush3.bf16.msra.mxu1 %v467_v14 }
 0x151   : > { %644 = vmatprep.subr.bf16.mxu1 %v468_v17 }
 0x152   : > { %628 = vmatprep.mubr.msk.bf16.mxu0 %vm285_vm0, %v345_v57 }
 0x153   : > { %629 = vmatmul.mubr.msk.bf16.vlgmr.msra.gmra.mrb[0].mxu0 %vm285_vm0, %v346_v56 }
 0x154   : > { %645 = vmatpush3.bf16.msra.mxu1 %v468_v17 }
 0x155   : > { %646 = vmatprep.subr.bf16.mxu1 %v469_v20 }
 0x158   : > { %647 = vmatpush3.bf16.msra.mxu1 %v469_v20 }
 0x226   : > { %v630_v22 = vpop.f32.mrb[0].mxu0 }
 0x227   : > { %v415_v23 = vadd.f32 %v630_v22, %v595_v21  ;;  %v406_v24 = vpop.f32.mrb[1].mxu0 }
 0x228   : > { %v407_v25 = vadd.f32 %v595_v21, %v406_v24  ;;  %v631_v26 = vpop.f32.mrb[2].mxu0 }
 0x229   : > { %v600_v27 = vmul.f32 -1.702, %v415_v23  ;;  %v409_v28 = vpop.f32.mrb[3].mxu0 }
 0x22a   : > { %v598_v29 = vmul.f32 -1.702, %v407_v25  ;;  %v410_v30 = vadd.f32 %v595_v21, %v409_v28 }
 0x22b   : > { %v430_v31 = vmul.f32 1.442695, %v600_v27 }
 0x22c   : > { %v426_v32 = vmul.f32 1.442695, %v598_v29  ;;  %v599_v33 = vmul.f32 -1.702, %v410_v30 }
 0x22d   : > { %667 = vpow2.f32 %v430_v31 }
 0x22e   : > { %669 = vpow2.f32 %v426_v32  ;;  %v428_v34 = vmul.f32 1.442695, %v599_v33 }
 0x230   : > { %671 = vpow2.f32 %v428_v34 }
 0x237   : > { %v668_v35 = vpop.eup %667 }
 0x238   : > { %v670_v36 = vpop.eup %669  ;;  %v434_v37 = vadd.f32 1.0, %v668_v35 }
 0x239   : > { %v432_v38 = vadd.f32 1.0, %v670_v36 }
 0x23a   : > { %v672_v39 = vpop.eup %671  ;;  %673 = vrcp.f32 %v434_v37 }
 0x23b   : > { %675 = vrcp.f32 %v432_v38  ;;  %v433_v40 = vadd.f32 1.0, %v672_v39 }
 0x23d   : > { %677 = vrcp.f32 %v433_v40 }
 0x244   : > { %v674_v41 = vpop.eup %673 }
 0x245   : > { %v676_v42 = vpop.eup %675  ;;  %v443_v44 = vmul.f32 %v674_v41, %v415_v23 }
 0x246   : > { %v441_v45 = vmul.f32 %v676_v42, %v407_v25 }
 0x247   : > { %v678_v43 = vpop.eup %677  ;;  %v445_v48 = vpack.c.bf16 %v443_v44, %v443_v44 }
 0x248   : > { %v442_v46 = vmul.f32 %v678_v43, %v410_v30 }
 0x24a   : > { %v444_v47 = vpack.c.bf16 %v442_v46, %v441_v45 }
 0x24c   : > { %648 = vmatprep.mubr.bf16.mxu1 %v444_v47 }
 0x24d   : > { %649 = vmatmul.mubr.bf16.vlgmr.msra.gmra.mrb[0].mxu1 %v445_v48 }
 0x320   : > { %v650_v50 = vpop.f32.mrb[0].mxu1 }
 0x321   : > { %v520_v51 = vadd.f32 %v650_v50, %v601_v49  ;;  %v511_v52 = vpop.f32.mrb[1].mxu1 }
 0x322   : > { %v512_v53 = vadd.f32 %v601_v49, %v511_v52  ;;  %v651_v54 = vpop.f32.mrb[2].mxu1 }
 0x323   : > { %v527_v55 = vadd.f32 %v520_v51, %v745_v1  ;;  %v514_v56 = vpop.f32.mrb[3].mxu1 }
 0x324   : > { %v525_v57 = vadd.f32 %v512_v53, %v743_v0  ;;  %v515_v58 = vadd.f32 %v601_v49, %v514_v56 }
 0x325   : > { %530 = vst.msk [vmem:[%s278_s28 + $0x10] sm:$0x1] %vm292_vm1, %v527_v55 }
 0x326   : > { %528 = vst.msk [vmem:[%s278_s28] sm:$0xff] %vm285_vm0, %v525_v57  ;;  %v526_v59 = vadd.f32 %v515_v58, %v747_v2 }
 0x328   : > { %529 = vst.msk [vmem:[%s278_s28 + $0x8] sm:$0xff] %vm285_vm0, %v526_v59 }
 0x329 PF: > { %s17_s24 = sadd.s32 1, %s685_s24  }
 0x32a   : > { %p14_p4 = scmp.ge.s32.totalorder %s17_s24, 6  }
 0x32c   :  { %16 = sbr.rel (!%p14_p4) target bundleno = 1 (0x1), region = 78 }

// kernel: molmo_vision_backbone_forward.8
= control target key start
LH: loop header
LB: loop body
LE: loop exit
PB: predicated region body
PF: predicated region fallthrough
CT: control target
= control target key end

     0   :  { %s1730_s24 = smov 0   ;;  %s2012_s0 = inlined_call_operand.vmem [shape: f32[4,17,64], index: 0, kind: input, shape index: {}]   ;;  %s2013_s1 = inlined_call_operand.vmem [shape: f32[1,64], index: 1, kind: input, shape index: {}]   ;;  %s2014_s2 = inlined_call_operand.vmem [shape: f32[1,64], index: 2, kind: input, shape index: {}]   ;;  %s2015_s3 = inlined_call_operand.vmem [shape: f32[64,192], index: 3, kind: input, shape index: {}]   ;;  %s2016_s4 = inlined_call_operand.vmem [shape: f32[1,192], index: 4, kind: input, shape index: {}]   ;;  %s2017_s5 = inlined_call_operand.vmem [shape: f32[64,64], index: 5, kind: input, shape index: {}]   ;;  %s2018_s6 = inlined_call_operand.vmem [shape: f32[1,64], index: 6, kind: input, shape index: {}]   ;;  %s2019_s7 = inlined_call_operand.vmem [shape: f32[4,17,64], index: 7, kind: output, shape index: {}]  }
   0x1 LB: > { %s1425_s25 = sadd.s32 4294967295, %s1680_s24   ;;  %p1429_p0 = scmp.ge.s32.totalorder %s1680_s24, 1  ;;  %s1680_s24 = sphi %s1730_s24, %s17_s24  }
   0x2   : > { %p237_p1 = scmp.lt.s32.totalorder %s1680_s24, 5 }
   0x4   : > { %p238_p2 = pnand %p1429_p0, %p237_p1 }
   0x5   : > { %p269_p3 = scmp.lt.s32.totalorder (!%p238_p2), %s1425_s25, 3  ;;  %vm285_vm0 = vcmask (!%p238_p2), 523264   ;;  %vm292_vm1 = vcmask (!%p238_p2), 516096   ;;  %v348_v21 = vld [vmem:[%s2015_s3 + $0x8] sm:$0xff] (!%p238_p2)  ;;  %v350_v22 = vld [vmem:[%s2015_s3 + $0x18] sm:$0xff] (!%p238_p2)  ;;  %v347_v24 = vld [vmem:[%s2015_s3] sm:$0xff] (!%p238_p2) }
   0x6   : > { %241 = sbr.rel (%p238_p2) target bundleno = 2676 (0xa74), region = 48  ;;  %v364_v23 = vpack.c.bf16 (!%p238_p2), %v350_v22, %v348_v21  ;;  %v349_v25 = vld [vmem:[%s2015_s3 + $0x10] sm:$0xff] (!%p238_p2)  ;;  %v352_v27 = vld [vmem:[%s2015_s3 + $0x28] sm:$0xff] (!%p238_p2)  ;;  %v354_v28 = vld [vmem:[%s2015_s3 + $0x38] sm:$0xff] (!%p238_p2)  ;;  %v1682_v44 = vmov (!%p238_p2), 0   ;;  %vm455_vm2 = vcmask (!%p238_p2), 130048  }
   0x7   : > { %v363_v26 = vpack.c.bf16 (!%p238_p2), %v349_v25, %v347_v24  ;;  %v366_v29 = vpack.c.bf16 (!%p238_p2), %v354_v28, %v352_v27  ;;  %v351_v30 = vld [vmem:[%s2015_s3 + $0x20] sm:$0xff] (!%p238_p2)  ;;  %v353_v31 = vld [vmem:[%s2015_s3 + $0x30] sm:$0xff] (!%p238_p2)  ;;  %v356_v33 = vld [vmem:[%s2015_s3 + $0x48] sm:$0xff] (!%p238_p2)  ;;  %421 = vmatprep.mubr.bf16.mxu0 (!%p238_p2), %v1682_v44  ;;  %s1683_s28 = smov (!%p238_p2), 64   ;;  %s1685_s30 = smov (!%p238_p2), 48   ;;  %vm559_vm3 = vcmask (!%p238_p2), 1040384  }
   0x8   : > { %389 = vmatprep.subr.bf16.mxu0 (!%p238_p2), %v364_v23  ;;  %v365_v32 = vpack.c.bf16 (!%p238_p2), %v353_v31, %v351_v30  ;;  %v358_v34 = vld [vmem:[%s2015_s3 + $0x58] sm:$0xff] (!%p238_p2)  ;;  %v355_v36 = vld [vmem:[%s2015_s3 + $0x40] sm:$0xff] (!%p238_p2)  ;;  %v357_v37 = vld [vmem:[%s2015_s3 + $0x50] sm:$0xff] (!%p238_p2)  ;;  %vm516_vm4 = vcmask (!%p238_p2), 138240   ;;  %vm523_vm5 = vcmask (!%p238_p2), 131072   ;;  %s1686_s12 = smov (!%p238_p2), 32  }
   0x9   : > { %390 = vmatpush1.bf16.msra.mxu0 (!%p238_p2), %v363_v26  ;;  %v368_v35 = vpack.c.bf16 (!%p238_p2), %v358_v34, %v356_v33  ;;  %v367_v38 = vpack.c.bf16 (!%p238_p2), %v357_v37, %v355_v36  ;;  %v360_v39 = vld [vmem:[%s2015_s3 + $0x68] sm:$0xff] (!%p238_p2)  ;;  %v362_v40 = vld [vmem:[%s2015_s3 + $0x78] sm:$0xff] (!%p238_p2)  ;;  %v359_v41 = vld [vmem:[%s2015_s3 + $0x60] sm:$0xff] (!%p238_p2)  ;;  %s1687_s13 = smov (!%p238_p2), 96   ;;  %s1688_s14 = smov (!%p238_p2), 16  }
   0xa   : > { %391 = vmatprep.subr.bf16.mxu0 (!%p238_p2), %v366_v29  ;;  %v370_v42 = vpack.c.bf16 (!%p238_p2), %v362_v40, %v360_v39  ;;  %v361_v43 = vld [vmem:[%s2015_s3 + $0x70] sm:$0xff] (!%p238_p2)  ;;  %v1432_v57 = vld [vmem:[%s2013_s1] ss:$0 sm:$0xff] (!%p238_p2)  ;;  %s1689_s15 = smov (!%p238_p2), 80  }
   0xb   : > { %v369_v45 = vpack.c.bf16 (!%p238_p2), %v361_v43, %v359_v41  ;;  %v1433_v62 = vld [vmem:[%s2014_s2] ss:$0 sm:$0xff] (!%p238_p2) }
   0xd   : > { %s2021_s25 = smov (!%p269_p3, %s1425_s25), 3  ;;  %392 = vmatpush1.bf16.msra.mxu0 %v365_v32 }
   0xe   : > { %s1603_s26 = smul.u32 24, %s2021_s25  ;;  %393 = vmatprep.subr.bf16.mxu0 %v368_v35 }
  0x10   : > { %s273_s29 = scalar_lea.vmem %s2012_s0, %s1603_s26 }
  0x11   : > { %v1746_v0 = vld [vmem:[%s273_s29] sm:$0xff]  ;;  %v1748_v1 = vld [vmem:[%s273_s29 + $0x10] sm:$0x1]  ;;  %v1750_v2 = vld [vmem:[%s273_s29 + $0x8] sm:$0xff]  ;;  %394 = vmatpush1.bf16.msra.mxu0 %v367_v38  ;;  %s1684_s29 = smov 112  }
  0x12   : > { %v286_v3 = vsel %vm285_vm0, %v1746_v0, 0.0  ;;  %v293_v4 = vsel %vm292_vm1, %v1748_v1, 0.0  ;;  %v289_v5 = vsel %vm285_vm0, %v1750_v2, 0.0  ;;  %395 = vmatprep.subr.bf16.mxu0 %v370_v42 }
  0x13   : > { %287 = vadd.xlane.f32.xlu0 %v286_v3  ;;  %294 = vadd.xlane.f32.xlu1 %v293_v4 }
  0x15   : > { %396 = vmatpush1.bf16.msra.mxu0 %v369_v45 }
  0x17   : > { %290 = vadd.xlane.f32.xlu0 %v289_v5 }
  0xa0   : > { %v288_v6 = vpop.xlane.xlu0 %287  ;;  %v295_v7 = vpop.xlane.xlu1 %294 }
  0xa1   : > { %v297_v8 = vmul.f32 0.015625, %v288_v6  ;;  %v299_v9 = vmul.f32 0.015625, %v295_v7 }
  0xa3   : > { %v300_v10 = vsub.f32 %v1746_v0, %v297_v8  ;;  %v1760_v11 = vsub.f32 %v1748_v1, %v299_v9 }
  0xa4   : > { %v291_v12 = vpop.xlane.xlu0 %290 }
  0xa5   : > { %v298_v13 = vmul.f32 0.015625, %v291_v12  ;;  %v303_v14 = vmul.f32 %v300_v10, %v300_v10  ;;  %v305_v15 = vmul.f32 %v1760_v11, %v1760_v11 }
  0xa7   : > { %v301_v16 = vsub.f32 %v1750_v2, %v298_v13  ;;  %v306_v17 = vsel %vm285_vm0, %v303_v14, 0.0  ;;  %v312_v18 = vsel %vm292_vm1, %v305_v15, 0.0  ;;  %v371_v14 = vld [vmem:[%s2016_s4] sm:$0x3] }
  0xa8   : > { %307 = vadd.xlane.f32.xlu1 %v306_v17 }
  0xa9   : > { %v304_v19 = vmul.f32 %v301_v16, %v301_v16 }
  0xab   : > { %v309_v20 = vsel %vm285_vm0, %v304_v19, 0.0 }
  0xac   : > { %313 = vadd.xlane.f32.xlu1 %v312_v18  ;;  %310 = vadd.xlane.f32.xlu0 %v309_v20 }
 0x135   : > { %v308_v46 = vpop.xlane.xlu1 %307 }
 0x136   : > { %v315_v47 = vmul.f32 0.015625, %v308_v46 }
 0x138   : > { %v318_v48 = vadd.f32 1e-05, %v315_v47 }
 0x139   : > { %v314_v49 = vpop.xlane.xlu1 %313  ;;  %v311_v50 = vpop.xlane.xlu0 %310 }
 0x13a   : > { %1620 = vrsqrt.f32 %v318_v48  ;;  %v317_v51 = vmul.f32 0.015625, %v314_v49  ;;  %v316_v52 = vmul.f32 0.015625, %v311_v50  ;;  %v1861_v48 = vsel %vm559_vm3, 65535, %v1682_v44 }
 0x13c   : > { %v320_v53 = vadd.f32 1e-05, %v317_v51  ;;  %v319_v54 = vadd.f32 1e-05, %v316_v52 }
 0x13e   : > { %1622 = vrsqrt.f32 %v320_v53 }
 0x13f   : > { %1624 = vrsqrt.f32 %v319_v54 }
 0x144   : > { %v1621_v55 = vpop.eup %1620 }
 0x145   : > { %v324_v56 = vmul.f32 %v1621_v55, %v300_v10  ;;  %v373_v10 = vlaneseq }
 0x147   : > { %v333_v61 = vmul.f32 %v1432_v57, %v324_v56  ;;  %v374_v12 = vshrl.u32 %v373_v10, 7 }
 0x148   : > { %v1623_v58 = vpop.eup %1622 }
 0x149   : > { %v1625_v59 = vpop.eup %1624  ;;  %v326_v3 = vmul.f32 %v1623_v58, %v1760_v11  ;;  %v342_v4 = vadd.f32 %v1433_v62, %v333_v61  ;;  %v375_v13 = vsub.s32 0, %v374_v12  ;;  %v379_v11 = vsub.s32 1, %v374_v12 }
 0x14a   : > { %v325_v60 = vmul.f32 %v1625_v59, %v301_v16 }
 0x14b   : > { %v335_v7 = vmul.f32 %v1432_v57, %v326_v3  ;;  %v376_v15 = vrot.slane %v371_v14, %v375_v13  ;;  %v380_v17 = vrot.slane %v371_v14, %v379_v11 }
 0x14c   : > { %v334_v63 = vmul.f32 %v1432_v57, %v325_v60 }
 0x14d   : > { %v344_v8 = vadd.f32 %v1433_v62, %v335_v7 }
 0x14e   : > { %v343_v5 = vadd.f32 %v1433_v62, %v334_v63 }
 0x14f   : > { %v346_v9 = vpack.c.bf16 %v344_v8, %v344_v8 }
 0x150   : > { %v345_v6 = vpack.c.bf16 %v343_v5, %v342_v4 }
 0x152   : > { %1434 = vmatmul.mubr.msk.bf16.vlgmr.msra.gmra.mrb[0].mxu0 %vm285_vm0, %v345_v6 }
 0x153   : > { %431 = vmatprep.mubr.bf16.mxu0 %v1682_v44 }
 0x15a   : > { %1435 = vmatmul.mubr.msk.bf16.gmra.mrb[4].mxu0 %vm285_vm0, %v346_v9 }
 0x225   : > { %v423_v16 = vpop.f32.mrb[0].mxu0 }
 0x226   : > { %v424_v18 = vadd.f32 %v423_v16, %v376_v15  ;;  %v425_v19 = vpop.f32.mrb[1].mxu0 }
 0x227   : > { %v427_v20 = vpop.f32.mrb[2].mxu0  ;;  %v426_v23 = vadd.f32 %v425_v19, %v380_v17 }
 0x228   : > { %v428_v21 = vadd.f32 %v427_v20, %v376_v15  ;;  %v429_v22 = vpop.f32.mrb[3].mxu0  ;;  %v440_v25 = vmul.f32 0.25, %v424_v18 }
 0x229   : > { %v430_v24 = vadd.f32 %v429_v22, %v380_v17 }
 0x22a   : > { %v441_v26 = vmul.f32 0.25, %v428_v21  ;;  %v1830_v27 = vpack.c.bf16 %v428_v21, %v424_v18 }
 0x22b   : > { %v1832_v28 = vpack.c.bf16 %v430_v24, %v426_v23 }
 0x22c   : > { %v1834_v29 = vpack.c.bf16 %v441_v26, %v440_v25  ;;  %451 = vrot.lane.b32.xlu0 %v1830_v27, %s1683_s28 }
 0x22d   : > { %v433_v30 = vpop.f32.mrb[4].mxu0 }
 0x22e   : > { %v434_v31 = vadd.f32 %v433_v30, %v376_v15  ;;  %v435_v32 = vpop.f32.mrb[5].mxu0  ;;  %1511 = vmatprep.mubr.msk.bf16.mxu1 %vm455_vm2, %v1834_v29 }
 0x22f   : > { %v437_v33 = vpop.f32.mrb[6].mxu0  ;;  %v436_v42 = vadd.f32 %v435_v32, %v380_v17 }
 0x230   : > { %v1839_v34 = vpack.c.bf16 %v434_v31, %v434_v31  ;;  %v438_v35 = vpop.f32.mrb[7].mxu0  ;;  %620 = vrot.lane.b32.xlu0 %v1834_v29, %s1684_s29  ;;  %v442_v36 = vmul.f32 0.25, %v434_v31 }
 0x231   : > { %v1858_v47 = vpack.c.bf16 %v436_v42, %v436_v42 }
 0x232   : > { %453 = vrot.lane.b32.xlu1 %v1839_v34, %s1683_s28  ;;  %v1846_v37 = vpack.c.bf16 %v442_v36, %v442_v36 }
 0x233   : > { %v563_v50 = vand.u32 %v1861_v48, %v1858_v47 }
 0x236   : > { %624 = vrot.lane.b32.xlu1 %v1830_v27, %s1685_s30 }
 0x23a   : > { %626 = vrot.lane.b32.xlu1 %v1839_v34, %s1685_s30 }
 0x23e   : > { %622 = vrot.lane.b32.xlu1 %v1846_v37, %s1684_s29 }
 0x29e   : > { %v452_v38 = vpop.permute.xlu0 %451 }
 0x29f   : > { %1595 = vmatprep.subr.msk.bf16.mxu1 %vm455_vm2, %v452_v38  ;;  %v463_v39 = vsel %vm455_vm2, %v452_v38, 0 }
 0x2a0   : > { %1508 = vmatpush3.bf16.xpose.msra.mxu1 %v463_v39 }
 0x2a2   : > { %v621_v40 = vpop.permute.xlu0 %620 }
 0x2a3   : > { %1527 = vmatprep.mubr.msk.bf16.mxu0 %vm455_vm2, %v621_v40  ;;  %v789_v40 = vld [vmem:[%s2017_s5 + $0x10] sm:$0xff] }
 0x2a4   : > { %v454_v41 = vpop.permute.xlu1 %453 }
 0x2a5   : > { %1596 = vmatprep.subr.msk.bf16.mxu1 %vm455_vm2, %v454_v41  ;;  %v466_v43 = vsel %vm455_vm2, %v454_v41, 0  ;;  %v790_v41 = vld [vmem:[%s2017_s5 + $0x18] sm:$0xff] }
 0x2a6   : > { %v791_v42 = vpack.c.bf16 %v790_v41, %v789_v40 }
 0x2a8   : > { %v625_v45 = vpop.permute.xlu1 %624  ;;  %1510 = vmatpush3.bf16.xpose.msra.mxu1 %v466_v43 }
 0x2a9   : > { %v635_v46 = vsel %vm455_vm2, %v625_v45, 0  ;;  %1515 = vmatprep.subr.bf16.mxu1 %v1832_v28  ;;  %1597 = vmatprep.subr.msk.bf16.mxu0 %vm455_vm2, %v625_v45 }
 0x2aa   : > { %1524 = vmatpush3.bf16.xpose.msra.mxu0 %v635_v46 }
 0x2ac   : > { %v627_v49 = vpop.permute.xlu1 %626 }
 0x2ad   : > { %1598 = vmatprep.subr.msk.bf16.mxu0 %vm455_vm2, %v627_v49  ;;  %v638_v51 = vsel %vm455_vm2, %v627_v49, 0 }
 0x2af   : > { %1512 = vmatmul.mubr.msk.bf16.vlgmr.msra.gmra.mrb[0].mxu1 %vm455_vm2, %v1846_v37 }
 0x2b0   : > { %1516 = vmatpush3.bf16.msra.mxu1 %v1832_v28  ;;  %v623_v52 = vpop.permute.xlu1 %622 }
 0x2b1   : > { %1517 = vmatprep.subr.bf16.mxu1 %v563_v50 }
 0x2b2   : > { %1526 = vmatpush3.bf16.xpose.msra.mxu0 %v638_v51 }
 0x2b3   : > { %1539 = vmatprep.subr.bf16.mxu0 %v791_v42 }
 0x2b4   : > { %1518 = vmatpush3.bf16.msra.mxu1 %v563_v50 }
 0x2b9   : > { %1528 = vmatmul.mubr.msk.bf16.vlgmr.msra.gmra.mrb[8].mxu0 %vm455_vm2, %v623_v52 }
 0x2ba   : > { %1540 = vmatpush3.bf16.msra.mxu0 %v791_v42 }
 0x382   : > { %v1513_v44 = vpop.f32.mrb[0].mxu1 }
 0x383   : > { %v502_v53 = vpop.f32.mrb[1].mxu1  ;;  %v524_v58 = vsel %vm523_vm5, %v1513_v44, -inf }
 0x384   : > { %v1514_v54 = vpop.f32.mrb[2].mxu1  ;;  %v517_v55 = vsel %vm516_vm4, %v502_v53, -inf }
 0x385   : > { %518 = vmax.xlane.f32.xlu0 %v517_v55  ;;  %v505_v56 = vpop.f32.mrb[3].mxu1 }
 0x386   : > { %v520_v57 = vsel %vm516_vm4, %v505_v56, -inf }
 0x387   : > { %521 = vmax.xlane.f32.xlu1 %v520_v57 }
 0x389   : > { %525 = vmax.xlane.f32.xlu0 %v524_v58 }
 0x38c   : > { %v1529_v59 = vpop.f32.mrb[8].mxu0 }
 0x38d   : > { %v674_v60 = vpop.f32.mrb[9].mxu0  ;;  %v694_v61 = vsel %vm523_vm5, %v1529_v59, -inf }
 0x38e   : > { %v1530_v62 = vpop.f32.mrb[10].mxu0  ;;  %695 = vmax.xlane.f32.xlu1 %v694_v61  ;;  %v688_v63 = vsel %vm516_vm4, %v674_v60, -inf }
 0x38f   : > { %v677_v3 = vpop.f32.mrb[11].mxu0  ;;  %689 = vmax.xlane.f32.xlu0 %v688_v63 }
 0x390   : > { %v691_v4 = vsel %vm516_vm4, %v677_v3, -inf }
 0x393   : > { %692 = vmax.xlane.f32.xlu0 %v691_v4 }
 0x412   : > { %v519_v5 = vpop.xlane.xlu0 %518 }
 0x413   : > { %v527_v6 = vsub.f32 %v502_v53, %v519_v5 }
 0x414   : > { %v522_v8 = vpop.xlane.xlu1 %521 }
 0x415   : > { %v530_v10 = vmul.f32 1.442695, %v527_v6  ;;  %v528_v16 = vsub.f32 %v505_v56, %v522_v8  ;;  %v615_v6 = vld [vmem:[%s2017_s5] sm:$0xff] }
 0x416   : > { %v526_v7 = vpop.xlane.xlu0 %525 }
 0x417   : > { %v529_v9 = vsub.f32 %v1513_v44, %v526_v7  ;;  %v532_v21 = vmul.f32 1.442695, %v528_v16  ;;  %v616_v7 = vld [vmem:[%s2017_s5 + $0x8] sm:$0xff] }
 0x418   : > { %v617_v8 = vpack.c.bf16 %v616_v7, %v615_v6 }
 0x419   : > { %v534_v12 = vmul.f32 1.442695, %v529_v9 }
 0x41b   : > { %1626 = vpow2.f32 %v534_v12  ;;  %v696_v13 = vpop.xlane.xlu1 %695 }
 0x41c   : > { %v699_v14 = vsub.f32 %v1529_v59, %v696_v13  ;;  %v690_v11 = vpop.xlane.xlu0 %689  ;;  %1628 = vpow2.f32 %v530_v10 }
 0x41d   : > { %v697_v15 = vsub.f32 %v674_v60, %v690_v11 }
 0x41e   : > { %v704_v17 = vmul.f32 1.442695, %v699_v14 }
 0x41f   : > { %v700_v18 = vmul.f32 1.442695, %v697_v15 }
 0x420   : > { %1630 = vpow2.f32 %v704_v17  ;;  %v693_v19 = vpop.xlane.xlu0 %692 }
 0x421   : > { %v698_v20 = vsub.f32 %v677_v3, %v693_v19  ;;  %1632 = vpow2.f32 %v700_v18 }
 0x423   : > { %v702_v22 = vmul.f32 1.442695, %v698_v20 }
 0x425   : > { %v1627_v23 = vpop.eup %1626  ;;  %1634 = vpow2.f32 %v702_v22 }
 0x426   : > { %1636 = vpow2.f32 %v532_v21  ;;  %v542_v24 = vsel %vm523_vm5, %v1627_v23, 0.0  ;;  %v1629_v25 = vpop.eup %1628 }
 0x427   : > { %543 = vadd.xlane.f32.xlu0 %v542_v24  ;;  %v536_v30 = vsel %vm516_vm4, %v1629_v25, 0.0 }
 0x42a   : > { %v1878_v26 = vpop.eup %1630 }
 0x42b   : > { %537 = vadd.xlane.f32.xlu0 %v536_v30  ;;  %v712_v31 = vsel %vm523_vm5, %v1878_v26, 0.0  ;;  %v1633_v32 = vpop.eup %1632 }
 0x42c   : > { %713 = vadd.xlane.f32.xlu1 %v712_v31  ;;  %v706_v35 = vsel %vm516_vm4, %v1633_v32, 0.0 }
 0x42f   : > { %v1635_v33 = vpop.eup %1634 }
 0x430   : > { %v1637_v36 = vpop.eup %1636  ;;  %707 = vadd.xlane.f32.xlu1 %v706_v35  ;;  %v709_v38 = vsel %vm516_vm4, %v1635_v33, 0.0 }
 0x431   : > { %710 = vadd.xlane.f32.xlu0 %v709_v38  ;;  %v539_v39 = vsel %vm516_vm4, %v1637_v36, 0.0 }
 0x434   : > { %540 = vadd.xlane.f32.xlu1 %v539_v39 }
 0x445   : > { %727 = vrot.lane.b32.xlu1 %v1858_v47, %s1684_s29 }
 0x447   : > { %725 = vrot.lane.b32.xlu0 %v1832_v28, %s1684_s29 }
 0x449   : > { %904 = vrot.lane.b32.xlu1 %v1830_v27, %s1686_s12 }
 0x44b   : > { %900 = vrot.lane.b32.xlu0 %v1834_v29, %s1687_s13 }
 0x44d   : > { %906 = vrot.lane.b32.xlu1 %v1839_v34, %s1686_s12  ;;  %s278_s12 = scalar_lea.vmem %s2019_s7, %s1603_s26 }
 0x44f   : > { %1131 = vrot.lane.b32.xlu0 %v1830_v27, %s1688_s14 }
 0x451   : > { %902 = vrot.lane.b32.xlu1 %v1846_v37, %s1687_s13 }
 0x453   : > { %1127 = vrot.lane.b32.xlu0 %v1834_v29, %s1689_s15 }
 0x455   : > { %1133 = vrot.lane.b32.xlu1 %v1839_v34, %s1688_s14 }
 0x459   : > { %1129 = vrot.lane.b32.xlu1 %v1846_v37, %s1689_s15 }
 0x4b4   : > { %v544_v43 = vpop.xlane.xlu0 %543 }
 0x4b5   : > { %1638 = vrcp.f32 %v544_v43 }
 0x4b8   : > { %v538_v46 = vpop.xlane.xlu0 %537 }
 0x4b9   : > { %v714_v45 = vpop.xlane.xlu1 %713  ;;  %1640 = vrcp.f32 %v538_v46 }
 0x4bd   : > { %v708_v49 = vpop.xlane.xlu1 %707 }
 0x4be   : > { %v711_v50 = vpop.xlane.xlu0 %710  ;;  %1642 = vrcp.f32 %v708_v49 }
 0x4bf   : > { %1644 = vrcp.f32 %v711_v50  ;;  %v1639_v29 = vpop.eup %1638 }
 0x4c0   : > { %v550_v55 = vmul.f32 %v1639_v29, %v1627_v23 }
 0x4c1   : > { %v541_v27 = vpop.xlane.xlu1 %540 }
 0x4c2   : > { %1646 = vrcp.f32 %v541_v27  ;;  %v726_v51 = vpop.permute.xlu0 %725  ;;  %v552_v61 = vpack.c.bf16 %v550_v55, %v550_v55 }
 0x4c3   : > { %1531 = vmatprep.subr.bf16.mxu1 %v726_v51  ;;  %1648 = vrcp.f32 %v714_v45  ;;  %v1641_v34 = vpop.eup %1640 }
 0x4c4   : > { %v548_v56 = vmul.f32 %v1641_v34, %v1629_v25 }
 0x4c5   : > { %v728_v52 = vpop.permute.xlu1 %727 }
 0x4c6   : > { %v737_v3 = vand.u32 %v728_v52, %v1861_v48  ;;  %v901_v21 = vpop.permute.xlu0 %900 }
 0x4c8   : > { %v1643_v44 = vpop.eup %1642 }
 0x4c9   : > { %v905_v53 = vpop.permute.xlu1 %904  ;;  %v1645_v37 = vpop.eup %1644  ;;  %v718_v58 = vmul.f32 %v1643_v44, %v1633_v32 }
 0x4ca   : > { %1599 = vmatprep.subr.msk.bf16.mxu0 %vm455_vm2, %v905_v53  ;;  %v719_v59 = vmul.f32 %v1645_v37, %v1635_v33  ;;  %v915_v22 = vsel %vm455_vm2, %v905_v53, 0  ;;  %v1132_v25 = vpop.permute.xlu0 %1131 }
 0x4cb   : > { %v1142_v30 = vsel %vm455_vm2, %v1132_v25, 0 }
 0x4cc   : > { %v1647_v54 = vpop.eup %1646  ;;  %v721_v63 = vpack.c.bf16 %v719_v59, %v718_v58 }
 0x4cd   : > { %v549_v57 = vmul.f32 %v1647_v54, %v1637_v36  ;;  %v1649_v62 = vpop.eup %1648  ;;  %v907_v23 = vpop.permute.xlu1 %906 }
 0x4ce   : > { %v720_v4 = vmul.f32 %v1649_v62, %v1878_v26  ;;  %v918_v24 = vsel %vm455_vm2, %v907_v23, 0  ;;  %v1128_v31 = vpop.permute.xlu0 %1127 }
 0x4cf   : > { %v551_v60 = vpack.c.bf16 %v549_v57, %v548_v56 }
 0x4d0   : > { %v722_v5 = vpack.c.bf16 %v720_v4, %v720_v4 }
 0x4d1   : > { %1519 = vmatprep.mubr.msk.bf16.mxu1 %vm516_vm4, %v551_v60  ;;  %v903_v26 = vpop.permute.xlu1 %902 }
 0x4d2   : > { %1520 = vmatmul.mubr.msk.bf16.vlgmr.msra.gmra.mrb[4].mxu1 %vm516_vm4, %v552_v61 }
 0x4d3   : > { %1532 = vmatpush3.bf16.msra.mxu1 %v726_v51  ;;  %1535 = vmatprep.mubr.msk.bf16.mxu1 %vm516_vm4, %v721_v63 }
 0x4d4   : > { %1533 = vmatprep.subr.bf16.mxu1 %v737_v3 }
 0x4d5   : > { %v1134_v32 = vpop.permute.xlu1 %1133 }
 0x4d6   : > { %v1145_v33 = vsel %vm455_vm2, %v1134_v32, 0 }
 0x4d7   : > { %1534 = vmatpush3.bf16.msra.mxu1 %v737_v3 }
 0x4d8   : > { %1545 = vmatprep.subr.bf16.mxu1 %v617_v8 }
 0x4d9   : > { %v1130_v35 = vpop.permute.xlu1 %1129 }
 0x4da   : > { %1536 = vmatmul.mubr.msk.bf16.vlgmr.msra.gmra.mrb[8].mxu1 %vm516_vm4, %v722_v5 }
 0x4db   : > { %1546 = vmatpush3.bf16.msra.mxu1 %v617_v8 }
 0x5a5   : > { %v1521_v9 = vpop.f32.mrb[4].mxu1 }
 0x5a6   : > { %v599_v10 = vpop.f32.mrb[5].mxu1  ;;  %v614_v11 = vpack.c.bf16 %v1521_v9, %v1521_v9 }
 0x5a7   : > { %v1522_v12 = vpop.f32.mrb[6].mxu1 }
 0x5a8   : > { %v602_v13 = vpop.f32.mrb[7].mxu1 }
 0x5a9   : > { %v613_v14 = vpack.c.bf16 %v602_v13, %v599_v10 }
 0x5ab   : > { %1547 = vmatprep.mubr.msk.bf16.mxu1 %vm455_vm2, %v613_v14 }
 0x5ac   : > { %1548 = vmatmul.mubr.msk.bf16.vlgmr.msra.gmra.mrb[12].mxu1 %vm455_vm2, %v614_v11 }
 0x5ad   : > { %v1537_v15 = vpop.f32.mrb[8].mxu1 }
 0x5ae   : > { %v773_v16 = vpop.f32.mrb[9].mxu1  ;;  %v788_v20 = vpack.c.bf16 %v1537_v15, %v1537_v15 }
 0x5af   : > { %v1538_v17 = vpop.f32.mrb[10].mxu1 }
 0x5b0   : > { %v776_v18 = vpop.f32.mrb[11].mxu1 }
 0x5b1   : > { %v787_v19 = vpack.c.bf16 %v776_v18, %v773_v16 }
 0x5b3   : > { %1541 = vmatprep.mubr.msk.bf16.mxu0 %vm455_vm2, %v787_v19 }
 0x5b4   : > { %1542 = vmatmul.mubr.msk.bf16.vlgmr.msra.gmra.mrb[12].mxu0 %vm455_vm2, %v788_v20 }
 0x5b5   : > { %1552 = vmatpush3.bf16.xpose.msra.mxu0 %v915_v22  ;;  %1555 = vmatprep.mubr.msk.bf16.mxu0 %vm455_vm2, %v901_v21 }
 0x5b6   : > { %1600 = vmatprep.subr.msk.bf16.mxu0 %vm455_vm2, %v907_v23 }
 0x5bd   : > { %1554 = vmatpush3.bf16.xpose.msra.mxu0 %v918_v24 }
 0x5be   : > { %1601 = vmatprep.subr.msk.bf16.mxu0 %vm455_vm2, %v1132_v25 }
 0x5c4   : > { %1556 = vmatmul.mubr.msk.bf16.vlgmr.msra.gmra.mrb[16].mxu0 %vm455_vm2, %v903_v26 }
 0x5c5   : > { %1574 = vmatpush3.bf16.xpose.msra.mxu0 %v1142_v30  ;;  %1577 = vmatprep.mubr.msk.bf16.mxu0 %vm455_vm2, %v1128_v31 }
 0x5c6   : > { %1602 = vmatprep.subr.msk.bf16.mxu0 %vm455_vm2, %v1134_v32 }
 0x5cd   : > { %1576 = vmatpush3.bf16.xpose.msra.mxu0 %v1145_v33 }
 0x5d4   : > { %1578 = vmatmul.mubr.msk.bf16.vlgmr.msra.gmra.mrb[20].mxu0 %vm455_vm2, %v1130_v35 }
 0x67f   : > { %v1549_v36 = vpop.f32.mrb[12].mxu1 }
 0x680   : > { %v886_v38 = vpop.f32.mrb[13].mxu1 }
 0x681   : > { %v1550_v39 = vpop.f32.mrb[14].mxu1 }
 0x682   : > { %v889_v40 = vpop.f32.mrb[15].mxu1 }
 0x687   : > { %v1543_v41 = vpop.f32.mrb[12].mxu0 }
 0x688   : > { %v1936_v42 = vadd.f32 %v1549_v36, %v1543_v41  ;;  %v832_v43 = vpop.f32.mrb[13].mxu0 }
 0x689   : > { %v1938_v45 = vadd.f32 %v886_v38, %v832_v43  ;;  %v1544_v46 = vpop.f32.mrb[14].mxu0 }
 0x68a   : > { %v835_v49 = vpop.f32.mrb[15].mxu0 }
 0x68b   : > { %v1940_v50 = vadd.f32 %v889_v40, %v835_v49 }
 0x697   : > { %v1557_v27 = vpop.f32.mrb[16].mxu0 }
 0x698   : > { %v954_v51 = vpop.f32.mrb[17].mxu0  ;;  %v974_v53 = vsel %vm523_vm5, %v1557_v27, -inf }
 0x699   : > { %v1558_v52 = vpop.f32.mrb[18].mxu0  ;;  %v968_v29 = vsel %vm516_vm4, %v954_v51, -inf }
 0x69a   : > { %969 = vmax.xlane.f32.xlu0 %v968_v29  ;;  %v957_v34 = vpop.f32.mrb[19].mxu0  ;;  %v1067_v29 = vld [vmem:[%s2017_s5 + $0x20] sm:$0xff] }
 0x69b   : > { %v971_v44 = vsel %vm516_vm4, %v957_v34, -inf }
 0x69c   : > { %972 = vmax.xlane.f32.xlu1 %v971_v44 }
 0x69e   : > { %975 = vmax.xlane.f32.xlu0 %v974_v53 }
 0x6a7   : > { %v1945_v37 = vpop.f32.mrb[20].mxu0 }
 0x6a8   : > { %v1947_v54 = vpop.f32.mrb[21].mxu0  ;;  %v1201_v14 = vsel %vm523_vm5, %v1945_v37, -inf }
 0x6a9   : > { %v1580_v55 = vpop.f32.mrb[22].mxu0  ;;  %v1195_v12 = vsel %vm516_vm4, %v1947_v54, -inf }
 0x6aa   : > { %v1184_v56 = vpop.f32.mrb[23].mxu0 }
 0x6ab   : > { %v1198_v13 = vsel %vm516_vm4, %v1184_v56, -inf }
 0x727   : > { %v970_v57 = vpop.xlane.xlu0 %969 }
 0x728   : > { %v977_v58 = vsub.f32 %v954_v51, %v970_v57 }
 0x729   : > { %v973_v59 = vpop.xlane.xlu1 %972 }
 0x72a   : > { %v980_v60 = vmul.f32 1.442695, %v977_v58  ;;  %v978_v61 = vsub.f32 %v957_v34, %v973_v59  ;;  %v1068_v34 = vld [vmem:[%s2017_s5 + $0x28] sm:$0xff] }
 0x72b   : > { %v976_v62 = vpop.xlane.xlu0 %975  ;;  %v1069_v44 = vpack.c.bf16 %v1068_v34, %v1067_v29 }
 0x72c   : > { %1650 = vpow2.f32 %v980_v60  ;;  %v982_v63 = vmul.f32 1.442695, %v978_v61  ;;  %v979_v3 = vsub.f32 %v1557_v27, %v976_v62 }
 0x72e   : > { %1652 = vpow2.f32 %v982_v63  ;;  %v984_v4 = vmul.f32 1.442695, %v979_v3 }
 0x730   : > { %1654 = vpow2.f32 %v984_v4 }
 0x736   : > { %v1651_v5 = vpop.eup %1650 }
 0x737   : > { %v986_v6 = vsel %vm516_vm4, %v1651_v5, 0.0 }
 0x738   : > { %v1653_v7 = vpop.eup %1652  ;;  %987 = vadd.xlane.f32.xlu0 %v986_v6 }
 0x739   : > { %v989_v10 = vsel %vm516_vm4, %v1653_v7, 0.0 }
 0x73a   : > { %v1655_v8 = vpop.eup %1654 }
 0x73b   : > { %v992_v9 = vsel %vm523_vm5, %v1655_v8, 0.0 }
 0x73c   : > { %993 = vadd.xlane.f32.xlu1 %v992_v9  ;;  %990 = vadd.xlane.f32.xlu0 %v989_v10  ;;  %v1294_v9 = vld [vmem:[%s2017_s5 + $0x30] sm:$0xff]  ;;  %v1295_v10 = vld [vmem:[%s2017_s5 + $0x38] sm:$0xff] }
 0x74d   : > { %1005 = vrot.lane.b32.xlu1 %v1858_v47, %s1687_s13 }
 0x752   : > { %1003 = vrot.lane.b32.xlu0 %v1832_v28, %s1687_s13 }
 0x771   : > { %1196 = vmax.xlane.f32.xlu1 %v1195_v12  ;;  %1199 = vmax.xlane.f32.xlu0 %v1198_v13 }
 0x775   : > { %1202 = vmax.xlane.f32.xlu0 %v1201_v14 }
 0x7c5   : > { %v988_v11 = vpop.xlane.xlu0 %987 }
 0x7c6   : > { %1656 = vrcp.f32 %v988_v11 }
 0x7c9   : > { %v991_v15 = vpop.xlane.xlu0 %990  ;;  %v994_v16 = vpop.xlane.xlu1 %993 }
 0x7ca   : > { %1658 = vrcp.f32 %v991_v15 }
 0x7cb   : > { %1660 = vrcp.f32 %v994_v16 }
 0x7cd   : > { %v1004_v17 = vpop.permute.xlu0 %1003  ;;  %v1006_v18 = vpop.permute.xlu1 %1005 }
 0x7ce   : > { %v1015_v19 = vand.u32 %v1006_v18, %v1861_v48  ;;  %1559 = vmatprep.subr.bf16.mxu1 %v1004_v17 }
 0x7cf   : > { %1560 = vmatpush3.bf16.msra.mxu1 %v1004_v17 }
 0x7d0   : > { %1561 = vmatprep.subr.bf16.mxu1 %v1015_v19  ;;  %v1657_v20 = vpop.eup %1656 }
 0x7d1   : > { %v998_v23 = vmul.f32 %v1657_v20, %v1651_v5 }
 0x7d3   : > { %1562 = vmatpush3.bf16.msra.mxu1 %v1015_v19 }
 0x7d4   : > { %v1659_v21 = vpop.eup %1658  ;;  %1567 = vmatprep.subr.bf16.mxu1 %v1069_v44 }
 0x7d5   : > { %v1661_v22 = vpop.eup %1660  ;;  %v999_v24 = vmul.f32 %v1659_v21, %v1653_v7 }
 0x7d6   : > { %v1000_v25 = vmul.f32 %v1661_v22, %v1655_v8 }
 0x7d7   : > { %v1001_v26 = vpack.c.bf16 %v999_v24, %v998_v23 }
 0x7d8   : > { %v1002_v30 = vpack.c.bf16 %v1000_v25, %v1000_v25 }
 0x7d9   : > { %1563 = vmatprep.mubr.msk.bf16.mxu1 %vm516_vm4, %v1001_v26 }
 0x7da   : > { %1564 = vmatmul.mubr.msk.bf16.vlgmr.msra.gmra.mrb[16].mxu1 %vm516_vm4, %v1002_v30 }
 0x7db   : > { %1568 = vmatpush3.bf16.msra.mxu1 %v1069_v44 }
 0x7fe   : > { %v1200_v31 = vpop.xlane.xlu0 %1199  ;;  %v1197_v32 = vpop.xlane.xlu1 %1196 }
 0x7ff   : > { %v1205_v33 = vsub.f32 %v1184_v56, %v1200_v31  ;;  %v1204_v36 = vsub.f32 %v1947_v54, %v1197_v32 }
 0x801   : > { %v1209_v35 = vmul.f32 1.442695, %v1205_v33  ;;  %v1207_v40 = vmul.f32 1.442695, %v1204_v36 }
 0x802   : > { %v1203_v38 = vpop.xlane.xlu0 %1202 }
 0x803   : > { %1662 = vpow2.f32 %v1209_v35  ;;  %v1206_v39 = vsub.f32 %v1945_v37, %v1203_v38 }
 0x805   : > { %v1211_v41 = vmul.f32 1.442695, %v1206_v39 }
 0x807   : > { %1664 = vpow2.f32 %v1211_v41 }
 0x808   : > { %1666 = vpow2.f32 %v1207_v40 }
 0x80d   : > { %v1663_v43 = vpop.eup %1662 }
 0x80e   : > { %v1216_v46 = vsel %vm516_vm4, %v1663_v43, 0.0 }
 0x80f   : > { %1217 = vadd.xlane.f32.xlu0 %v1216_v46 }
 0x811   : > { %v1665_v49 = vpop.eup %1664 }
 0x812   : > { %v1219_v27 = vsel %vm523_vm5, %v1665_v49, 0.0  ;;  %v1667_v51 = vpop.eup %1666 }
 0x813   : > { %1220 = vadd.xlane.f32.xlu1 %v1219_v27  ;;  %v1213_v52 = vsel %vm516_vm4, %v1667_v51, 0.0 }
 0x817   : > { %1214 = vadd.xlane.f32.xlu1 %v1213_v52 }
 0x825   : > { %1230 = vrot.lane.b32.xlu0 %v1832_v28, %s1689_s15 }
 0x828   : > { %1232 = vrot.lane.b32.xlu1 %v1858_v47, %s1689_s15 }
 0x89c   : > { %v1218_v53 = vpop.xlane.xlu0 %1217 }
 0x89d   : > { %1668 = vrcp.f32 %v1218_v53 }
 0x8a0   : > { %v1231_v37 = vpop.permute.xlu0 %1230  ;;  %v1221_v54 = vpop.xlane.xlu1 %1220 }
 0x8a1   : > { %1581 = vmatprep.subr.bf16.mxu1 %v1231_v37 }
 0x8a4   : > { %v1215_v55 = vpop.xlane.xlu1 %1214 }
 0x8a5   : > { %1670 = vrcp.f32 %v1215_v55 }
 0x8a6   : > { %1672 = vrcp.f32 %v1221_v54 }
 0x8a7   : > { %v1669_v56 = vpop.eup %1668 }
 0x8a8   : > { %v1226_v63 = vmul.f32 %v1669_v56, %v1663_v43  ;;  %v1233_v28 = vpop.permute.xlu1 %1232 }
 0x8a9   : > { %v1242_v6 = vand.u32 %v1233_v28, %v1861_v48  ;;  %v1296_v48 = vpack.c.bf16 %v1295_v10, %v1294_v9 }
 0x8ad   : > { %v1565_v57 = vpop.f32.mrb[16].mxu1 }
 0x8ae   : > { %v1051_v58 = vpop.f32.mrb[17].mxu1  ;;  %v1066_v4 = vpack.c.bf16 %v1565_v57, %v1565_v57 }
 0x8af   : > { %v1671_v59 = vpop.eup %1670  ;;  %v1566_v60 = vpop.f32.mrb[18].mxu1 }
 0x8b0   : > { %v1054_v61 = vpop.f32.mrb[19].mxu1  ;;  %v1225_v62 = vmul.f32 %v1671_v59, %v1667_v51  ;;  %v1673_v5 = vpop.eup %1672 }
 0x8b1   : > { %v1065_v3 = vpack.c.bf16 %v1054_v61, %v1051_v58  ;;  %v1227_v7 = vmul.f32 %v1673_v5, %v1665_v49 }
 0x8b2   : > { %v1228_v47 = vpack.c.bf16 %v1226_v63, %v1225_v62 }
 0x8b3   : > { %1569 = vmatprep.mubr.msk.bf16.mxu1 %vm455_vm2, %v1065_v3  ;;  %v1229_v8 = vpack.c.bf16 %v1227_v7, %v1227_v7 }
 0x8b4   : > { %1570 = vmatmul.mubr.msk.bf16.vlgmr.msra.gmra.mrb[20].mxu1 %vm455_vm2, %v1066_v4 }
 0x8b5   : > { %1582 = vmatpush3.bf16.msra.mxu1 %v1231_v37  ;;  %1585 = vmatprep.mubr.msk.bf16.mxu1 %vm516_vm4, %v1228_v47 }
 0x8b6   : > { %1583 = vmatprep.subr.bf16.mxu1 %v1242_v6 }
 0x8b9   : > { %1584 = vmatpush3.bf16.msra.mxu1 %v1242_v6 }
 0x8ba   : > { %1589 = vmatprep.subr.bf16.mxu1 %v1296_v48 }
 0x8bc   : > { %1586 = vmatmul.mubr.msk.bf16.vlgmr.msra.gmra.mrb[24].mxu1 %vm516_vm4, %v1229_v8 }
 0x8bd   : > { %1590 = vmatpush3.bf16.msra.mxu1 %v1296_v48 }
 0x987   : > { %v1571_v12 = vpop.f32.mrb[20].mxu1 }
 0x988   : > { %v1126_v13 = vadd.f32 %v1571_v12, %v1936_v42  ;;  %v1110_v14 = vpop.f32.mrb[21].mxu1 }
 0x989   : > { %v1124_v11 = vadd.f32 %v1110_v14, %v1938_v45  ;;  %v1572_v15 = vpop.f32.mrb[22].mxu1  ;;  %v1460_v45 = vld [vmem:[%s2018_s6] ss:$0 sm:$0xff] }
 0x98a   : > { %v1113_v16 = vpop.f32.mrb[23].mxu1 }
 0x98b   : > { %v1125_v17 = vadd.f32 %v1113_v16, %v1940_v50 }
 0x98f   : > { %v1587_v18 = vpop.f32.mrb[24].mxu1 }
 0x990   : > { %v1278_v19 = vpop.f32.mrb[25].mxu1  ;;  %v1293_v23 = vpack.c.bf16 %v1587_v18, %v1587_v18 }
 0x991   : > { %v1588_v20 = vpop.f32.mrb[26].mxu1 }
 0x992   : > { %v1281_v21 = vpop.f32.mrb[27].mxu1 }
 0x993   : > { %v1292_v22 = vpack.c.bf16 %v1281_v21, %v1278_v19 }
 0x995   : > { %1591 = vmatprep.mubr.msk.bf16.mxu1 %vm455_vm2, %v1292_v22 }
 0x996   : > { %1592 = vmatmul.mubr.msk.bf16.vlgmr.msra.gmra.mrb[28].mxu1 %vm455_vm2, %v1293_v23 }
 0xa69   : > { %v1593_v24 = vpop.f32.mrb[28].mxu1 }
 0xa6a   : > { %v1353_v42 = vadd.f32 %v1593_v24, %v1126_v13  ;;  %v1337_v25 = vpop.f32.mrb[29].mxu1 }
 0xa6b   : > { %v1351_v26 = vadd.f32 %v1337_v25, %v1124_v11  ;;  %v1594_v50 = vpop.f32.mrb[30].mxu1 }
 0xa6c   : > { %v1356_v30 = vadd.f32 %v1353_v42, %v1748_v1  ;;  %v1340_v31 = vpop.f32.mrb[31].mxu1 }
 0xa6d   : > { %v1354_v32 = vadd.f32 %v1351_v26, %v1746_v0  ;;  %v1352_v33 = vadd.f32 %v1340_v31, %v1125_v17 }
 0xa6e   : > { %v1366_v35 = vadd.f32 %v1460_v45, %v1356_v30 }
 0xa6f   : > { %v1364_v36 = vadd.f32 %v1460_v45, %v1354_v32  ;;  %v1355_v38 = vadd.f32 %v1352_v33, %v1750_v2 }
 0xa70   : > { %1369 = vst.msk [vmem:[%s278_s12 + $0x10] sm:$0x1] %vm292_vm1, %v1366_v35 }
 0xa71   : > { %1367 = vst.msk [vmem:[%s278_s12] sm:$0xff] %vm285_vm0, %v1364_v36  ;;  %v1365_v39 = vadd.f32 %v1460_v45, %v1355_v38 }
 0xa73   : > { %1368 = vst.msk [vmem:[%s278_s12 + $0x8] sm:$0xff] %vm285_vm0, %v1365_v39 }
 0xa74 PF: > { %s17_s24 = sadd.s32 1, %s1680_s24  }
 0xa75   : > { %p14_p4 = scmp.ge.s32.totalorder %s17_s24, 6  }
 0xa77   :  { %16 = sbr.rel (!%p14_p4) target bundleno = 1 (0x1), region = 78 }

// kernel: molmo_vision_backbone_forward.13
= control target key start
LH: loop header
LB: loop body
LE: loop exit
PB: predicated region body
PF: predicated region fallthrough
CT: control target
= control target key end

     0   :  { %v260_v7 = vmov 0   ;;  %s400_s0 = inlined_call_operand.vmem [shape: f32[16,64], index: 0, kind: input, shape index: {}]   ;;  %s401_s1 = inlined_call_operand.vmem [shape: f32[64,256], index: 1, kind: input, shape index: {}]   ;;  %s402_s2 = inlined_call_operand.vmem [shape: f32[128,128], index: 2, kind: input, shape index: {}]   ;;  %s403_s3 = inlined_call_operand.hbm [shape: f32[16,128], index: 3, kind: output, shape index: {}]  }
   0x1   :  { %v20_v0 = vld [vmem:[%s401_s1 + $0x8] sm:$0xff]  ;;  %v22_v1 = vld [vmem:[%s401_s1 + $0x18] sm:$0xff]  ;;  %v19_v2 = vld [vmem:[%s401_s1] sm:$0xff]  ;;  %79 = vmatprep.mubr.bf16.mxu0 %v260_v7 }
   0x2   :  { %v36_v3 = vpack.c.bf16 %v22_v1, %v20_v0  ;;  %v21_v4 = vld [vmem:[%s401_s1 + $0x10] sm:$0xff]  ;;  %v24_v5 = vld [vmem:[%s401_s1 + $0x28] sm:$0xff]  ;;  %v26_v6 = vld [vmem:[%s401_s1 + $0x38] sm:$0xff] }
   0x3   :  { %v35_v8 = vpack.c.bf16 %v21_v4, %v19_v2  ;;  %v38_v9 = vpack.c.bf16 %v26_v6, %v24_v5  ;;  %v23_v10 = vld [vmem:[%s401_s1 + $0x20] sm:$0xff]  ;;  %v25_v11 = vld [vmem:[%s401_s1 + $0x30] sm:$0xff]  ;;  %v28_v12 = vld [vmem:[%s401_s1 + $0x48] sm:$0xff] }
   0x4   :  { %47 = vmatprep.subr.bf16.mxu0 %v36_v3  ;;  %v30_v13 = vld [vmem:[%s401_s1 + $0x58] sm:$0xff]  ;;  %v37_v14 = vpack.c.bf16 %v25_v11, %v23_v10  ;;  %v27_v16 = vld [vmem:[%s401_s1 + $0x40] sm:$0xff]  ;;  %v29_v17 = vld [vmem:[%s401_s1 + $0x50] sm:$0xff] }
   0x5   :  { %48 = vmatpush1.bf16.msra.mxu0 %v35_v8  ;;  %v40_v15 = vpack.c.bf16 %v30_v13, %v28_v12  ;;  %v32_v18 = vld [vmem:[%s401_s1 + $0x68] sm:$0xff]  ;;  %v34_v19 = vld [vmem:[%s401_s1 + $0x78] sm:$0xff] }
   0x6   :  { %49 = vmatprep.subr.bf16.mxu0 %v38_v9 }
   0x7   :  { %8 = vsyncpa [#allocation3], 0  ;;  %v39_v20 = vpack.c.bf16 %v29_v17, %v27_v16  ;;  %v42_v21 = vpack.c.bf16 %v34_v19, %v32_v18  ;;  %v31_v22 = vld [vmem:[%s401_s1 + $0x60] sm:$0xff]  ;;  %v33_v23 = vld [vmem:[%s401_s1 + $0x70] sm:$0xff]  ;;  %vm43_vm0 = vcmask 523264   ;;  %v261_v31 = vmov 0.0  }
   0x8   :  { %v41_v24 = vpack.c.bf16 %v33_v23, %v31_v22  ;;  %v16_v25 = vld [vmem:[%s400_s0] sm:$0xff]  ;;  %v17_v26 = vld [vmem:[%s400_s0 + $0x8] sm:$0xff]  ;;  %202 = vmatprep.subr.bf16.mxu1 %v261_v31  ;;  %v109_v32 = vld [vmem:[%s402_s2 + $0x10] sm:$0xff]  ;;  %vm262_vm1 = vmmov 0  }
   0x9   :  { %50 = vmatpush1.bf16.msra.mxu0 %v37_v14  ;;  %v18_v27 = vpack.c.bf16 %v17_v26, %v16_v25  ;;  %v107_v28 = vld [vmem:[%s402_s2] sm:$0xff]  ;;  %v108_v29 = vld [vmem:[%s402_s2 + $0x8] sm:$0xff]  ;;  %v110_v33 = vld [vmem:[%s402_s2 + $0x18] sm:$0xff]  ;;  %218 = vmatprep.mubr.msk.bf16.mxu1 %vm262_vm1, %v261_v31 }
   0xa   :  { %51 = vmatprep.subr.bf16.mxu0 %v40_v15  ;;  %v123_v30 = vpack.c.bf16 %v108_v29, %v107_v28  ;;  %v124_v34 = vpack.c.bf16 %v110_v33, %v109_v32  ;;  %v111_v35 = vld [vmem:[%s402_s2 + $0x20] sm:$0xff]  ;;  %v112_v36 = vld [vmem:[%s402_s2 + $0x28] sm:$0xff]  ;;  %v113_v38 = vld [vmem:[%s402_s2 + $0x30] sm:$0xff] }
   0xb   :  { %v125_v37 = vpack.c.bf16 %v112_v36, %v111_v35  ;;  %v114_v39 = vld [vmem:[%s402_s2 + $0x38] sm:$0xff]  ;;  %v115_v41 = vld [vmem:[%s402_s2 + $0x40] sm:$0xff]  ;;  %v116_v42 = vld [vmem:[%s402_s2 + $0x48] sm:$0xff] }
   0xc   :  { %203 = vmatpush3.bf16.msra.mxu1 %v123_v30  ;;  %v126_v40 = vpack.c.bf16 %v114_v39, %v113_v38  ;;  %v127_v43 = vpack.c.bf16 %v116_v42, %v115_v41  ;;  %v117_v44 = vld [vmem:[%s402_s2 + $0x50] sm:$0xff]  ;;  %v118_v45 = vld [vmem:[%s402_s2 + $0x58] sm:$0xff]  ;;  %v119_v47 = vld [vmem:[%s402_s2 + $0x60] sm:$0xff] }
   0xd   :  { %52 = vmatpush1.bf16.msra.mxu0 %v39_v20  ;;  %204 = vmatprep.subr.bf16.mxu1 %v261_v31  ;;  %v128_v46 = vpack.c.bf16 %v118_v45, %v117_v44  ;;  %v120_v48 = vld [vmem:[%s402_s2 + $0x68] sm:$0xff]  ;;  %v121_v50 = vld [vmem:[%s402_s2 + $0x70] sm:$0xff]  ;;  %v122_v51 = vld [vmem:[%s402_s2 + $0x78] sm:$0xff]  ;;  %s263_s2 = smov [#allocation2]  }
   0xe   :  { %53 = vmatprep.subr.bf16.mxu0 %v42_v21  ;;  %v129_v49 = vpack.c.bf16 %v120_v48, %v119_v47  ;;  %v130_v52 = vpack.c.bf16 %v122_v51, %v121_v50  ;;  %s179_s23 = sshll.u32 %s263_s2, 4  ;;  %s180_s23 = int_to_ptr.vmem [resolvable:$true] %s179_s23 }
   0xf   :  { %s236_s24 = scalar_lea.vmem %s180_s23, 256  ;;  %p241_p1 = scmp.lt.s32.totalorder %s180_s23, %s180_s23 }
  0x10   :  { %205 = vmatpush3.bf16.msra.mxu1 %v124_v34  ;;  %p237_p0 = scmp.ne.s32.totalorder %s180_s23, %s236_s24  ;;  %p242_p2 = scmp.lt.s32.totalorder %s236_s24, %s236_s24 }
  0x11   :  { %54 = vmatpush1.bf16.msra.mxu0 %v41_v24  ;;  %206 = vmatprep.subr.bf16.mxu1 %v261_v31 }
  0x12   :  { %p243_p3 = por %p242_p2, %p241_p1 }
  0x14   :  { %190 = vmatmul.mubr.msk.bf16.vlgmr.msra.gmra.mrb[0].mxu0 %vm43_vm0, %v18_v27  ;;  %207 = vmatpush3.bf16.msra.mxu1 %v125_v37  ;;  %p244_p4 = pnand %p243_p3, %p237_p0 }
  0x15   :  { %208 = vmatprep.subr.bf16.mxu1 %v261_v31 }
  0x18   :  { %209 = vmatpush3.bf16.msra.mxu1 %v126_v40 }
  0x19   :  { %210 = vmatprep.subr.bf16.mxu1 %v261_v31 }
  0x1c   :  { %211 = vmatpush3.bf16.msra.mxu1 %v127_v43 }
  0x1d   :  { %212 = vmatprep.subr.bf16.mxu1 %v261_v31 }
  0x20   :  { %213 = vmatpush3.bf16.msra.mxu1 %v128_v46 }
  0x21   :  { %214 = vmatprep.subr.bf16.mxu1 %v261_v31 }
  0x24   :  { %215 = vmatpush3.bf16.msra.mxu1 %v129_v49 }
  0x25   :  { %216 = vmatprep.subr.bf16.mxu1 %v261_v31 }
  0x28   :  { %217 = vmatpush3.bf16.msra.mxu1 %v130_v52 }
  0xe7   :  { %v81_v53 = vpop.f32.mrb[0].mxu0 }
  0xe8   :  { %v191_v54 = vmul.f32 -1.442695, %v81_v53  ;;  %v83_v55 = vpop.f32.mrb[1].mxu0 }
  0xe9   :  { %v85_v56 = vpop.f32.mrb[2].mxu0 }
  0xea   :  { %228 = vpow2.f32 %v191_v54  ;;  %v192_v57 = vmul.f32 -1.442695, %v85_v56  ;;  %v87_v58 = vpop.f32.mrb[3].mxu0 }
  0xec   :  { %230 = vpow2.f32 %v192_v57 }
  0xf4   :  { %v229_v59 = vpop.eup %228 }
  0xf5   :  { %v96_v60 = vadd.f32 1.0, %v229_v59 }
  0xf6   :  { %v231_v61 = vpop.eup %230 }
  0xf7   :  { %232 = vrcp.f32 %v96_v60  ;;  %v97_v62 = vadd.f32 1.0, %v231_v61 }
  0xf9   :  { %234 = vrcp.f32 %v97_v62 }
 0x101   :  { %v233_v63 = vpop.eup %232 }
 0x102   :  { %v102_v0 = vmul.f32 %v233_v63, %v81_v53 }
 0x103   :  { %v235_v1 = vpop.eup %234 }
 0x104   :  { %v104_v2 = vmul.f32 %v102_v0, %v83_v55  ;;  %v103_v3 = vmul.f32 %v235_v1, %v85_v56 }
 0x106   :  { %v105_v4 = vmul.f32 %v103_v3, %v87_v58 }
 0x108   :  { %v106_v5 = vpack.c.bf16 %v105_v4, %v104_v2 }
 0x10a   :  { %219 = vmatmul.mubr.bf16.vlgmr.msra.gmra.mrb[0].mxu1 %v106_v5 }
 0x1dd   :  { %v165_v6 = vpop.f32.mrb[0].mxu1 }
 0x1de   :  { %172 = vst [vmem:[#allocation2] sm:$0xff] %v165_v6  ;;  %v220_v7 = vpop.f32.mrb[1].mxu1 }
 0x1df   :  { %v168_v8 = vpop.f32.mrb[2].mxu1 }
 0x1e0   :  { %173 = vst [vmem:[#allocation2 + $0x8] sm:$0xff] %v168_v8  ;;  %v221_v9 = vpop.f32.mrb[3].mxu1 }
 0x1e1   :  { %247 = shalt.err (!%p244_p4)
}
 0x1e2   :  { %s248_s26 = scalar_lea.hbm %s403_s3, 256 }
 0x1e3   :  { %p249_p5 = scmp.ne.s32.totalorder %s403_s3, %s248_s26  ;;  %p252_p6 = scmp.lt.u32.totalorder %s248_s26, %s403_s3 }
 0x1e5   :  { %p254_p7 = pnand %p252_p6, %p249_p5 }
 0x1e7   :  { %257 = shalt.err (!%p254_p7)
}
 0x1e8   :  { %s264_s4 = smov 128   ;;  %s265_s5 = smov 8  }
 0x1e9   :  { %185 = dma.vmem_to_hbm [thread:$0]  %s180_s23, 256, %s403_s3, [#allocation3], %s264_s4, %s264_s4, %s265_s5  }
 0x1ea   :  { %258 = dma.done.wait [#allocation3], 256  }
 0x1eb   :  { %259 = vsyncadd [#allocation3], 4294967040 }
 0x1ec   :  { %189 = vsyncpa [#allocation3], 1 }

// kernel: molmo_vision_backbone_forward.12
= control target key start
LH: loop header
LB: loop body
LE: loop exit
PB: predicated region body
PF: predicated region fallthrough
CT: control target
= control target key end

     0   :  { %v1094_v0 = vmov 0   ;;  %v1095_v15 = vmov 0.0   ;;  %vm1096_vm0 = vmmov 0   ;;  %vm122_vm1 = vcmask 523264   ;;  %s1099_s25 = smov 80   ;;  %s1100_s28 = smov 64   ;;  %s1493_s1 = inlined_call_operand.vmem [shape: f32[64,1], index: 1, kind: input, shape index: {}]   ;;  %s1494_s4 = inlined_call_operand.vmem [shape: f32[64,128], index: 4, kind: input, shape index: {}]   ;;  %s1495_s2 = inlined_call_operand.vmem [shape: f32[64,64], index: 2, kind: input, shape index: {}]   ;;  %s1496_s0 = inlined_call_operand.vmem [shape: f32[64,64], index: 0, kind: input, shape index: {}]   ;;  %s1497_s3 = inlined_call_operand.vmem [shape: f32[1,64], index: 3, kind: input, shape index: {}]   ;;  %s1498_s5 = inlined_call_operand.vmem [shape: f32[1,128], index: 5, kind: input, shape index: {}]   ;;  %s1499_s6 = inlined_call_operand.vmem [shape: f32[64,64], index: 6, kind: input, shape index: {}]   ;;  %s1500_s7 = inlined_call_operand.vmem [shape: f32[1,64], index: 7, kind: input, shape index: {}]   ;;  %s1501_s8 = inlined_call_operand.vmem [shape: f32[16,64], index: 8, kind: output, shape index: {}]  }
   0x1   :  { %1013 = vset.pattern.permute.xlu1 %v1094_v0  ;;  %1012 = vset.pattern.permute.xlu0 %v1094_v0  ;;  %v40_v1 = vld [vmem:[%s1493_s1 + $0x10] sm:$0xff]  ;;  %v38_v2 = vld [vmem:[%s1493_s1] sm:$0xff]  ;;  %v41_v3 = vld [vmem:[%s1493_s1 + $0x18] sm:$0xff]  ;;  %vm271_vm2 = vcmask 130048   ;;  %s1101_s10 = smov 48   ;;  %s1102_s11 = smov 32  }
   0x2   :  { %58 = vperm.xlu1 %1013, %v40_v1   ;;  %48 = vperm.xlu0 %1012, %v38_v2   ;;  %v39_v4 = vld [vmem:[%s1493_s1 + $0x8] sm:$0xff]  ;;  %v171_v5 = vld [vmem:[%s1494_s4] sm:$0xff]  ;;  %v173_v7 = vld [vmem:[%s1494_s4 + $0x10] sm:$0xff]  ;;  %s1103_s12 = smov 16  }
   0x3   :  { %v172_v6 = vld [vmem:[%s1494_s4 + $0x8] sm:$0xff]  ;;  %v174_v8 = vld [vmem:[%s1494_s4 + $0x18] sm:$0xff]  ;;  %v175_v12 = vld [vmem:[%s1494_s4 + $0x20] sm:$0xff]  ;;  %950 = vmatprep.subr.bf16.mxu0 %v1095_v15  ;;  %958 = vmatprep.mubr.msk.bf16.mxu0 %vm1096_vm0, %v1095_v15 }
   0x4   :  { %v179_v9 = vpack.c.bf16 %v172_v6, %v171_v5  ;;  %v180_v10 = vpack.c.bf16 %v174_v8, %v173_v7  ;;  %v43_v11 = vld [vmem:[%s1493_s1 + $0x28] sm:$0xff]  ;;  %v42_v14 = vld [vmem:[%s1493_s1 + $0x20] sm:$0xff]  ;;  %v105_v19 = vld [vmem:[%s1495_s2 + $0x10] sm:$0xff] }
   0x5   :  { %v176_v13 = vld [vmem:[%s1494_s4 + $0x28] sm:$0xff]  ;;  %v103_v16 = vld [vmem:[%s1495_s2] sm:$0xff]  ;;  %v106_v20 = vld [vmem:[%s1495_s2 + $0x18] sm:$0xff] }
   0x6   :  { %63 = vperm.xlu1 %1013, %v41_v3   ;;  %53 = vperm.xlu0 %1012, %v39_v4   ;;  %v104_v17 = vld [vmem:[%s1495_s2 + $0x8] sm:$0xff]  ;;  %v181_v21 = vpack.c.bf16 %v176_v13, %v175_v12  ;;  %v177_v22 = vld [vmem:[%s1494_s4 + $0x30] sm:$0xff]  ;;  %v178_v23 = vld [vmem:[%s1494_s4 + $0x38] sm:$0xff]  ;;  %v112_v26 = vpack.c.bf16 %v106_v20, %v105_v19 }
   0x7   :  { %962 = vmatprep.subr.bf16.mxu1 %v179_v9  ;;  %v111_v18 = vpack.c.bf16 %v104_v17, %v103_v16  ;;  %v45_v24 = vld [vmem:[%s1493_s1 + $0x38] sm:$0xff]  ;;  %v44_v25 = vld [vmem:[%s1493_s1 + $0x30] sm:$0xff]  ;;  %v107_v27 = vld [vmem:[%s1495_s2 + $0x20] sm:$0xff]  ;;  %v182_v29 = vpack.c.bf16 %v178_v23, %v177_v22 }
   0x8   :  { %963 = vmatpush3.bf16.msra.mxu1 %v179_v9  ;;  %v108_v28 = vld [vmem:[%s1495_s2 + $0x28] sm:$0xff]  ;;  %v109_v31 = vld [vmem:[%s1495_s2 + $0x30] sm:$0xff]  ;;  %v110_v32 = vld [vmem:[%s1495_s2 + $0x38] sm:$0xff] }
   0x9   :  { %964 = vmatprep.subr.bf16.mxu1 %v180_v10  ;;  %951 = vmatpush3.bf16.msra.mxu0 %v111_v18  ;;  %v113_v30 = vpack.c.bf16 %v108_v28, %v107_v27  ;;  %v114_v33 = vpack.c.bf16 %v110_v32, %v109_v31  ;;  %v32_v36 = vld [vmem:[%s1496_s0 + $0x10] sm:$0xff]  ;;  %v30_v37 = vld [vmem:[%s1496_s0] sm:$0xff]  ;;  %v33_v38 = vld [vmem:[%s1496_s0 + $0x18] sm:$0xff] }
   0xa   :  { %73 = vperm.xlu1 %1013, %v43_v11   ;;  %68 = vperm.xlu0 %1012, %v42_v14   ;;  %v31_v39 = vld [vmem:[%s1496_s0 + $0x8] sm:$0xff]  ;;  %v34_v47 = vld [vmem:[%s1496_s0 + $0x20] sm:$0xff]  ;;  %v37_v54 = vld [vmem:[%s1496_s0 + $0x38] sm:$0xff] }
   0xb   :  { %952 = vmatprep.subr.bf16.mxu0 %v1095_v15  ;;  %v35_v46 = vld [vmem:[%s1496_s0 + $0x28] sm:$0xff]  ;;  %v36_v55 = vld [vmem:[%s1496_s0 + $0x30] sm:$0xff]  ;;  %v917_v13 = vld [vmem:[%s1497_s3] ss:$0 sm:$0xff]  ;;  %s1097_s3 = smov 112  }
   0xc   :  { %965 = vmatpush3.bf16.msra.mxu1 %v180_v10  ;;  %v919_v16 = vld [vmem:[%s1498_s5] ss:$0 sm:$0xff]  ;;  %s1098_s5 = smov 96  }
   0xd   :  { %966 = vmatprep.subr.bf16.mxu1 %v181_v21  ;;  %953 = vmatpush3.bf16.msra.mxu0 %v112_v26 }
   0xe   :  { %83 = vperm.xlu1 %1013, %v45_v24   ;;  %78 = vperm.xlu0 %1012, %v44_v25  }
   0xf   :  { %954 = vmatprep.subr.bf16.mxu0 %v1095_v15 }
  0x10   :  { %967 = vmatpush3.bf16.msra.mxu1 %v181_v21 }
  0x11   :  { %968 = vmatprep.subr.bf16.mxu1 %v182_v29  ;;  %955 = vmatpush3.bf16.msra.mxu0 %v113_v30 }
  0x12   :  { %956 = vmatprep.subr.bf16.mxu0 %v1095_v15 }
  0x14   :  { %969 = vmatpush3.bf16.msra.mxu1 %v182_v29 }
  0x15   :  { %990 = vmatprep.subr.bf16.mxu1 %v1095_v15  ;;  %957 = vmatpush3.bf16.msra.mxu0 %v114_v33 }
  0x16   :  { %978 = vmatprep.subr.bf16.mxu0 %v1095_v15 }
  0x81   :  { %v59_v34 = vpop.permute.xlu1 %58  ;;  %v49_v35 = vpop.permute.xlu0 %48 }
  0x82   :  { %v88_v42 = vmul.f32 %v59_v34, %v32_v36  ;;  %v86_v43 = vmul.f32 %v49_v35, %v30_v37 }
  0x84   :  { %v94_v56 = vadd.f32 %v88_v42, %v86_v43 }
  0x85   :  { %v64_v40 = vpop.permute.xlu1 %63  ;;  %v54_v41 = vpop.permute.xlu0 %53 }
  0x86   :  { %v89_v44 = vmul.f32 %v64_v40, %v33_v38  ;;  %v87_v45 = vmul.f32 %v54_v41, %v31_v39 }
  0x88   :  { %v168_v48 = vpack.c.bf16 %v89_v44, %v88_v42  ;;  %v167_v49 = vpack.c.bf16 %v87_v45, %v86_v43  ;;  %v95_v57 = vadd.f32 %v89_v44, %v87_v45 }
  0x89   :  { %v74_v50 = vpop.permute.xlu1 %73  ;;  %v69_v51 = vpop.permute.xlu0 %68 }
  0x8a   :  { %v91_v52 = vmul.f32 %v74_v50, %v35_v46  ;;  %v90_v53 = vmul.f32 %v69_v51, %v34_v47  ;;  %970 = vmatprep.mubr.msk.bf16.mxu1 %vm122_vm1, %v167_v49 }
  0x8b   :  { %971 = vmatmul.mubr.msk.bf16.vlgmr.msra.gmra.mrb[0].mxu1 %vm122_vm1, %v168_v48 }
  0x8c   :  { %v169_v58 = vpack.c.bf16 %v91_v52, %v90_v53  ;;  %v97_v61 = vadd.f32 %v95_v57, %v91_v52  ;;  %v96_v62 = vadd.f32 %v94_v56, %v90_v53 }
  0x8d   :  { %v84_v59 = vpop.permute.xlu1 %83  ;;  %v79_v60 = vpop.permute.xlu0 %78 }
  0x8e   :  { %v93_v63 = vmul.f32 %v84_v59, %v37_v54  ;;  %v92_v0 = vmul.f32 %v79_v60, %v36_v55  ;;  %974 = vmatprep.mubr.msk.bf16.mxu1 %vm122_vm1, %v169_v58 }
  0x90   :  { %v99_v1 = vadd.f32 %v97_v61, %v93_v63  ;;  %v98_v2 = vadd.f32 %v96_v62, %v92_v0  ;;  %v170_v3 = vpack.c.bf16 %v93_v63, %v92_v0 }
  0x92   :  { %v101_v4 = vmul.f32 0.25, %v99_v1  ;;  %v100_v5 = vmul.f32 0.25, %v98_v2 }
  0x93   :  { %975 = vmatmul.mubr.msk.bf16.gmra.mrb[4].mxu1 %vm122_vm1, %v170_v3 }
  0x94   :  { %v102_v6 = vpack.c.bf16 %v101_v4, %v100_v5  ;;  %992 = vmatprep.mubr.msk.bf16.mxu1 %vm1096_vm0, %v1095_v15 }
  0x96   :  { %959 = vmatmul.mubr.msk.bf16.vlgmr.msra.gmra.mrb[0].mxu0 %vm122_vm1, %v102_v6 }
  0x97   :  { %980 = vmatprep.mubr.msk.bf16.mxu0 %vm1096_vm0, %v1095_v15 }
 0x15e   :  { %v972_v7 = vpop.f32.mrb[0].mxu1 }
 0x15f   :  { %v236_v8 = vpop.f32.mrb[1].mxu1  ;;  %v1270_v25 = vadd.f32 %v972_v7, %v919_v16 }
 0x160   :  { %v973_v9 = vpop.f32.mrb[2].mxu1  ;;  %v1268_v22 = vadd.f32 %v919_v16, %v236_v8 }
 0x161   :  { %v239_v10 = vpop.f32.mrb[3].mxu1  ;;  %v1290_v39 = vadd.f32 %v973_v9, %v919_v16 }
 0x162   :  { %v1287_v37 = vadd.f32 %v919_v16, %v239_v10 }
 0x166   :  { %v976_v11 = vpop.f32.mrb[4].mxu1 }
 0x167   :  { %v252_v12 = vpop.f32.mrb[5].mxu1  ;;  %v1281_v32 = vadd.f32 %v976_v11, %v919_v16 }
 0x168   :  { %v977_v14 = vpop.f32.mrb[6].mxu1  ;;  %v1276_v29 = vadd.f32 %v919_v16, %v252_v12 }
 0x169   :  { %v160_v17 = vpop.f32.mrb[0].mxu0  ;;  %v255_v18 = vpop.f32.mrb[7].mxu1  ;;  %v1298_v43 = vadd.f32 %v977_v14, %v919_v16 }
 0x16a   :  { %v161_v19 = vadd.f32 %v917_v13, %v160_v17  ;;  %v960_v20 = vpop.f32.mrb[1].mxu0  ;;  %v1294_v41 = vadd.f32 %v919_v16, %v255_v18 }
 0x16b   :  { %v163_v21 = vpop.f32.mrb[2].mxu0 }
 0x16c   :  { %v267_v23 = vmul.f32 0.25, %v161_v19  ;;  %v961_v24 = vpop.f32.mrb[3].mxu0  ;;  %v164_v35 = vadd.f32 %v917_v13, %v163_v21 }
 0x16e   :  { %v269_v26 = vmul.f32 %v267_v23, %v1268_v22  ;;  %v278_v28 = vmul.f32 %v267_v23, %v1270_v25  ;;  %v286_v31 = vmul.f32 %v267_v23, %v1276_v29  ;;  %v294_v34 = vmul.f32 %v267_v23, %v1281_v32 }
 0x16f   :  { %v268_v36 = vmul.f32 0.25, %v164_v35 }
 0x170   :  { %368 = vrot.lane.b32.xlu0 %v269_v26, %s1097_s3  ;;  %v272_v27 = vsel %vm271_vm2, %v269_v26, 0.0  ;;  %v280_v30 = vsel %vm271_vm2, %v278_v28, 0.0  ;;  %v288_v33 = vsel %vm271_vm2, %v286_v31, 0.0  ;;  %v296_v49 = vsel %vm271_vm2, %v294_v34, 0.0 }
 0x171   :  { %273 = vadd.xlane.f32.xlu1 %v272_v27  ;;  %v270_v38 = vmul.f32 %v268_v36, %v1287_v37  ;;  %v279_v40 = vmul.f32 %v268_v36, %v1290_v39  ;;  %v287_v42 = vmul.f32 %v268_v36, %v1294_v41  ;;  %v295_v44 = vmul.f32 %v268_v36, %v1298_v43 }
 0x173   :  { %v275_v45 = vsel %vm271_vm2, %v270_v38, 0.0  ;;  %v283_v46 = vsel %vm271_vm2, %v279_v40, 0.0  ;;  %v291_v47 = vsel %vm271_vm2, %v287_v42, 0.0  ;;  %v299_v48 = vsel %vm271_vm2, %v295_v44, 0.0 }
 0x174   :  { %382 = vrot.lane.b32.xlu0 %v278_v28, %s1097_s3 }
 0x175   :  { %281 = vadd.xlane.f32.xlu1 %v280_v30 }
 0x178   :  { %396 = vrot.lane.b32.xlu0 %v286_v31, %s1097_s3 }
 0x179   :  { %289 = vadd.xlane.f32.xlu1 %v288_v33 }
 0x17c   :  { %410 = vrot.lane.b32.xlu0 %v294_v34, %s1097_s3 }
 0x180   :  { %580 = vrot.lane.b32.xlu0 %v269_v26, %s1098_s5 }
 0x184   :  { %592 = vrot.lane.b32.xlu0 %v278_v28, %s1098_s5 }
 0x188   :  { %604 = vrot.lane.b32.xlu0 %v286_v31, %s1098_s5 }
 0x18a   :  { %370 = vrot.lane.b32.xlu1 %v270_v38, %s1097_s3 }
 0x18c   :  { %741 = vrot.lane.b32.xlu0 %v269_v26, %s1099_s25 }
 0x18e   :  { %384 = vrot.lane.b32.xlu1 %v279_v40, %s1097_s3 }
 0x190   :  { %753 = vrot.lane.b32.xlu0 %v278_v28, %s1099_s25 }
 0x192   :  { %398 = vrot.lane.b32.xlu1 %v287_v42, %s1097_s3 }
 0x194   :  { %616 = vrot.lane.b32.xlu0 %v294_v34, %s1098_s5 }
 0x196   :  { %412 = vrot.lane.b32.xlu1 %v295_v44, %s1097_s3 }
 0x198   :  { %765 = vrot.lane.b32.xlu0 %v286_v31, %s1099_s25 }
 0x19a   :  { %582 = vrot.lane.b32.xlu1 %v270_v38, %s1098_s5 }
 0x19c   :  { %777 = vrot.lane.b32.xlu0 %v294_v34, %s1099_s25 }
 0x19e   :  { %594 = vrot.lane.b32.xlu1 %v279_v40, %s1098_s5 }
 0x1a2   :  { %606 = vrot.lane.b32.xlu1 %v287_v42, %s1098_s5 }
 0x1a6   :  { %743 = vrot.lane.b32.xlu1 %v270_v38, %s1099_s25 }
 0x1aa   :  { %755 = vrot.lane.b32.xlu1 %v279_v40, %s1099_s25 }
 0x1ae   :  { %618 = vrot.lane.b32.xlu1 %v295_v44, %s1098_s5 }
 0x1b2   :  { %767 = vrot.lane.b32.xlu1 %v287_v42, %s1099_s25 }
 0x1b6   :  { %779 = vrot.lane.b32.xlu1 %v295_v44, %s1099_s25 }
 0x1bb   :  { %276 = vadd.xlane.f32.xlu0 %v275_v45 }
 0x1bf   :  { %284 = vadd.xlane.f32.xlu0 %v283_v46 }
 0x1c3   :  { %292 = vadd.xlane.f32.xlu0 %v291_v47 }
 0x1c7   :  { %300 = vadd.xlane.f32.xlu0 %v299_v48 }
 0x1da   :  { %297 = vadd.xlane.f32.xlu1 %v296_v49 }
 0x1e2   :  { %v369_v50 = vpop.permute.xlu0 %368 }
 0x1e3   :  { %v374_v51 = vsel %vm271_vm2, %v369_v50, 0.0 }
 0x1e4   :  { %375 = vadd.xlane.f32.xlu0 %v374_v51 }
 0x1e6   :  { %v383_v52 = vpop.permute.xlu0 %382 }
 0x1e7   :  { %v388_v53 = vsel %vm271_vm2, %v383_v52, 0.0 }
 0x1e8   :  { %389 = vadd.xlane.f32.xlu0 %v388_v53 }
 0x1ea   :  { %v397_v54 = vpop.permute.xlu0 %396 }
 0x1eb   :  { %v402_v55 = vsel %vm271_vm2, %v397_v54, 0.0 }
 0x1ec   :  { %403 = vadd.xlane.f32.xlu1 %v402_v55 }
 0x1ee   :  { %v411_v56 = vpop.permute.xlu0 %410 }
 0x1ef   :  { %v416_v57 = vsel %vm271_vm2, %v411_v56, 0.0 }
 0x1f0   :  { %417 = vadd.xlane.f32.xlu1 %v416_v57 }
 0x1f2   :  { %v581_v58 = vpop.permute.xlu0 %580 }
 0x1f3   :  { %v586_v59 = vsel %vm271_vm2, %v581_v58, 0.0 }
 0x1f4   :  { %587 = vadd.xlane.f32.xlu1 %v586_v59 }
 0x1f6   :  { %v593_v60 = vpop.permute.xlu0 %592 }
 0x1f7   :  { %v598_v61 = vsel %vm271_vm2, %v593_v60, 0.0 }
 0x1f8   :  { %599 = vadd.xlane.f32.xlu1 %v598_v61 }
 0x1fa   :  { %v605_v62 = vpop.permute.xlu0 %604 }
 0x1fb   :  { %v610_v63 = vsel %vm271_vm2, %v605_v62, 0.0 }
 0x1fc   :  { %611 = vadd.xlane.f32.xlu1 %v610_v63 }
 0x1fe   :  { %v1315_v0 = vpop.xlane.xlu1 %273  ;;  %v742_v2 = vpop.permute.xlu0 %741 }
 0x1ff   :  { %v747_v8 = vsel %vm271_vm2, %v742_v2, 0.0 }
 0x202   :  { %v1317_v1 = vpop.xlane.xlu1 %281  ;;  %v754_v4 = vpop.permute.xlu0 %753 }
 0x203   :  { %v759_v12 = vsel %vm271_vm2, %v754_v4, 0.0  ;;  %v302_v61 = vmax.f32 %v1315_v0, %v1317_v1 }
 0x206   :  { %v1319_v3 = vpop.xlane.xlu1 %289  ;;  %v617_v10 = vpop.permute.xlu0 %616 }
 0x207   :  { %v622_v17 = vsel %vm271_vm2, %v617_v10, 0.0  ;;  %v304_v63 = vmax.f32 %v302_v61, %v1319_v3 }
 0x20a   :  { %v371_v5 = vpop.permute.xlu1 %370  ;;  %v766_v14 = vpop.permute.xlu0 %765 }
 0x20b   :  { %v377_v6 = vsel %vm271_vm2, %v371_v5, 0.0  ;;  %v771_v20 = vsel %vm271_vm2, %v766_v14, 0.0 }
 0x20c   :  { %378 = vadd.xlane.f32.xlu1 %v377_v6 }
 0x20e   :  { %v385_v7 = vpop.permute.xlu1 %384  ;;  %v778_v23 = vpop.permute.xlu0 %777 }
 0x20f   :  { %v391_v9 = vsel %vm271_vm2, %v385_v7, 0.0  ;;  %v783_v26 = vsel %vm271_vm2, %v778_v23, 0.0 }
 0x210   :  { %748 = vadd.xlane.f32.xlu1 %v747_v8  ;;  %392 = vadd.xlane.f32.xlu0 %v391_v9 }
 0x212   :  { %v399_v11 = vpop.permute.xlu1 %398 }
 0x213   :  { %v405_v13 = vsel %vm271_vm2, %v399_v11, 0.0 }
 0x214   :  { %760 = vadd.xlane.f32.xlu1 %v759_v12  ;;  %406 = vadd.xlane.f32.xlu0 %v405_v13 }
 0x216   :  { %v413_v16 = vpop.permute.xlu1 %412 }
 0x217   :  { %v419_v18 = vsel %vm271_vm2, %v413_v16, 0.0 }
 0x218   :  { %623 = vadd.xlane.f32.xlu1 %v622_v17  ;;  %420 = vadd.xlane.f32.xlu0 %v419_v18 }
 0x21a   :  { %v583_v19 = vpop.permute.xlu1 %582 }
 0x21b   :  { %v589_v21 = vsel %vm271_vm2, %v583_v19, 0.0 }
 0x21c   :  { %772 = vadd.xlane.f32.xlu1 %v771_v20  ;;  %590 = vadd.xlane.f32.xlu0 %v589_v21 }
 0x21e   :  { %v595_v24 = vpop.permute.xlu1 %594 }
 0x21f   :  { %v601_v27 = vsel %vm271_vm2, %v595_v24, 0.0 }
 0x220   :  { %784 = vadd.xlane.f32.xlu1 %v783_v26  ;;  %602 = vadd.xlane.f32.xlu0 %v601_v27 }
 0x222   :  { %v607_v28 = vpop.permute.xlu1 %606 }
 0x223   :  { %v613_v30 = vsel %vm271_vm2, %v607_v28, 0.0 }
 0x224   :  { %614 = vadd.xlane.f32.xlu0 %v613_v30 }
 0x226   :  { %v744_v31 = vpop.permute.xlu1 %743 }
 0x227   :  { %v750_v33 = vsel %vm271_vm2, %v744_v31, 0.0 }
 0x228   :  { %751 = vadd.xlane.f32.xlu0 %v750_v33 }
 0x22a   :  { %v756_v34 = vpop.permute.xlu1 %755 }
 0x22b   :  { %v762_v35 = vsel %vm271_vm2, %v756_v34, 0.0 }
 0x22c   :  { %763 = vadd.xlane.f32.xlu0 %v762_v35 }
 0x22e   :  { %v619_v36 = vpop.permute.xlu1 %618 }
 0x22f   :  { %v625_v38 = vsel %vm271_vm2, %v619_v36, 0.0 }
 0x230   :  { %626 = vadd.xlane.f32.xlu0 %v625_v38 }
 0x232   :  { %v768_v40 = vpop.permute.xlu1 %767 }
 0x233   :  { %v774_v42 = vsel %vm271_vm2, %v768_v40, 0.0 }
 0x234   :  { %775 = vadd.xlane.f32.xlu0 %v774_v42 }
 0x236   :  { %v780_v44 = vpop.permute.xlu1 %779 }
 0x237   :  { %v786_v45 = vsel %vm271_vm2, %v780_v44, 0.0  ;;  %v483_v44 = vld [vmem:[%s1499_s6 + $0x10] sm:$0xff] }
 0x238   :  { %787 = vadd.xlane.f32.xlu0 %v786_v45  ;;  %v484_v45 = vld [vmem:[%s1499_s6 + $0x18] sm:$0xff] }
 0x248   :  { %v277_v46 = vpop.xlane.xlu0 %276 }
 0x24c   :  { %v285_v47 = vpop.xlane.xlu0 %284 }
 0x24d   :  { %v303_v49 = vmax.f32 %v277_v46, %v285_v47 }
 0x250   :  { %v293_v48 = vpop.xlane.xlu0 %292 }
 0x251   :  { %v305_v50 = vmax.f32 %v303_v49, %v293_v48 }
 0x254   :  { %v301_v51 = vpop.xlane.xlu0 %300 }
 0x255   :  { %v307_v52 = vmax.f32 %v305_v50, %v301_v51 }
 0x257   :  { %v309_v53 = vsub.f32 %v277_v46, %v307_v52  ;;  %v315_v54 = vsub.f32 %v285_v47, %v307_v52  ;;  %v321_v57 = vsub.f32 %v293_v48, %v307_v52  ;;  %v327_v59 = vsub.f32 %v301_v51, %v307_v52 }
 0x258   :  { %v485_v52 = vpack.c.bf16 %v484_v45, %v483_v44 }
 0x259   :  { %v312_v55 = vmul.f32 1.442695, %v309_v53  ;;  %v318_v56 = vmul.f32 1.442695, %v315_v54  ;;  %v324_v58 = vmul.f32 1.442695, %v321_v57 }
 0x25a   :  { %v330_v60 = vmul.f32 1.442695, %v327_v59  ;;  %979 = vmatpush3.bf16.msra.mxu0 %v485_v52 }
 0x25b   :  { %1014 = vpow2.f32 %v312_v55  ;;  %984 = vmatprep.subr.bf16.mxu0 %v1095_v15 }
 0x25c   :  { %1016 = vpow2.f32 %v318_v56 }
 0x25d   :  { %1018 = vpow2.f32 %v324_v58 }
 0x25e   :  { %1020 = vpow2.f32 %v330_v60 }
 0x265   :  { %v1015_v62 = vpop.eup %1014 }
 0x266   :  { %v1017_v2 = vpop.eup %1016 }
 0x267   :  { %v298_v4 = vpop.xlane.xlu1 %297  ;;  %v333_v6 = vadd.f32 %v1017_v2, %v1015_v62  ;;  %v1019_v13 = vpop.eup %1018 }
 0x268   :  { %v306_v5 = vmax.f32 %v304_v63, %v298_v4  ;;  %v1021_v18 = vpop.eup %1020 }
 0x269   :  { %v335_v16 = vadd.f32 %v1019_v13, %v333_v6 }
 0x26a   :  { %v308_v7 = vsub.f32 %v1315_v0, %v306_v5  ;;  %v314_v8 = vsub.f32 %v1317_v1, %v306_v5  ;;  %v320_v9 = vsub.f32 %v1319_v3, %v306_v5  ;;  %v326_v10 = vsub.f32 %v298_v4, %v306_v5 }
 0x26b   :  { %v337_v19 = vadd.f32 %v1021_v18, %v335_v16 }
 0x26c   :  { %v310_v11 = vmul.f32 1.442695, %v308_v7  ;;  %v316_v12 = vmul.f32 1.442695, %v314_v8  ;;  %v322_v14 = vmul.f32 1.442695, %v320_v9 }
 0x26d   :  { %v328_v17 = vmul.f32 1.442695, %v326_v10 }
 0x26e   :  { %1022 = vpow2.f32 %v310_v11 }
 0x26f   :  { %1024 = vpow2.f32 %v316_v12 }
 0x270   :  { %1026 = vpow2.f32 %v322_v14 }
 0x271   :  { %1028 = vpow2.f32 %v328_v17  ;;  %v376_v28 = vpop.xlane.xlu0 %375 }
 0x272   :  { %1030 = vrcp.f32 %v337_v19 }
 0x275   :  { %v390_v36 = vpop.xlane.xlu0 %389 }
 0x276   :  { %v422_v50 = vmax.f32 %v376_v28, %v390_v36 }
 0x278   :  { %v1023_v20 = vpop.eup %1022 }
 0x279   :  { %v1025_v0 = vpop.eup %1024  ;;  %v404_v24 = vpop.xlane.xlu1 %403 }
 0x27a   :  { %v332_v21 = vadd.f32 %v1025_v0, %v1023_v20  ;;  %v1027_v1 = vpop.eup %1026  ;;  %v424_v57 = vmax.f32 %v422_v50, %v404_v24 }
 0x27b   :  { %v1029_v3 = vpop.eup %1028 }
 0x27c   :  { %v334_v23 = vadd.f32 %v1027_v1, %v332_v21  ;;  %v1031_v27 = vpop.eup %1030 }
 0x27d   :  { %v418_v30 = vpop.xlane.xlu1 %417  ;;  %v341_v31 = vmul.f32 %v1031_v27, %v1015_v62  ;;  %v345_v33 = vmul.f32 %v1031_v27, %v1017_v2  ;;  %v351_v40 = vmul.f32 %v1031_v27, %v1019_v13  ;;  %v357_v51 = vmul.f32 %v1031_v27, %v1021_v18 }
 0x27e   :  { %v336_v26 = vadd.f32 %v1029_v3, %v334_v23  ;;  %v426_v62 = vmax.f32 %v424_v57, %v418_v30 }
 0x27f   :  { %v343_v34 = vmul.f32 %v341_v31, %v1287_v37  ;;  %v347_v35 = vmul.f32 %v345_v33, %v1290_v39  ;;  %v353_v55 = vmul.f32 %v351_v40, %v1294_v41  ;;  %v359_v4 = vmul.f32 %v357_v51, %v1298_v43 }
 0x280   :  { %1032 = vrcp.f32 %v336_v26  ;;  %v428_v7 = vsub.f32 %v376_v28, %v426_v62  ;;  %v434_v8 = vsub.f32 %v390_v36, %v426_v62  ;;  %v440_v14 = vsub.f32 %v404_v24, %v426_v62 }
 0x281   :  { %v1346_v38 = vpop.xlane.xlu1 %587  ;;  %v349_v48 = vadd.f32 %v347_v35, %v343_v34  ;;  %v446_v19 = vsub.f32 %v418_v30, %v426_v62 }
 0x282   :  { %v430_v11 = vmul.f32 1.442695, %v428_v7  ;;  %v436_v12 = vmul.f32 1.442695, %v434_v8  ;;  %v442_v18 = vmul.f32 1.442695, %v440_v14 }
 0x283   :  { %v355_v61 = vadd.f32 %v353_v55, %v349_v48  ;;  %v448_v23 = vmul.f32 1.442695, %v446_v19 }
 0x284   :  { %1034 = vpow2.f32 %v430_v11 }
 0x285   :  { %v600_v58 = vpop.xlane.xlu1 %599  ;;  %v361_v6 = vadd.f32 %v359_v4, %v355_v61  ;;  %1036 = vpow2.f32 %v436_v12 }
 0x286   :  { %v628_v21 = vmax.f32 %v1346_v38, %v600_v58  ;;  %1038 = vpow2.f32 %v442_v18 }
 0x287   :  { %1040 = vpow2.f32 %v448_v23 }
 0x289   :  { %v612_v9 = vpop.xlane.xlu1 %611 }
 0x28a   :  { %v1033_v42 = vpop.eup %1032 }
 0x28b   :  { %v340_v46 = vmul.f32 %v1033_v42, %v1023_v20  ;;  %v344_v47 = vmul.f32 %v1033_v42, %v1025_v0  ;;  %v350_v49 = vmul.f32 %v1033_v42, %v1027_v1  ;;  %v356_v56 = vmul.f32 %v1033_v42, %v1029_v3 }
 0x28c   :  { %v630_v3 = vmax.f32 %v628_v21, %v612_v9 }
 0x28d   :  { %v342_v53 = vmul.f32 %v340_v46, %v1268_v22  ;;  %v346_v54 = vmul.f32 %v344_v47, %v1270_v25  ;;  %v352_v60 = vmul.f32 %v350_v49, %v1276_v29  ;;  %v358_v2 = vmul.f32 %v356_v56, %v1281_v32 }
 0x28e   :  { %v1362_v31 = vpop.eup %1034 }
 0x28f   :  { %v348_v59 = vadd.f32 %v346_v54, %v342_v53  ;;  %v1364_v34 = vpop.eup %1036 }
 0x290   :  { %v452_v44 = vadd.f32 %v1364_v34, %v1362_v31  ;;  %v1371_v51 = vpop.eup %1038 }
 0x291   :  { %v354_v63 = vadd.f32 %v352_v60, %v348_v59 }
 0x292   :  { %v454_v55 = vadd.f32 %v1371_v51, %v452_v44 }
 0x293   :  { %v360_v5 = vadd.f32 %v358_v2, %v354_v63 }
 0x295   :  { %v362_v10 = vpack.c.bf16 %v361_v6, %v360_v5 }
 0x297   :  { %534 = vrot.lane.b32.xlu0 %v362_v10, %s1100_s28 }
 0x299   :  { %v379_v13 = vpop.xlane.xlu1 %378 }
 0x29d   :  { %v749_v16 = vpop.xlane.xlu1 %748  ;;  %v393_v17 = vpop.xlane.xlu0 %392 }
 0x29e   :  { %v423_v1 = vmax.f32 %v379_v13, %v393_v17 }
 0x2a1   :  { %v761_v20 = vpop.xlane.xlu1 %760  ;;  %v407_v0 = vpop.xlane.xlu0 %406 }
 0x2a2   :  { %v425_v26 = vmax.f32 %v423_v1, %v407_v0  ;;  %v789_v45 = vmax.f32 %v749_v16, %v761_v20 }
 0x2a5   :  { %v624_v27 = vpop.xlane.xlu1 %623  ;;  %v421_v28 = vpop.xlane.xlu0 %420 }
 0x2a6   :  { %v632_v24 = vmax.f32 %v630_v3, %v624_v27  ;;  %v427_v33 = vmax.f32 %v425_v26, %v421_v28 }
 0x2a8   :  { %v634_v30 = vsub.f32 %v1346_v38, %v632_v24  ;;  %v429_v35 = vsub.f32 %v379_v13, %v427_v33  ;;  %v435_v36 = vsub.f32 %v393_v17, %v427_v33  ;;  %v640_v46 = vsub.f32 %v600_v58, %v632_v24  ;;  %v1374_v58 = vpop.eup %1040 }
 0x2a9   :  { %v773_v40 = vpop.xlane.xlu1 %772  ;;  %v1367_v42 = vpop.xlane.xlu0 %590  ;;  %v441_v48 = vsub.f32 %v407_v0, %v427_v33  ;;  %v447_v53 = vsub.f32 %v421_v28, %v427_v33  ;;  %v646_v59 = vsub.f32 %v612_v9, %v632_v24  ;;  %v456_v4 = vadd.f32 %v1374_v58, %v454_v55 }
 0x2aa   :  { %v636_v47 = vmul.f32 1.442695, %v634_v30  ;;  %v432_v49 = vmul.f32 1.442695, %v429_v35  ;;  %v791_v50 = vmax.f32 %v789_v45, %v773_v40  ;;  %v438_v52 = vmul.f32 1.442695, %v435_v36 }
 0x2ab   :  { %v642_v56 = vmul.f32 1.442695, %v640_v46  ;;  %v444_v60 = vmul.f32 1.442695, %v441_v48  ;;  %v450_v62 = vmul.f32 1.442695, %v447_v53  ;;  %v652_v6 = vsub.f32 %v624_v27, %v632_v24 }
 0x2ac   :  { %1042 = vpow2.f32 %v636_v47  ;;  %v648_v5 = vmul.f32 1.442695, %v646_v59 }
 0x2ad   :  { %v785_v54 = vpop.xlane.xlu1 %784  ;;  %v603_v38 = vpop.xlane.xlu0 %602  ;;  %1044 = vpow2.f32 %v432_v49  ;;  %v654_v11 = vmul.f32 1.442695, %v652_v6 }
 0x2ae   :  { %v793_v57 = vmax.f32 %v791_v50, %v785_v54  ;;  %1046 = vpow2.f32 %v438_v52 }
 0x2af   :  { %1048 = vpow2.f32 %v642_v56 }
 0x2b0   :  { %v795_v61 = vsub.f32 %v749_v16, %v793_v57  ;;  %v801_v63 = vsub.f32 %v761_v20, %v793_v57  ;;  %1050 = vpow2.f32 %v444_v60  ;;  %v807_v9 = vsub.f32 %v773_v40, %v793_v57 }
 0x2b1   :  { %v615_v2 = vpop.xlane.xlu0 %614  ;;  %1052 = vpow2.f32 %v450_v62  ;;  %v629_v16 = vmax.f32 %v1367_v42, %v603_v38  ;;  %v813_v19 = vsub.f32 %v785_v54, %v793_v57 }
 0x2b2   :  { %v797_v7 = vmul.f32 1.442695, %v795_v61  ;;  %v803_v8 = vmul.f32 1.442695, %v801_v63  ;;  %1054 = vrcp.f32 %v456_v4  ;;  %v809_v18 = vmul.f32 1.442695, %v807_v9 }
 0x2b3   :  { %1056 = vpow2.f32 %v648_v5  ;;  %v631_v21 = vmax.f32 %v629_v16, %v615_v2  ;;  %v815_v24 = vmul.f32 1.442695, %v813_v19 }
 0x2b4   :  { %1058 = vpow2.f32 %v797_v7 }
 0x2b5   :  { %v1377_v10 = vpop.xlane.xlu0 %751  ;;  %1060 = vpow2.f32 %v803_v8 }
 0x2b6   :  { %v1379_v12 = vpop.eup %1042  ;;  %1062 = vpow2.f32 %v654_v11 }
 0x2b7   :  { %v1381_v14 = vpop.eup %1044  ;;  %1064 = vpow2.f32 %v809_v18 }
 0x2b8   :  { %v1384_v17 = vpop.eup %1046 }
 0x2b9   :  { %v764_v13 = vpop.xlane.xlu0 %763  ;;  %v1386_v20 = vpop.eup %1048  ;;  %v453_v0 = vadd.f32 %v1384_v17, %v1381_v14 }
 0x2ba   :  { %v1051_v1 = vpop.eup %1050  ;;  %v658_v28 = vadd.f32 %v1386_v20, %v1379_v12  ;;  %v790_v48 = vmax.f32 %v1377_v10, %v764_v13 }
 0x2bb   :  { %v455_v3 = vadd.f32 %v1051_v1, %v453_v0  ;;  %v1390_v27 = vpop.eup %1052 }
 0x2bc   :  { %v1055_v33 = vpop.eup %1054 }
 0x2bd   :  { %v627_v23 = vpop.xlane.xlu0 %626  ;;  %v457_v30 = vadd.f32 %v1390_v27, %v455_v3  ;;  %v1396_v40 = vpop.eup %1056  ;;  %v464_v55 = vmul.f32 %v1055_v33, %v1364_v34  ;;  %v470_v11 = vmul.f32 %v1055_v33, %v1371_v51  ;;  %v476_v51 = vmul.f32 %v1055_v33, %v1374_v58 }
 0x2be   :  { %v633_v26 = vmax.f32 %v631_v21, %v627_v23  ;;  %v1398_v47 = vpop.eup %1058  ;;  %v660_v53 = vadd.f32 %v1396_v40, %v658_v28 }
 0x2bf   :  { %1066 = vrcp.f32 %v457_v30  ;;  %v1401_v52 = vpop.eup %1060  ;;  %v466_v34 = vmul.f32 %v464_v55, %v1270_v25  ;;  %v472_v28 = vmul.f32 %v470_v11, %v1276_v29  ;;  %v478_v58 = vmul.f32 %v476_v51, %v1281_v32 }
 0x2c0   :  { %v635_v35 = vsub.f32 %v1367_v42, %v633_v26  ;;  %v641_v36 = vsub.f32 %v603_v38, %v633_v26  ;;  %v647_v44 = vsub.f32 %v615_v2, %v633_v26  ;;  %v653_v45 = vsub.f32 %v627_v23, %v633_v26  ;;  %v1406_v59 = vpop.eup %1062 }
 0x2c1   :  { %v776_v46 = vpop.xlane.xlu0 %775  ;;  %1068 = vpow2.f32 %v815_v24  ;;  %v460_v42 = vmul.f32 %v1055_v33, %v1362_v31  ;;  %v819_v60 = vadd.f32 %v1401_v52, %v1398_v47  ;;  %v662_v62 = vadd.f32 %v1406_v59, %v660_v53  ;;  %v1414_v5 = vpop.eup %1064  ;;  %v690_v53 = vld [vmem:[%s1499_s6 + $0x28] sm:$0xff] }
 0x2c2   :  { %v638_v49 = vmul.f32 1.442695, %v635_v35  ;;  %v644_v50 = vmul.f32 1.442695, %v641_v36  ;;  %v650_v54 = vmul.f32 1.442695, %v647_v44  ;;  %v792_v38 = vmax.f32 %v790_v48, %v776_v46 }
 0x2c3   :  { %v656_v56 = vmul.f32 1.442695, %v653_v45  ;;  %v462_v63 = vmul.f32 %v460_v42, %v1268_v22  ;;  %v821_v7 = vadd.f32 %v1414_v5, %v819_v60 }
 0x2c4   :  { %1070 = vpow2.f32 %v638_v49 }
 0x2c5   :  { %1072 = vpow2.f32 %v644_v50  ;;  %v788_v57 = vpop.xlane.xlu0 %787 }
 0x2c6   :  { %v794_v61 = vmax.f32 %v792_v38, %v788_v57  ;;  %1074 = vpow2.f32 %v650_v54 }
 0x2c7   :  { %1076 = vpow2.f32 %v656_v56 }
 0x2c8   :  { %v796_v31 = vsub.f32 %v1377_v10, %v794_v61  ;;  %v802_v2 = vsub.f32 %v764_v13, %v794_v61  ;;  %v808_v4 = vsub.f32 %v776_v46, %v794_v61  ;;  %v814_v6 = vsub.f32 %v788_v57, %v794_v61 }
 0x2c9   :  { %1078 = vrcp.f32 %v662_v62  ;;  %v1067_v18 = vpop.eup %1066  ;;  %v468_v10 = vadd.f32 %v466_v34, %v462_v63 }
 0x2ca   :  { %v799_v8 = vmul.f32 1.442695, %v796_v31  ;;  %v805_v9 = vmul.f32 1.442695, %v802_v2  ;;  %v811_v16 = vmul.f32 1.442695, %v808_v4  ;;  %v461_v0 = vmul.f32 %v1067_v18, %v1381_v14 }
 0x2cb   :  { %v817_v19 = vmul.f32 1.442695, %v814_v6  ;;  %v1418_v13 = vpop.eup %1068  ;;  %v465_v21 = vmul.f32 %v1067_v18, %v1384_v17  ;;  %v471_v23 = vmul.f32 %v1067_v18, %v1051_v1  ;;  %v477_v36 = vmul.f32 %v1067_v18, %v1390_v27  ;;  %v689_v27 = vld [vmem:[%s1499_s6 + $0x20] sm:$0xff] }
 0x2cc   :  { %1080 = vpow2.f32 %v799_v8  ;;  %v823_v26 = vadd.f32 %v1418_v13, %v821_v7  ;;  %v463_v30 = vmul.f32 %v461_v0, %v1287_v37  ;;  %v474_v45 = vadd.f32 %v472_v28, %v468_v10 }
 0x2cd   :  { %1082 = vpow2.f32 %v805_v9  ;;  %v467_v35 = vmul.f32 %v465_v21, %v1290_v39  ;;  %v473_v1 = vmul.f32 %v471_v23, %v1294_v41  ;;  %v479_v33 = vmul.f32 %v477_v36, %v1298_v43 }
 0x2ce   :  { %v1071_v3 = vpop.eup %1070  ;;  %1084 = vpow2.f32 %v811_v16  ;;  %v480_v42 = vadd.f32 %v478_v58, %v474_v45  ;;  %v691_v55 = vpack.c.bf16 %v690_v53, %v689_v27 }
 0x2cf   :  { %v1073_v24 = vpop.eup %1072  ;;  %1086 = vpow2.f32 %v817_v19  ;;  %v469_v17 = vadd.f32 %v467_v35, %v463_v30 }
 0x2d0   :  { %v659_v44 = vadd.f32 %v1073_v24, %v1071_v3  ;;  %v1075_v14 = vpop.eup %1074  ;;  %1088 = vrcp.f32 %v823_v26  ;;  %991 = vmatpush3.bf16.msra.mxu1 %v691_v55 }
 0x2d1   :  { %v1077_v48 = vpop.eup %1076  ;;  %v475_v49 = vadd.f32 %v473_v1, %v469_v17 }
 0x2d2   :  { %v661_v46 = vadd.f32 %v1075_v14, %v659_v44 }
 0x2d3   :  { %v1079_v54 = vpop.eup %1078  ;;  %v481_v38 = vadd.f32 %v479_v33, %v475_v49 }
 0x2d4   :  { %v663_v50 = vadd.f32 %v1077_v48, %v661_v46  ;;  %v666_v62 = vmul.f32 %v1079_v54, %v1379_v12  ;;  %v670_v63 = vmul.f32 %v1079_v54, %v1386_v20  ;;  %v676_v9 = vmul.f32 %v1079_v54, %v1396_v40 }
 0x2d5   :  { %v482_v60 = vpack.c.bf16 %v481_v38, %v480_v42  ;;  %v682_v21 = vmul.f32 %v1079_v54, %v1406_v59 }
 0x2d6   :  { %v1081_v56 = vpop.eup %1080  ;;  %1090 = vrcp.f32 %v663_v50  ;;  %v668_v6 = vmul.f32 %v666_v62, %v1268_v22  ;;  %v672_v7 = vmul.f32 %v670_v63, %v1270_v25  ;;  %v678_v0 = vmul.f32 %v676_v9, %v1276_v29 }
 0x2d7   :  { %v1083_v57 = vpop.eup %1082  ;;  %487 = vrot.lane.b32.xlu1 %v482_v60, %s1101_s10 }
 0x2d8   :  { %v820_v61 = vadd.f32 %v1083_v57, %v1081_v56  ;;  %v1085_v31 = vpop.eup %1084  ;;  %v674_v16 = vadd.f32 %v672_v7, %v668_v6 }
 0x2d9   :  { %v1087_v4 = vpop.eup %1086 }
 0x2da   :  { %v822_v2 = vadd.f32 %v1085_v31, %v820_v61  ;;  %v1089_v8 = vpop.eup %1088  ;;  %v680_v51 = vadd.f32 %v678_v0, %v674_v16 }
 0x2db   :  { %v827_v12 = vmul.f32 %v1089_v8, %v1398_v47  ;;  %v831_v20 = vmul.f32 %v1089_v8, %v1401_v52 }
 0x2dc   :  { %v824_v34 = vadd.f32 %v1087_v4, %v822_v2 }
 0x2dd   :  { %v829_v40 = vmul.f32 %v827_v12, %v1268_v22  ;;  %v833_v30 = vmul.f32 %v831_v20, %v1270_v25  ;;  %v843_v25 = vmul.f32 %v1089_v8, %v1418_v13 }
 0x2de   :  { %1092 = vrcp.f32 %v824_v34 }
 0x2df   :  { %v845_v54 = vmul.f32 %v843_v25, %v1281_v32 }
 0x2e0   :  { %v1091_v11 = vpop.eup %1090 }
 0x2e1   :  { %v667_v18 = vmul.f32 %v1091_v11, %v1071_v3  ;;  %v671_v19 = vmul.f32 %v1091_v11, %v1073_v24  ;;  %v677_v10 = vmul.f32 %v1091_v11, %v1075_v14  ;;  %v683_v28 = vmul.f32 %v1091_v11, %v1077_v48 }
 0x2e2   :  { %v684_v3 = vmul.f32 %v682_v21, %v1281_v32  ;;  %v837_v24 = vmul.f32 %v1089_v8, %v1414_v5  ;;  %v835_v14 = vadd.f32 %v833_v30, %v829_v40  ;;  %v850_v32 = vld [vmem:[%s1499_s6 + $0x30] sm:$0xff] }
 0x2e3   :  { %v669_v23 = vmul.f32 %v667_v18, %v1287_v37  ;;  %v673_v26 = vmul.f32 %v671_v19, %v1290_v39  ;;  %v679_v52 = vmul.f32 %v677_v10, %v1294_v41  ;;  %v685_v59 = vmul.f32 %v683_v28, %v1298_v43  ;;  %v928_v10 = vld [vmem:[%s1500_s7] ss:$0 sm:$0xff] }
 0x2e4   :  { %v686_v44 = vadd.f32 %v684_v3, %v680_v51  ;;  %v839_v22 = vmul.f32 %v837_v24, %v1276_v29 }
 0x2e5   :  { %v675_v47 = vadd.f32 %v673_v26, %v669_v23 }
 0x2e6   :  { %v841_v27 = vadd.f32 %v839_v22, %v835_v14 }
 0x2e7   :  { %v681_v35 = vadd.f32 %v679_v52, %v675_v47 }
 0x2e8   :  { %v1093_v36 = vpop.eup %1092  ;;  %v847_v29 = vadd.f32 %v845_v54, %v841_v27 }
 0x2e9   :  { %v687_v17 = vadd.f32 %v685_v59, %v681_v35  ;;  %v828_v1 = vmul.f32 %v1093_v36, %v1081_v56  ;;  %v832_v45 = vmul.f32 %v1093_v36, %v1083_v57  ;;  %v838_v46 = vmul.f32 %v1093_v36, %v1085_v31 }
 0x2ea   :  { %v844_v5 = vmul.f32 %v1093_v36, %v1087_v4 }
 0x2eb   :  { %v688_v48 = vpack.c.bf16 %v687_v17, %v686_v44  ;;  %v830_v49 = vmul.f32 %v828_v1, %v1287_v37  ;;  %v834_v58 = vmul.f32 %v832_v45, %v1290_v39  ;;  %v840_v50 = vmul.f32 %v838_v46, %v1294_v41  ;;  %v363_v37 = vld [vmem:[%s1499_s6] sm:$0xff]  ;;  %v364_v39 = vld [vmem:[%s1499_s6 + $0x8] sm:$0xff] }
 0x2ec   :  { %v846_v42 = vmul.f32 %v844_v5, %v1298_v43  ;;  %v365_v41 = vpack.c.bf16 %v364_v39, %v363_v37  ;;  %v851_v43 = vld [vmem:[%s1499_s6 + $0x38] sm:$0xff] }
 0x2ed   :  { %693 = vrot.lane.b32.xlu1 %v688_v48, %s1102_s11  ;;  %v836_v33 = vadd.f32 %v834_v58, %v830_v49  ;;  %v852_v56 = vpack.c.bf16 %v851_v43, %v850_v32 }
 0x2ef   :  { %v842_v53 = vadd.f32 %v840_v50, %v836_v33 }
 0x2f1   :  { %v848_v38 = vadd.f32 %v846_v42, %v842_v53 }
 0x2f3   :  { %v849_v13 = vpack.c.bf16 %v848_v38, %v847_v29 }
 0x2f5   :  { %854 = vrot.lane.b32.xlu1 %v849_v13, %s1103_s12 }
 0x309   :  { %v535_v57 = vpop.permute.xlu0 %534 }
 0x349   :  { %v488_v55 = vpop.permute.xlu1 %487 }
 0x34a   :  { %981 = vmatmul.mubr.msk.bf16.vlgmr.msra.gmra.mrb[4].mxu0 %vm271_vm2, %v488_v55 }
 0x34b   :  { %985 = vmatpush3.bf16.msra.mxu0 %v365_v41  ;;  %986 = vmatprep.mubr.msk.bf16.mxu0 %vm1096_vm0, %v1095_v15 }
 0x34c   :  { %996 = vmatprep.subr.bf16.mxu0 %v1095_v15 }
 0x352   :  { %987 = vmatmul.mubr.msk.bf16.vlgmr.msra.gmra.mrb[8].mxu0 %vm271_vm2, %v535_v57 }
 0x353   :  { %997 = vmatpush3.bf16.msra.mxu0 %v852_v56  ;;  %998 = vmatprep.mubr.msk.bf16.mxu0 %vm1096_vm0, %v1095_v15 }
 0x35f   :  { %v694_v60 = vpop.permute.xlu1 %693 }
 0x360   :  { %993 = vmatmul.mubr.msk.bf16.vlgmr.msra.gmra.mrb[8].mxu1 %vm271_vm2, %v694_v60 }
 0x367   :  { %v855_v61 = vpop.permute.xlu1 %854 }
 0x368   :  { %999 = vmatmul.mubr.msk.bf16.vlgmr.msra.gmra.mrb[12].mxu0 %vm271_vm2, %v855_v61 }
 0x41d   :  { %v526_v62 = vpop.f32.mrb[4].mxu0 }
 0x41e   :  { %v982_v63 = vpop.f32.mrb[5].mxu0 }
 0x41f   :  { %v529_v31 = vpop.f32.mrb[6].mxu0 }
 0x420   :  { %v983_v2 = vpop.f32.mrb[7].mxu0 }
 0x425   :  { %v573_v4 = vpop.f32.mrb[8].mxu0 }
 0x426   :  { %v574_v34 = vadd.f32 %v573_v4, %v526_v62  ;;  %v988_v6 = vpop.f32.mrb[9].mxu0 }
 0x427   :  { %v576_v7 = vpop.f32.mrb[10].mxu0 }
 0x428   :  { %v577_v8 = vadd.f32 %v576_v7, %v529_v31  ;;  %v989_v9 = vpop.f32.mrb[11].mxu0 }
 0x433   :  { %v732_v11 = vpop.f32.mrb[8].mxu1 }
 0x434   :  { %v739_v16 = vadd.f32 %v732_v11, %v574_v34  ;;  %v994_v12 = vpop.f32.mrb[9].mxu1 }
 0x435   :  { %v735_v15 = vpop.f32.mrb[10].mxu1 }
 0x436   :  { %v740_v20 = vadd.f32 %v735_v15, %v577_v8  ;;  %v995_v18 = vpop.f32.mrb[11].mxu1 }
 0x43b   :  { %v893_v19 = vpop.f32.mrb[12].mxu0 }
 0x43c   :  { %v900_v0 = vadd.f32 %v893_v19, %v739_v16  ;;  %v1000_v21 = vpop.f32.mrb[13].mxu0 }
 0x43d   :  { %v896_v23 = vpop.f32.mrb[14].mxu0 }
 0x43e   :  { %v909_v26 = vadd.f32 %v928_v10, %v900_v0  ;;  %v901_v28 = vadd.f32 %v896_v23, %v740_v20  ;;  %v1001_v51 = vpop.f32.mrb[15].mxu0 }
 0x440   :  { %911 = vst.msk [vmem:[%s1501_s8] sm:$0xff] %vm122_vm1, %v909_v26  ;;  %v910_v40 = vadd.f32 %v928_v10, %v901_v28 }
 0x442   :  { %912 = vst.msk [vmem:[%s1501_s8 + $0x8] sm:$0xff] %vm122_vm1, %v910_v40 }

</bundles_post_ra>
